<compile_context>
chip_gen: v7x
topology: tpu7x:2x2x1
jax: 0.10.0
libtpu: 0.0.40
codegen_flags: <defaults>
</compile_context>

<pallas_src>
import functools

import jax
import jax.numpy as jnp
from jax.experimental import pallas as pl
from jax.experimental.pallas import tpu as pltpu


# ----------------------------- Pallas kernels ------------------------------

def _mm_bias_act_kernel(x_ref, w_ref, b_ref, o_ref, *, act):
    """Single-K-step matmul + bias (+ReLU).  grid = (M/tm,)."""
    r = jnp.dot(x_ref[...], w_ref[...], preferred_element_type=jnp.float32)
    r = r + b_ref[...]
    if act:
        r = jnp.maximum(r, 0.0)
    o_ref[...] = r.astype(o_ref.dtype)


def _maxpool_kernel(p_ref, o_ref):
    """Max over the window axis of (tm, KK, C) patches.

    Unrolled elementwise maxima over 2-D (tm, C) slabs: keeps the reduction on
    the VPU (no cross-sublane XLU reduce) and avoids sublane padding of KK.
    """
    acc = p_ref[:, 0, :]
    for k in range(1, p_ref.shape[1]):
        acc = jnp.maximum(acc, p_ref[:, k, :])
    o_ref[...] = acc


# ----------------------------- Pallas wrappers ------------------------------

_VMEM_LIMIT = 32 * 1024 * 1024  # explicit scoped-VMEM budget (safe on v5e..v7x)


def _round_up(v, m):
    return (v + m - 1) // m * m


def matmul_bias_act(x, w, b, *, act):
    """y = act(x @ w + b) in a row-blocked Pallas kernel.

    All matmuls in this model have K <= 2048 and N <= 128, so K and N each fit
    in a single block (no accumulator scratch needed).  tm adapts to M so the
    (B, .) fc path uses an 8-row tile instead of padding to 128.
    """
    M, K = x.shape
    K2, N = w.shape
    assert K == K2 and b.shape == (N,)
    Kp = _round_up(K, 128)
    Np = _round_up(N, 128)
    tm = min(128, _round_up(M, 8))
    Mp = _round_up(M, tm)
    # bf16 operands, f32 accumulation on the MXU.
    xp = jnp.pad(x, ((0, Mp - M), (0, Kp - K))).astype(jnp.bfloat16)
    wp = jnp.pad(w, ((0, Kp - K), (0, Np - N))).astype(jnp.bfloat16)
    bp = jnp.pad(b, (0, Np - N)).reshape(1, Np).astype(jnp.float32)
    out = pl.pallas_call(
        functools.partial(_mm_bias_act_kernel, act=act),
        out_shape=jax.ShapeDtypeStruct((Mp, Np), jnp.float32),
        grid_spec=pltpu.PrefetchScalarGridSpec(
            num_scalar_prefetch=0,
            grid=(Mp // tm,),
            in_specs=[
                pl.BlockSpec((tm, Kp), lambda i: (i, 0)),
                pl.BlockSpec((Kp, Np), lambda i: (0, 0)),
                pl.BlockSpec((1, Np), lambda i: (0, 0)),
            ],
            out_specs=pl.BlockSpec((tm, Np), lambda i: (i, 0)),
        ),
        compiler_params=pltpu.CompilerParams(
            dimension_semantics=("parallel",),
            vmem_limit_bytes=_VMEM_LIMIT),
    )(xp, wp, bp)
    return out[:M, :N]


def max_pool(x, k, stride):
    """NHWC max pool via patches + a row-blocked Pallas max kernel."""
    patches, Ho, Wo = extract_patches(x, k, k, stride, 0)
    B = x.shape[0]
    KK, C = patches.shape[3], patches.shape[4]
    M = B * Ho * Wo
    p = patches.reshape(M, KK, C)
    tm = min(256, _round_up(M, 8))
    Mp = _round_up(M, tm)
    p = jnp.pad(p, ((0, Mp - M), (0, 0), (0, 0)))
    out = pl.pallas_call(
        _maxpool_kernel,
        out_shape=jax.ShapeDtypeStruct((Mp, C), jnp.float32),
        grid_spec=pltpu.PrefetchScalarGridSpec(
            num_scalar_prefetch=0,
            grid=(Mp // tm,),
            in_specs=[pl.BlockSpec((tm, KK, C), lambda i: (i, 0, 0))],
            out_specs=pl.BlockSpec((tm, C), lambda i: (i, 0)),
        ),
        compiler_params=pltpu.CompilerParams(
            dimension_semantics=("parallel",),
            vmem_limit_bytes=_VMEM_LIMIT),
    )(p)
    return out[:M].reshape(B, Ho, Wo, C)


# ------------------------------- JAX glue -----------------------------------

def extract_patches(x, kh, kw, stride, pad):
    """NHWC -> (B, Ho, Wo, kh*kw, C) sliding-window patches (plain-JAX glue)."""
    if pad:
        x = jnp.pad(x, ((0, 0), (pad, pad), (pad, pad), (0, 0)))
    B, H, W, C = x.shape
    Ho = (H - kh) // stride + 1
    Wo = (W - kw) // stride + 1
    cols = []
    for dy in range(kh):
        for dx in range(kw):
            cols.append(x[:, dy:dy + stride * Ho:stride,
                          dx:dx + stride * Wo:stride, :])
    return jnp.stack(cols, axis=3), Ho, Wo


def conv_bn_relu(x, p, stride, pad):
    """BasicConv2d: conv (no bias) + folded eval-mode BatchNorm + ReLU."""
    kh, kw, cin, cout = p["w"].shape
    patches, Ho, Wo = extract_patches(x, kh, kw, stride, pad)
    B = x.shape[0]
    cols = patches.reshape(B * Ho * Wo, kh * kw * cin)
    y = matmul_bias_act(cols, p["w"].reshape(kh * kw * cin, cout), p["b"],
                        act=True)
    return y.reshape(B, Ho, Wo, cout)


# ---------------------------- parameter setup --------------------------------

def _conv_params(key, kh, kw, cin, cout):
    k = jax.random.split(key, 5)
    w = jax.random.normal(k[0], (kh, kw, cin, cout), jnp.float32)
    w = w * (1.0 / (kh * kw * cin) ** 0.5)
    gamma = 1.0 + 0.1 * jax.random.normal(k[1], (cout,), jnp.float32)
    beta = 0.1 * jax.random.normal(k[2], (cout,), jnp.float32)
    mean = 0.1 * jax.random.normal(k[3], (cout,), jnp.float32)
    var = jnp.abs(jax.random.normal(k[4], (cout,), jnp.float32)) + 0.5
    scale = gamma / jnp.sqrt(var + 1e-3)  # BN eps = 0.001 as in BasicConv2d
    return {"w": w * scale, "b": beta - mean * scale}


def init_params(key, num_classes=3):
    keys = jax.random.split(key, 12)
    p = {}
    # reduced stem
    p["conv1"] = _conv_params(keys[0], 3, 3, 3, 8)
    p["conv2"] = _conv_params(keys[1], 3, 3, 8, 16)
    # Inception-A style block
    p["b1_1x1"] = _conv_params(keys[2], 1, 1, 16, 16)
    p["b5_1x1"] = _conv_params(keys[3], 1, 1, 16, 8)
    p["b5_5x5"] = _conv_params(keys[4], 5, 5, 8, 16)
    p["b3_1x1"] = _conv_params(keys[5], 1, 1, 16, 16)
    p["b3_3x3a"] = _conv_params(keys[6], 3, 3, 16, 16)
    p["b3_3x3b"] = _conv_params(keys[7], 3, 3, 16, 16)
    p["bp_1x1"] = _conv_params(keys[8], 1, 1, 16, 8)
    feat_c = 16 + 16 + 16 + 8
    # backbone classifier -> 1000 (Inception-v3 interface)
    p["fc_backbone_w"] = jax.random.normal(
        keys[9], (feat_c, 1000), jnp.float32) * (1.0 / feat_c ** 0.5)
    p["fc_backbone_b"] = jnp.zeros((1000,), jnp.float32)
    # head: nn.Linear(1000, num_classes)
    p["fc_w"] = jax.random.normal(
        keys[10], (1000, num_classes), jnp.float32) * (1.0 / 1000 ** 0.5)
    p["fc_b"] = 0.01 * jax.random.normal(keys[11], (num_classes,), jnp.float32)
    return p


# ------------------------------- forward -------------------------------------

def forward(x_nchw, params):
    """Eval-mode Inceptionv3Based forward: backbone -> dropout(id) -> fc."""
    x = x_nchw.astype(jnp.float32)
    # transform_input=True (torchvision sets it when pretrained=True)
    ch0 = x[:, 0:1] * (0.229 / 0.5) + (0.485 - 0.5) / 0.5
    ch1 = x[:, 1:2] * (0.224 / 0.5) + (0.456 - 0.5) / 0.5
    ch2 = x[:, 2:3] * (0.225 / 0.5) + (0.406 - 0.5) / 0.5
    x = jnp.concatenate([ch0, ch1, ch2], axis=1)
    x = jnp.transpose(x, (0, 2, 3, 1))  # NCHW -> NHWC (kernel layout)

    # ---- reduced Inception-v3 backbone ----
    x = conv_bn_relu(x, params["conv1"], stride=2, pad=0)
    x = conv_bn_relu(x, params["conv2"], stride=1, pad=0)
    x = max_pool(x, 3, 2)

    # Inception-A style block (4 branches, channel concat)
    # The three parallel 1x1 convs that read the same x are fused into one
    # matmul (weights concatenated along cout) and the output split per branch.
    n1 = params["b1_1x1"]["w"].shape[-1]
    n5 = params["b5_1x1"]["w"].shape[-1]
    w_1x1 = jnp.concatenate([params["b1_1x1"]["w"], params["b5_1x1"]["w"],
                             params["b3_1x1"]["w"]], axis=-1)
    b_1x1 = jnp.concatenate([params["b1_1x1"]["b"], params["b5_1x1"]["b"],
                             params["b3_1x1"]["b"]])
    y = conv_bn_relu(x, {"w": w_1x1, "b": b_1x1}, 1, 0)
    b1 = y[..., :n1]
    b5 = y[..., n1:n1 + n5]
    b3 = y[..., n1 + n5:]
    b5 = conv_bn_relu(b5, params["b5_5x5"], 1, 2)
    b3 = conv_bn_relu(b3, params["b3_3x3a"], 1, 1)
    b3 = conv_bn_relu(b3, params["b3_3x3b"], 1, 1)
    # avg_pool2d(3, stride=1, pad=1, count_include_pad=True) + 1x1 conv fused
    # into one 3x3 conv (exact: the avg pool is linear, so w3[dy,dx] = w1x1/9).
    cin, cout = params["bp_1x1"]["w"].shape[2:]
    w_bp = jnp.broadcast_to(params["bp_1x1"]["w"] / 9.0, (3, 3, cin, cout))
    bp = conv_bn_relu(x, {"w": w_bp, "b": params["bp_1x1"]["b"]}, 1, 1)
    x = jnp.concatenate([b1, b5, b3, bp], axis=-1)  # (B, H, W, 56)

    # Global average pool + backbone fc (->1000) + eval-mode dropout (identity)
    # + head fc (->num_classes) are all linear, so fold them into ONE matmul:
    #   W' = fc_backbone_w @ fc_w ; b' = fc_backbone_b @ fc_w + fc_b
    #   out = mean_hw(x) @ W' + b' = x.reshape(B, HW*C) @ tile(W'/HW) + b'
    # TODO(synk): training path (AuxLogits head + stochastic dropout via
    # pltpu.prng_seed/prng_random_bits) not implemented; this fold is exact
    # only in eval mode.
    B, H, W, C = x.shape
    w_head = params["fc_backbone_w"] @ params["fc_w"]                  # (C, nc)
    b_head = params["fc_backbone_b"] @ params["fc_w"] + params["fc_b"]
    w_big = jnp.tile(w_head / (H * W), (H * W, 1))                     # (HW*C, nc)
    return matmul_bias_act(x.reshape(B, H * W * C), w_big, b_head, act=False)


# --------------------------------- main ---------------------------------------

if __name__ == "__main__":
    key = jax.random.PRNGKey(0)
    kx, kp = jax.random.split(key)
    # small NCHW input consistent with a 3-channel image classifier
    x = jax.random.normal(kx, (2, 3, 32, 32), jnp.float32)
    params = init_params(kp, num_classes=3)

    fwd = jax.jit(forward)
    out = jax.block_until_ready(fwd(x, params))

    assert out.shape == (2, 3), out.shape
    assert out.dtype == jnp.float32
    print("KERNEL_OK")
</pallas_src>

<mosaic_0001>
module attributes {stable_mosaic.version = 11 : i64} {
  func.func @_mm_bias_act_kernel(%arg0: i32, %arg1: memref<128x128xbf16, #tpu.memory_space<vmem>>, %arg2: memref<128x128xbf16, #tpu.memory_space<vmem>>, %arg3: memref<1x128xf32, #tpu.memory_space<vmem>>, %arg4: memref<128x128xf32, #tpu.memory_space<vmem>>) attributes {dimension_semantics = [#tpu.dimension_semantics<parallel>], iteration_bounds = array<i64: 4>, scalar_prefetch = 0 : i64, scratch_operands = 0 : i64, tpu.core_type = #tpu.core_type<tc>, window_params = [{transform_indices = @transform_0, window_bounds = array<i64: 128, 128>}, {pipeline_mode = #tpu.pipeline_mode<synchronous>, transform_indices = @transform_1, window_bounds = array<i64: 128, 128>}, {pipeline_mode = #tpu.pipeline_mode<synchronous>, transform_indices = @transform_2, window_bounds = array<i64: 1, 128>}, {transform_indices = @transform_3, window_bounds = array<i64: 128, 128>}]} {
    %c0 = arith.constant 0 : index
    %c0_0 = arith.constant 0 : index
    %0 = vector.load %arg1[%c0, %c0_0] : memref<128x128xbf16, #tpu.memory_space<vmem>>, vector<128x128xbf16>
    %c0_1 = arith.constant 0 : index
    %c0_2 = arith.constant 0 : index
    %1 = vector.load %arg2[%c0_1, %c0_2] : memref<128x128xbf16, #tpu.memory_space<vmem>>, vector<128x128xbf16>
    %cst = arith.constant dense<0.000000e+00> : vector<128x128xf32>
    %2 = tpu.matmul %0, %1, %cst {dimension_numbers = #tpu.dot_dimension_numbers<[1], [0], [0], [1], [0, 0, 1, 1], [], []>} : vector<128x128xbf16>, vector<128x128xbf16>, vector<128x128xf32> -> vector<128x128xf32>
    %c0_3 = arith.constant 0 : index
    %c0_4 = arith.constant 0 : index
    %3 = vector.load %arg3[%c0_3, %c0_4] : memref<1x128xf32, #tpu.memory_space<vmem>>, vector<1x128xf32>
    %4 = vector.broadcast %3 : vector<1x128xf32> to vector<128x128xf32>
    %5 = arith.addf %2, %4 : vector<128x128xf32>
    %cst_5 = arith.constant 0.000000e+00 : f32
    %6 = vector.broadcast %cst_5 : f32 to vector<128x128xf32>
    %7 = arith.maximumf %5, %6 : vector<128x128xf32>
    %c0_6 = arith.constant 0 : index
    %c0_7 = arith.constant 0 : index
    %8 = vector.load %arg4[%c0_6, %c0_7] : memref<128x128xf32, #tpu.memory_space<vmem>>, vector<128x128xf32>
    tpu.vector_store %arg4[%c0_6, %c0_7], %7 {strides = array<i32>} : memref<128x128xf32, #tpu.memory_space<vmem>>, vector<128x128xf32>,
    return
  }
  func.func @transform_0(%arg0: i32) -> (i32, i32) {
    %c0_i32 = arith.constant 0 : i32
    %c0_i32_0 = arith.constant 0 : i32
    return %arg0, %c0_i32 : i32, i32
  }
  func.func @transform_1(%arg0: i32) -> (i32, i32) {
    %c0_i32 = arith.constant 0 : i32
    %c0_i32_0 = arith.constant 0 : i32
    %c0_i32_1 = arith.constant 0 : i32
    return %c0_i32, %c0_i32_0 : i32, i32
  }
  func.func @transform_2(%arg0: i32) -> (i32, i32) {
    %c0_i32 = arith.constant 0 : i32
    %c0_i32_0 = arith.constant 0 : i32
    %c0_i32_1 = arith.constant 0 : i32
    return %c0_i32, %c0_i32_0 : i32, i32
  }
  func.func @transform_3(%arg0: i32) -> (i32, i32) {
    %c0_i32 = arith.constant 0 : i32
    %c0_i32_0 = arith.constant 0 : i32
    return %arg0, %c0_i32 : i32, i32
  }
}

module attributes {stable_mosaic.version = 11 : i64} {
  func.func @_mm_bias_act_kernel(%arg0: i32, %arg1: memref<128x128xbf16, #tpu.memory_space<vmem>>, %arg2: memref<128x128xbf16, #tpu.memory_space<vmem>>, %arg3: memref<1x128xf32, #tpu.memory_space<vmem>>, %arg4: memref<128x128xf32, #tpu.memory_space<vmem>>) attributes {dimension_semantics = [#tpu.dimension_semantics<parallel>], iteration_bounds = array<i64: 3>, scalar_prefetch = 0 : i64, scratch_operands = 0 : i64, tpu.core_type = #tpu.core_type<tc>, window_params = [{transform_indices = @transform_0, window_bounds = array<i64: 128, 128>}, {pipeline_mode = #tpu.pipeline_mode<synchronous>, transform_indices = @transform_1, window_bounds = array<i64: 128, 128>}, {pipeline_mode = #tpu.pipeline_mode<synchronous>, transform_indices = @transform_2, window_bounds = array<i64: 1, 128>}, {transform_indices = @transform_3, window_bounds = array<i64: 128, 128>}]} {
    %c0 = arith.constant 0 : index
    %c0_0 = arith.constant 0 : index
    %0 = vector.load %arg1[%c0, %c0_0] : memref<128x128xbf16, #tpu.memory_space<vmem>>, vector<128x128xbf16>
    %c0_1 = arith.constant 0 : index
    %c0_2 = arith.constant 0 : index
    %1 = vector.load %arg2[%c0_1, %c0_2] : memref<128x128xbf16, #tpu.memory_space<vmem>>, vector<128x128xbf16>
    %cst = arith.constant dense<0.000000e+00> : vector<128x128xf32>
    %2 = tpu.matmul %0, %1, %cst {dimension_numbers = #tpu.dot_dimension_numbers<[1], [0], [0], [1], [0, 0, 1, 1], [], []>} : vector<128x128xbf16>, vector<128x128xbf16>, vector<128x128xf32> -> vector<128x128xf32>
    %c0_3 = arith.constant 0 : index
    %c0_4 = arith.constant 0 : index
    %3 = vector.load %arg3[%c0_3, %c0_4] : memref<1x128xf32, #tpu.memory_space<vmem>>, vector<1x128xf32>
    %4 = vector.broadcast %3 : vector<1x128xf32> to vector<128x128xf32>
    %5 = arith.addf %2, %4 : vector<128x128xf32>
    %cst_5 = arith.constant 0.000000e+00 : f32
    %6 = vector.broadcast %cst_5 : f32 to vector<128x128xf32>
    %7 = arith.maximumf %5, %6 : vector<128x128xf32>
    %c0_6 = arith.constant 0 : index
    %c0_7 = arith.constant 0 : index
    %8 = vector.load %arg4[%c0_6, %c0_7] : memref<128x128xf32, #tpu.memory_space<vmem>>, vector<128x128xf32>
    tpu.vector_store %arg4[%c0_6, %c0_7], %7 {strides = array<i32>} : memref<128x128xf32, #tpu.memory_space<vmem>>, vector<128x128xf32>,
    return
  }
  func.func @transform_0(%arg0: i32) -> (i32, i32) {
    %c0_i32 = arith.constant 0 : i32
    %c0_i32_0 = arith.constant 0 : i32
    return %arg0, %c0_i32 : i32, i32
  }
  func.func @transform_1(%arg0: i32) -> (i32, i32) {
    %c0_i32 = arith.constant 0 : i32
    %c0_i32_0 = arith.constant 0 : i32
    %c0_i32_1 = arith.constant 0 : i32
    return %c0_i32, %c0_i32_0 : i32, i32
  }
  func.func @transform_2(%arg0: i32) -> (i32, i32) {
    %c0_i32 = arith.constant 0 : i32
    %c0_i32_0 = arith.constant 0 : i32
    %c0_i32_1 = arith.constant 0 : i32
    return %c0_i32, %c0_i32_0 : i32, i32
  }
  func.func @transform_3(%arg0: i32) -> (i32, i32) {
    %c0_i32 = arith.constant 0 : i32
    %c0_i32_0 = arith.constant 0 : i32
    return %arg0, %c0_i32 : i32, i32
  }
}

module attributes {stable_mosaic.version = 11 : i64} {
  func.func @_maxpool_kernel(%arg0: i32, %arg1: memref<72x9x16xf32, #tpu.memory_space<vmem>>, %arg2: memref<72x16xf32, #tpu.memory_space<vmem>>) attributes {dimension_semantics = [#tpu.dimension_semantics<parallel>], iteration_bounds = array<i64: 1>, scalar_prefetch = 0 : i64, scratch_operands = 0 : i64, tpu.core_type = #tpu.core_type<tc>, window_params = [{transform_indices = @transform_0, window_bounds = array<i64: 72, 9, 16>}, {transform_indices = @transform_1, window_bounds = array<i64: 72, 16>}]} {
    %c0 = arith.constant 0 : index
    %c0_0 = arith.constant 0 : index
    %c0_1 = arith.constant 0 : index
    %0 = vector.load %arg1[%c0, %c0_0, %c0_1] : memref<72x9x16xf32, #tpu.memory_space<vmem>>, vector<72x1x16xf32>
    %1 = vector.shape_cast %0 : vector<72x1x16xf32> to vector<72x16xf32>
    %c0_2 = arith.constant 0 : index
    %c1 = arith.constant 1 : index
    %c0_3 = arith.constant 0 : index
    %2 = vector.load %arg1[%c0_2, %c1, %c0_3] : memref<72x9x16xf32, #tpu.memory_space<vmem>>, vector<72x1x16xf32>
    %3 = vector.shape_cast %2 : vector<72x1x16xf32> to vector<72x16xf32>
    %4 = arith.maximumf %1, %3 : vector<72x16xf32>
    %c0_4 = arith.constant 0 : index
    %c2 = arith.constant 2 : index
    %c0_5 = arith.constant 0 : index
    %5 = vector.load %arg1[%c0_4, %c2, %c0_5] : memref<72x9x16xf32, #tpu.memory_space<vmem>>, vector<72x1x16xf32>
    %6 = vector.shape_cast %5 : vector<72x1x16xf32> to vector<72x16xf32>
    %7 = arith.maximumf %4, %6 : vector<72x16xf32>
    %c0_6 = arith.constant 0 : index
    %c3 = arith.constant 3 : index
    %c0_7 = arith.constant 0 : index
    %8 = vector.load %arg1[%c0_6, %c3, %c0_7] : memref<72x9x16xf32, #tpu.memory_space<vmem>>, vector<72x1x16xf32>
    %9 = vector.shape_cast %8 : vector<72x1x16xf32> to vector<72x16xf32>
    %10 = arith.maximumf %7, %9 : vector<72x16xf32>
    %c0_8 = arith.constant 0 : index
    %c4 = arith.constant 4 : index
    %c0_9 = arith.constant 0 : index
    %11 = vector.load %arg1[%c0_8, %c4, %c0_9] : memref<72x9x16xf32, #tpu.memory_space<vmem>>, vector<72x1x16xf32>
    %12 = vector.shape_cast %11 : vector<72x1x16xf32> to vector<72x16xf32>
    %13 = arith.maximumf %10, %12 : vector<72x16xf32>
    %c0_10 = arith.constant 0 : index
    %c5 = arith.constant 5 : index
    %c0_11 = arith.constant 0 : index
    %14 = vector.load %arg1[%c0_10, %c5, %c0_11] : memref<72x9x16xf32, #tpu.memory_space<vmem>>, vector<72x1x16xf32>
    %15 = vector.shape_cast %14 : vector<72x1x16xf32> to vector<72x16xf32>
    %16 = arith.maximumf %13, %15 : vector<72x16xf32>
    %c0_12 = arith.constant 0 : index
    %c6 = arith.constant 6 : index
    %c0_13 = arith.constant 0 : index
    %17 = vector.load %arg1[%c0_12, %c6, %c0_13] : memref<72x9x16xf32, #tpu.memory_space<vmem>>, vector<72x1x16xf32>
    %18 = vector.shape_cast %17 : vector<72x1x16xf32> to vector<72x16xf32>
    %19 = arith.maximumf %16, %18 : vector<72x16xf32>
    %c0_14 = arith.constant 0 : index
    %c7 = arith.constant 7 : index
    %c0_15 = arith.constant 0 : index
    %20 = vector.load %arg1[%c0_14, %c7, %c0_15] : memref<72x9x16xf32, #tpu.memory_space<vmem>>, vector<72x1x16xf32>
    %21 = vector.shape_cast %20 : vector<72x1x16xf32> to vector<72x16xf32>
    %22 = arith.maximumf %19, %21 : vector<72x16xf32>
    %c0_16 = arith.constant 0 : index
    %c8 = arith.constant 8 : index
    %c0_17 = arith.constant 0 : index
    %23 = vector.load %arg1[%c0_16, %c8, %c0_17] : memref<72x9x16xf32, #tpu.memory_space<vmem>>, vector<72x1x16xf32>
    %24 = vector.shape_cast %23 : vector<72x1x16xf32> to vector<72x16xf32>
    %25 = arith.maximumf %22, %24 : vector<72x16xf32>
    %c0_18 = arith.constant 0 : index
    %c0_19 = arith.constant 0 : index
    %26 = vector.load %arg2[%c0_18, %c0_19] : memref<72x16xf32, #tpu.memory_space<vmem>>, vector<72x16xf32>
    tpu.vector_store %arg2[%c0_18, %c0_19], %25 {strides = array<i32>} : memref<72x16xf32, #tpu.memory_space<vmem>>, vector<72x16xf32>,
    return
  }
  func.func @transform_0(%arg0: i32) -> (i32, i32, i32) {
    %c0_i32 = arith.constant 0 : i32
    %c0_i32_0 = arith.constant 0 : i32
    %c0_i32_1 = arith.constant 0 : i32
    return %arg0, %c0_i32, %c0_i32_0 : i32, i32, i32
  }
  func.func @transform_1(%arg0: i32) -> (i32, i32) {
    %c0_i32 = arith.constant 0 : i32
    %c0_i32_0 = arith.constant 0 : i32
    return %arg0, %c0_i32 : i32, i32
  }
}

module attributes {stable_mosaic.version = 11 : i64} {
  func.func @_mm_bias_act_kernel(%arg0: i32, %arg1: memref<72x128xbf16, #tpu.memory_space<vmem>>, %arg2: memref<128x128xbf16, #tpu.memory_space<vmem>>, %arg3: memref<1x128xf32, #tpu.memory_space<vmem>>, %arg4: memref<72x128xf32, #tpu.memory_space<vmem>>) attributes {dimension_semantics = [#tpu.dimension_semantics<parallel>], iteration_bounds = array<i64: 1>, scalar_prefetch = 0 : i64, scratch_operands = 0 : i64, tpu.core_type = #tpu.core_type<tc>, window_params = [{transform_indices = @transform_0, window_bounds = array<i64: 72, 128>}, {pipeline_mode = #tpu.pipeline_mode<synchronous>, transform_indices = @transform_1, window_bounds = array<i64: 128, 128>}, {pipeline_mode = #tpu.pipeline_mode<synchronous>, transform_indices = @transform_2, window_bounds = array<i64: 1, 128>}, {transform_indices = @transform_3, window_bounds = array<i64: 72, 128>}]} {
    %c0 = arith.constant 0 : index
    %c0_0 = arith.constant 0 : index
    %0 = vector.load %arg1[%c0, %c0_0] : memref<72x128xbf16, #tpu.memory_space<vmem>>, vector<72x128xbf16>
    %c0_1 = arith.constant 0 : index
    %c0_2 = arith.constant 0 : index
    %1 = vector.load %arg2[%c0_1, %c0_2] : memref<128x128xbf16, #tpu.memory_space<vmem>>, vector<128x128xbf16>
    %cst = arith.constant dense<0.000000e+00> : vector<72x128xf32>
    %2 = tpu.matmul %0, %1, %cst {dimension_numbers = #tpu.dot_dimension_numbers<[1], [0], [0], [1], [0, 0, 1, 1], [], []>} : vector<72x128xbf16>, vector<128x128xbf16>, vector<72x128xf32> -> vector<72x128xf32>
    %c0_3 = arith.constant 0 : index
    %c0_4 = arith.constant 0 : index
    %3 = vector.load %arg3[%c0_3, %c0_4] : memref<1x128xf32, #tpu.memory_space<vmem>>, vector<1x128xf32>
    %4 = vector.broadcast %3 : vector<1x128xf32> to vector<72x128xf32>
    %5 = arith.addf %2, %4 : vector<72x128xf32>
    %cst_5 = arith.constant 0.000000e+00 : f32
    %6 = vector.broadcast %cst_5 : f32 to vector<72x128xf32>
    %7 = arith.maximumf %5, %6 : vector<72x128xf32>
    %c0_6 = arith.constant 0 : index
    %c0_7 = arith.constant 0 : index
    %8 = vector.load %arg4[%c0_6, %c0_7] : memref<72x128xf32, #tpu.memory_space<vmem>>, vector<72x128xf32>
    tpu.vector_store %arg4[%c0_6, %c0_7], %7 {strides = array<i32>} : memref<72x128xf32, #tpu.memory_space<vmem>>, vector<72x128xf32>,
    return
  }
  func.func @transform_0(%arg0: i32) -> (i32, i32) {
    %c0_i32 = arith.constant 0 : i32
    %c0_i32_0 = arith.constant 0 : i32
    return %arg0, %c0_i32 : i32, i32
  }
  func.func @transform_1(%arg0: i32) -> (i32, i32) {
    %c0_i32 = arith.constant 0 : i32
    %c0_i32_0 = arith.constant 0 : i32
    %c0_i32_1 = arith.constant 0 : i32
    return %c0_i32, %c0_i32_0 : i32, i32
  }
  func.func @transform_2(%arg0: i32) -> (i32, i32) {
    %c0_i32 = arith.constant 0 : i32
    %c0_i32_0 = arith.constant 0 : i32
    %c0_i32_1 = arith.constant 0 : i32
    return %c0_i32, %c0_i32_0 : i32, i32
  }
  func.func @transform_3(%arg0: i32) -> (i32, i32) {
    %c0_i32 = arith.constant 0 : i32
    %c0_i32_0 = arith.constant 0 : i32
    return %arg0, %c0_i32 : i32, i32
  }
}

module attributes {stable_mosaic.version = 11 : i64} {
  func.func @_mm_bias_act_kernel(%arg0: i32, %arg1: memref<72x256xbf16, #tpu.memory_space<vmem>>, %arg2: memref<256x128xbf16, #tpu.memory_space<vmem>>, %arg3: memref<1x128xf32, #tpu.memory_space<vmem>>, %arg4: memref<72x128xf32, #tpu.memory_space<vmem>>) attributes {dimension_semantics = [#tpu.dimension_semantics<parallel>], iteration_bounds = array<i64: 1>, scalar_prefetch = 0 : i64, scratch_operands = 0 : i64, tpu.core_type = #tpu.core_type<tc>, window_params = [{transform_indices = @transform_0, window_bounds = array<i64: 72, 256>}, {pipeline_mode = #tpu.pipeline_mode<synchronous>, transform_indices = @transform_1, window_bounds = array<i64: 256, 128>}, {pipeline_mode = #tpu.pipeline_mode<synchronous>, transform_indices = @transform_2, window_bounds = array<i64: 1, 128>}, {transform_indices = @transform_3, window_bounds = array<i64: 72, 128>}]} {
    %c0 = arith.constant 0 : index
    %c0_0 = arith.constant 0 : index
    %0 = vector.load %arg1[%c0, %c0_0] : memref<72x256xbf16, #tpu.memory_space<vmem>>, vector<72x256xbf16>
    %c0_1 = arith.constant 0 : index
    %c0_2 = arith.constant 0 : index
    %1 = vector.load %arg2[%c0_1, %c0_2] : memref<256x128xbf16, #tpu.memory_space<vmem>>, vector<256x128xbf16>
    %cst = arith.constant dense<0.000000e+00> : vector<72x128xf32>
    %2 = tpu.matmul %0, %1, %cst {dimension_numbers = #tpu.dot_dimension_numbers<[1], [0], [0], [1], [0, 0, 1, 1], [], []>} : vector<72x256xbf16>, vector<256x128xbf16>, vector<72x128xf32> -> vector<72x128xf32>
    %c0_3 = arith.constant 0 : index
    %c0_4 = arith.constant 0 : index
    %3 = vector.load %arg3[%c0_3, %c0_4] : memref<1x128xf32, #tpu.memory_space<vmem>>, vector<1x128xf32>
    %4 = vector.broadcast %3 : vector<1x128xf32> to vector<72x128xf32>
    %5 = arith.addf %2, %4 : vector<72x128xf32>
    %cst_5 = arith.constant 0.000000e+00 : f32
    %6 = vector.broadcast %cst_5 : f32 to vector<72x128xf32>
    %7 = arith.maximumf %5, %6 : vector<72x128xf32>
    %c0_6 = arith.constant 0 : index
    %c0_7 = arith.constant 0 : index
    %8 = vector.load %arg4[%c0_6, %c0_7] : memref<72x128xf32, #tpu.memory_space<vmem>>, vector<72x128xf32>
    tpu.vector_store %arg4[%c0_6, %c0_7], %7 {strides = array<i32>} : memref<72x128xf32, #tpu.memory_space<vmem>>, vector<72x128xf32>,
    return
  }
  func.func @transform_0(%arg0: i32) -> (i32, i32) {
    %c0_i32 = arith.constant 0 : i32
    %c0_i32_0 = arith.constant 0 : i32
    return %arg0, %c0_i32 : i32, i32
  }
  func.func @transform_1(%arg0: i32) -> (i32, i32) {
    %c0_i32 = arith.constant 0 : i32
    %c0_i32_0 = arith.constant 0 : i32
    %c0_i32_1 = arith.constant 0 : i32
    return %c0_i32, %c0_i32_0 : i32, i32
  }
  func.func @transform_2(%arg0: i32) -> (i32, i32) {
    %c0_i32 = arith.constant 0 : i32
    %c0_i32_0 = arith.constant 0 : i32
    %c0_i32_1 = arith.constant 0 : i32
    return %c0_i32, %c0_i32_0 : i32, i32
  }
  func.func @transform_3(%arg0: i32) -> (i32, i32) {
    %c0_i32 = arith.constant 0 : i32
    %c0_i32_0 = arith.constant 0 : i32
    return %arg0, %c0_i32 : i32, i32
  }
}

module attributes {stable_mosaic.version = 11 : i64} {
  func.func @_mm_bias_act_kernel(%arg0: i32, %arg1: memref<8x2048xbf16, #tpu.memory_space<vmem>>, %arg2: memref<2048x128xbf16, #tpu.memory_space<vmem>>, %arg3: memref<1x128xf32, #tpu.memory_space<vmem>>, %arg4: memref<8x128xf32, #tpu.memory_space<vmem>>) attributes {dimension_semantics = [#tpu.dimension_semantics<parallel>], iteration_bounds = array<i64: 1>, scalar_prefetch = 0 : i64, scratch_operands = 0 : i64, tpu.core_type = #tpu.core_type<tc>, window_params = [{transform_indices = @transform_0, window_bounds = array<i64: 8, 2048>}, {pipeline_mode = #tpu.pipeline_mode<synchronous>, transform_indices = @transform_1, window_bounds = array<i64: 2048, 128>}, {pipeline_mode = #tpu.pipeline_mode<synchronous>, transform_indices = @transform_2, window_bounds = array<i64: 1, 128>}, {transform_indices = @transform_3, window_bounds = array<i64: 8, 128>}]} {
    %c0 = arith.constant 0 : index
    %c0_0 = arith.constant 0 : index
    %0 = vector.load %arg1[%c0, %c0_0] : memref<8x2048xbf16, #tpu.memory_space<vmem>>, vector<8x2048xbf16>
    %c0_1 = arith.constant 0 : index
    %c0_2 = arith.constant 0 : index
    %1 = vector.load %arg2[%c0_1, %c0_2] : memref<2048x128xbf16, #tpu.memory_space<vmem>>, vector<2048x128xbf16>
    %cst = arith.constant dense<0.000000e+00> : vector<8x128xf32>
    %2 = tpu.matmul %0, %1, %cst {dimension_numbers = #tpu.dot_dimension_numbers<[1], [0], [0], [1], [0, 0, 1, 1], [], []>} : vector<8x2048xbf16>, vector<2048x128xbf16>, vector<8x128xf32> -> vector<8x128xf32>
    %c0_3 = arith.constant 0 : index
    %c0_4 = arith.constant 0 : index
    %3 = vector.load %arg3[%c0_3, %c0_4] : memref<1x128xf32, #tpu.memory_space<vmem>>, vector<1x128xf32>
    %4 = vector.broadcast %3 : vector<1x128xf32> to vector<8x128xf32>
    %5 = arith.addf %2, %4 : vector<8x128xf32>
    %c0_5 = arith.constant 0 : index
    %c0_6 = arith.constant 0 : index
    %6 = vector.load %arg4[%c0_5, %c0_6] : memref<8x128xf32, #tpu.memory_space<vmem>>, vector<8x128xf32>
    tpu.vector_store %arg4[%c0_5, %c0_6], %5 {strides = array<i32>} : memref<8x128xf32, #tpu.memory_space<vmem>>, vector<8x128xf32>,
    return
  }
  func.func @transform_0(%arg0: i32) -> (i32, i32) {
    %c0_i32 = arith.constant 0 : i32
    %c0_i32_0 = arith.constant 0 : i32
    return %arg0, %c0_i32 : i32, i32
  }
  func.func @transform_1(%arg0: i32) -> (i32, i32) {
    %c0_i32 = arith.constant 0 : i32
    %c0_i32_0 = arith.constant 0 : i32
    %c0_i32_1 = arith.constant 0 : i32
    return %c0_i32, %c0_i32_0 : i32, i32
  }
  func.func @transform_2(%arg0: i32) -> (i32, i32) {
    %c0_i32 = arith.constant 0 : i32
    %c0_i32_0 = arith.constant 0 : i32
    %c0_i32_1 = arith.constant 0 : i32
    return %c0_i32, %c0_i32_0 : i32, i32
  }
  func.func @transform_3(%arg0: i32) -> (i32, i32) {
    %c0_i32 = arith.constant 0 : i32
    %c0_i32_0 = arith.constant 0 : i32
    return %arg0, %c0_i32 : i32, i32
  }
}

</mosaic_0001>

<bundles_post_ra>
// kernel: forward.9
= control target key start
LH: loop header
LB: loop body
LE: loop exit
PB: predicated region body
PF: predicated region fallthrough
CT: control target
= control target key end

     0   :  { %s639_s12 = smov 0   ;;  %s715_s0 = inlined_call_operand.vmem [shape: bf16[512,128], index: 0, kind: input, shape index: {}]   ;;  %s716_s1 = inlined_call_operand.vmem [shape: bf16[128,128], index: 1, kind: input, shape index: {}]   ;;  %s717_s2 = inlined_call_operand.vmem [shape: f32[1,128], index: 2, kind: input, shape index: {}]   ;;  %s718_s3 = inlined_call_operand.vmem [shape: f32[512,128], index: 3, kind: output, shape index: {}]  }
   0x1 LB: > { %s495_s13 = sadd.s32 4294967295, %s617_s12   ;;  %p499_p0 = scmp.ge.s32.totalorder %s617_s12, 1  ;;  %s617_s12 = sphi %s639_s12, %s13_s12  }
   0x2   : > { %p138_p1 = scmp.lt.s32.totalorder %s617_s12, 5 }
   0x4   : > { %p139_p2 = pnand %p499_p0, %p138_p1 }
   0x5   : > { %v595_v0 = vld [vmem:[%s716_s1] sm:$0xff] (!%p139_p2)   ;;  %s500_s16 = sshll.u32 (!%p139_p2), %s495_s13, 4  ;;  %v596_v1 = vld [vmem:[%s716_s1 + $0x8] sm:$0xff] (!%p139_p2)   ;;  %v597_v2 = vld [vmem:[%s716_s1 + $0x10] sm:$0xff] (!%p139_p2)  }
   0x6   : > { %142 = sbr.rel (%p139_p2) target bundleno = 266 (0x10a), region = 32  ;;  %p163_p3 = scmp.lt.s32.totalorder (!%p139_p2), %s500_s16, 63  ;;  %539 = vmatprep.subr.bf16.mxu0 (!%p139_p2), %v595_v0  ;;  %571 = vmatprep.subr.bf16.mxu1 (!%p139_p2), %v595_v0  ;;  %v598_v3 = vld [vmem:[%s716_s1 + $0x18] sm:$0xff] (!%p139_p2)   ;;  %v599_v6 = vld [vmem:[%s716_s1 + $0x20] sm:$0xff] (!%p139_p2)   ;;  %v600_v7 = vld [vmem:[%s716_s1 + $0x28] sm:$0xff] (!%p139_p2)  }
   0x7   : > { %540 = vmatpush3.bf16.msra.mxu0 (!%p139_p2), %v595_v0  ;;  %579 = vmatpush3.bf16.msra.mxu1 (!%p139_p2), %v595_v0  ;;  %v601_v8 = vld [vmem:[%s716_s1 + $0x30] sm:$0xff] (!%p139_p2)   ;;  %v602_v9 = vld [vmem:[%s716_s1 + $0x38] sm:$0xff] (!%p139_p2)   ;;  %v504_v16 = vld [vmem:[%s717_s2] ss:$0 sm:$0xff] (!%p139_p2) }
   0x8   : > { %541 = vmatprep.subr.bf16.mxu0 (!%p139_p2), %v596_v1  ;;  %572 = vmatprep.subr.bf16.mxu1 (!%p139_p2), %v596_v1 }
   0xb   : > { %542 = vmatpush3.bf16.msra.mxu0 (!%p139_p2), %v596_v1  ;;  %580 = vmatpush3.bf16.msra.mxu1 (!%p139_p2), %v596_v1 }
   0xc   : > { %543 = vmatprep.subr.bf16.mxu0 (!%p139_p2), %v597_v2  ;;  %573 = vmatprep.subr.bf16.mxu1 (!%p139_p2), %v597_v2 }
   0xd   : > { %s720_s16 = smov (!%p163_p3, %s500_s16), 63 }
   0xe   : > { %s501_s21 = sshll.u32 %s720_s16, 2  ;;  %s503_s10 = sshll.u32 %s720_s16, 3 }
   0xf   : > { %s662_s24 = scalar_lea.vmem %s715_s0, %s501_s21  ;;  %544 = vmatpush3.bf16.msra.mxu0 %v597_v2  ;;  %581 = vmatpush3.bf16.msra.mxu1 %v597_v2  ;;  %s694_s14 = scalar_lea.vmem %s718_s3, %s503_s10 }
  0x10   : > { %v603_v4 = vld [vmem:[%s662_s24] sm:$0xff]   ;;  %545 = vmatprep.subr.bf16.mxu0 %v598_v3  ;;  %574 = vmatprep.subr.bf16.mxu1 %v598_v3  ;;  %v605_v10 = vld [vmem:[%s662_s24 + $0x8] sm:$0xff]   ;;  %v607_v12 = vld [vmem:[%s662_s24 + $0x10] sm:$0xff]  }
  0x11   : > { %v604_v5 = vld [vmem:[%s662_s24 + $0x20] sm:$0xff]   ;;  %555 = vmatprep.mubr.bf16.mxu0 %v603_v4  ;;  %v606_v11 = vld [vmem:[%s662_s24 + $0x28] sm:$0xff]   ;;  %v608_v13 = vld [vmem:[%s662_s24 + $0x30] sm:$0xff]  }
  0x12   : > { %563 = vmatprep.mubr.bf16.mxu1 %v604_v5  ;;  %v609_v14 = vld [vmem:[%s662_s24 + $0x18] sm:$0xff]  }
  0x13   : > { %546 = vmatpush3.bf16.msra.mxu0 %v598_v3  ;;  %582 = vmatpush3.bf16.msra.mxu1 %v598_v3  ;;  %v610_v15 = vld [vmem:[%s662_s24 + $0x38] sm:$0xff]  }
  0x14   : > { %547 = vmatprep.subr.bf16.mxu0 %v599_v6  ;;  %575 = vmatprep.subr.bf16.mxu1 %v599_v6 }
  0x17   : > { %548 = vmatpush3.bf16.msra.mxu0 %v599_v6  ;;  %583 = vmatpush3.bf16.msra.mxu1 %v599_v6 }
  0x18   : > { %549 = vmatprep.subr.bf16.mxu0 %v600_v7  ;;  %576 = vmatprep.subr.bf16.mxu1 %v600_v7 }
  0x1b   : > { %550 = vmatpush3.bf16.msra.mxu0 %v600_v7  ;;  %584 = vmatpush3.bf16.msra.mxu1 %v600_v7 }
  0x1c   : > { %551 = vmatprep.subr.bf16.mxu0 %v601_v8  ;;  %577 = vmatprep.subr.bf16.mxu1 %v601_v8 }
  0x1f   : > { %552 = vmatpush3.bf16.msra.mxu0 %v601_v8  ;;  %585 = vmatpush3.bf16.msra.mxu1 %v601_v8 }
  0x20   : > { %553 = vmatprep.subr.bf16.mxu0 %v602_v9  ;;  %578 = vmatprep.subr.bf16.mxu1 %v602_v9 }
  0x23   : > { %554 = vmatpush3.bf16.msra.mxu0 %v602_v9  ;;  %586 = vmatpush3.bf16.msra.mxu1 %v602_v9 }
  0x26   : > { %556 = vmatmul.mubr.bf16.vlgmr.msra.gmra.mrb[0].mxu0 %v605_v10  ;;  %564 = vmatmul.mubr.bf16.vlgmr.msra.gmra.mrb[0].mxu1 %v606_v11 }
  0x27   : > { %559 = vmatprep.mubr.bf16.mxu0 %v607_v12  ;;  %567 = vmatprep.mubr.bf16.mxu1 %v608_v13 }
  0x2e   : > { %560 = vmatmul.mubr.bf16.gmra.mrb[4].mxu0 %v609_v14  ;;  %568 = vmatmul.mubr.bf16.gmra.mrb[4].mxu1 %v610_v15 }
  0xf9   : > { %v557_v17 = vpop.f32.mrb[0].mxu0  ;;  %v565_v18 = vpop.f32.mrb[0].mxu1 }
  0xfa   : > { %v353_v19 = vadd.f32 %v557_v17, %v504_v16  ;;  %v385_v20 = vadd.f32 %v565_v18, %v504_v16  ;;  %v344_v21 = vpop.f32.mrb[1].mxu0  ;;  %v376_v22 = vpop.f32.mrb[1].mxu1 }
  0xfb   : > { %v345_v23 = vadd.f32 %v504_v16, %v344_v21  ;;  %v377_v24 = vadd.f32 %v504_v16, %v376_v22  ;;  %v558_v25 = vpop.f32.mrb[2].mxu0  ;;  %v566_v26 = vpop.f32.mrb[2].mxu1 }
  0xfc   : > { %v409_v27 = vmax.f32 %v353_v19, 0.0  ;;  %v417_v28 = vmax.f32 %v385_v20, 0.0  ;;  %v356_v29 = vadd.f32 %v558_v25, %v504_v16  ;;  %v388_v30 = vadd.f32 %v566_v26, %v504_v16  ;;  %v347_v31 = vpop.f32.mrb[3].mxu0  ;;  %v379_v32 = vpop.f32.mrb[3].mxu1 }
  0xfd   : > { %v407_v33 = vmax.f32 %v345_v23, 0.0  ;;  %v415_v34 = vmax.f32 %v377_v24, 0.0  ;;  %v348_v35 = vadd.f32 %v504_v16, %v347_v31  ;;  %v380_v36 = vadd.f32 %v504_v16, %v379_v32 }
  0xfe   : > { %425 = vst [vmem:[%s694_s14 + $0x10] sm:$0xff] %v409_v27  ;;  %433 = vst [vmem:[%s694_s14 + $0x50] sm:$0xff] %v417_v28  ;;  %v410_v37 = vmax.f32 %v356_v29, 0.0  ;;  %v418_v38 = vmax.f32 %v388_v30, 0.0 }
  0xff   : > { %423 = vst [vmem:[%s694_s14] sm:$0xff] %v407_v33  ;;  %431 = vst [vmem:[%s694_s14 + $0x40] sm:$0xff] %v415_v34  ;;  %v408_v39 = vmax.f32 %v348_v35, 0.0  ;;  %v416_v40 = vmax.f32 %v380_v36, 0.0 }
 0x100   : > { %426 = vst [vmem:[%s694_s14 + $0x18] sm:$0xff] %v410_v37  ;;  %434 = vst [vmem:[%s694_s14 + $0x58] sm:$0xff] %v418_v38 }
 0x101   : > { %424 = vst [vmem:[%s694_s14 + $0x8] sm:$0xff] %v408_v39  ;;  %432 = vst [vmem:[%s694_s14 + $0x48] sm:$0xff] %v416_v40  ;;  %v561_v41 = vpop.f32.mrb[4].mxu0  ;;  %v569_v42 = vpop.f32.mrb[4].mxu1 }
 0x102   : > { %v369_v43 = vadd.f32 %v561_v41, %v504_v16  ;;  %v401_v44 = vadd.f32 %v569_v42, %v504_v16  ;;  %v360_v45 = vpop.f32.mrb[5].mxu0  ;;  %v392_v46 = vpop.f32.mrb[5].mxu1 }
 0x103   : > { %v361_v47 = vadd.f32 %v504_v16, %v360_v45  ;;  %v393_v48 = vadd.f32 %v504_v16, %v392_v46  ;;  %v562_v49 = vpop.f32.mrb[6].mxu0  ;;  %v570_v50 = vpop.f32.mrb[6].mxu1 }
 0x104   : > { %v413_v51 = vmax.f32 %v369_v43, 0.0  ;;  %v421_v52 = vmax.f32 %v401_v44, 0.0  ;;  %v372_v53 = vadd.f32 %v562_v49, %v504_v16  ;;  %v404_v54 = vadd.f32 %v570_v50, %v504_v16  ;;  %v363_v55 = vpop.f32.mrb[7].mxu0  ;;  %v395_v56 = vpop.f32.mrb[7].mxu1 }
 0x105   : > { %v411_v57 = vmax.f32 %v361_v47, 0.0  ;;  %v419_v58 = vmax.f32 %v393_v48, 0.0  ;;  %v364_v59 = vadd.f32 %v504_v16, %v363_v55  ;;  %v396_v60 = vadd.f32 %v504_v16, %v395_v56 }
 0x106   : > { %429 = vst [vmem:[%s694_s14 + $0x30] sm:$0xff] %v413_v51  ;;  %437 = vst [vmem:[%s694_s14 + $0x70] sm:$0xff] %v421_v52  ;;  %v414_v61 = vmax.f32 %v372_v53, 0.0  ;;  %v422_v62 = vmax.f32 %v404_v54, 0.0 }
 0x107   : > { %427 = vst [vmem:[%s694_s14 + $0x20] sm:$0xff] %v411_v57  ;;  %435 = vst [vmem:[%s694_s14 + $0x60] sm:$0xff] %v419_v58  ;;  %v412_v63 = vmax.f32 %v364_v59, 0.0  ;;  %v420_v0 = vmax.f32 %v396_v60, 0.0 }
 0x108   : > { %430 = vst [vmem:[%s694_s14 + $0x38] sm:$0xff] %v414_v61  ;;  %438 = vst [vmem:[%s694_s14 + $0x78] sm:$0xff] %v422_v62 }
 0x109   : > { %428 = vst [vmem:[%s694_s14 + $0x28] sm:$0xff] %v412_v63  ;;  %436 = vst [vmem:[%s694_s14 + $0x68] sm:$0xff] %v420_v0 }
 0x10a PF: > { %s13_s12 = sadd.s32 1, %s617_s12  }
 0x10b   : > { %p10_p4 = scmp.ge.s32.totalorder %s13_s12, 6  }
 0x10d   :  { %12 = sbr.rel (!%p10_p4) target bundleno = 1 (0x1), region = 62 }

// kernel: forward.10
= control target key start
LH: loop header
LB: loop body
LE: loop exit
PB: predicated region body
PF: predicated region fallthrough
CT: control target
= control target key end

     0   :  { %s639_s12 = smov 0   ;;  %s715_s0 = inlined_call_operand.vmem [shape: bf16[384,128], index: 0, kind: input, shape index: {}]   ;;  %s716_s1 = inlined_call_operand.vmem [shape: bf16[128,128], index: 1, kind: input, shape index: {}]   ;;  %s717_s2 = inlined_call_operand.vmem [shape: f32[1,128], index: 2, kind: input, shape index: {}]   ;;  %s718_s3 = inlined_call_operand.vmem [shape: f32[384,128], index: 3, kind: output, shape index: {}]  }
   0x1 LB: > { %s495_s13 = sadd.s32 4294967295, %s617_s12   ;;  %p499_p0 = scmp.ge.s32.totalorder %s617_s12, 1  ;;  %s617_s12 = sphi %s639_s12, %s13_s12  }
   0x2   : > { %p138_p1 = scmp.lt.s32.totalorder %s617_s12, 4 }
   0x4   : > { %p139_p2 = pnand %p499_p0, %p138_p1 }
   0x5   : > { %v595_v0 = vld [vmem:[%s716_s1] sm:$0xff] (!%p139_p2)   ;;  %s500_s16 = sshll.u32 (!%p139_p2), %s495_s13, 4  ;;  %v596_v1 = vld [vmem:[%s716_s1 + $0x8] sm:$0xff] (!%p139_p2)   ;;  %v597_v2 = vld [vmem:[%s716_s1 + $0x10] sm:$0xff] (!%p139_p2)  }
   0x6   : > { %142 = sbr.rel (%p139_p2) target bundleno = 266 (0x10a), region = 32  ;;  %p163_p3 = scmp.lt.s32.totalorder (!%p139_p2), %s500_s16, 47  ;;  %539 = vmatprep.subr.bf16.mxu0 (!%p139_p2), %v595_v0  ;;  %571 = vmatprep.subr.bf16.mxu1 (!%p139_p2), %v595_v0  ;;  %v598_v3 = vld [vmem:[%s716_s1 + $0x18] sm:$0xff] (!%p139_p2)   ;;  %v599_v6 = vld [vmem:[%s716_s1 + $0x20] sm:$0xff] (!%p139_p2)   ;;  %v600_v7 = vld [vmem:[%s716_s1 + $0x28] sm:$0xff] (!%p139_p2)  }
   0x7   : > { %540 = vmatpush3.bf16.msra.mxu0 (!%p139_p2), %v595_v0  ;;  %579 = vmatpush3.bf16.msra.mxu1 (!%p139_p2), %v595_v0  ;;  %v601_v8 = vld [vmem:[%s716_s1 + $0x30] sm:$0xff] (!%p139_p2)   ;;  %v602_v9 = vld [vmem:[%s716_s1 + $0x38] sm:$0xff] (!%p139_p2)   ;;  %v504_v16 = vld [vmem:[%s717_s2] ss:$0 sm:$0xff] (!%p139_p2) }
   0x8   : > { %541 = vmatprep.subr.bf16.mxu0 (!%p139_p2), %v596_v1  ;;  %572 = vmatprep.subr.bf16.mxu1 (!%p139_p2), %v596_v1 }
   0xb   : > { %542 = vmatpush3.bf16.msra.mxu0 (!%p139_p2), %v596_v1  ;;  %580 = vmatpush3.bf16.msra.mxu1 (!%p139_p2), %v596_v1 }
   0xc   : > { %543 = vmatprep.subr.bf16.mxu0 (!%p139_p2), %v597_v2  ;;  %573 = vmatprep.subr.bf16.mxu1 (!%p139_p2), %v597_v2 }
   0xd   : > { %s720_s16 = smov (!%p163_p3, %s500_s16), 47 }
   0xe   : > { %s501_s21 = sshll.u32 %s720_s16, 2  ;;  %s503_s10 = sshll.u32 %s720_s16, 3 }
   0xf   : > { %s662_s24 = scalar_lea.vmem %s715_s0, %s501_s21  ;;  %544 = vmatpush3.bf16.msra.mxu0 %v597_v2  ;;  %581 = vmatpush3.bf16.msra.mxu1 %v597_v2  ;;  %s694_s14 = scalar_lea.vmem %s718_s3, %s503_s10 }
  0x10   : > { %v603_v4 = vld [vmem:[%s662_s24] sm:$0xff]   ;;  %545 = vmatprep.subr.bf16.mxu0 %v598_v3  ;;  %574 = vmatprep.subr.bf16.mxu1 %v598_v3  ;;  %v605_v10 = vld [vmem:[%s662_s24 + $0x8] sm:$0xff]   ;;  %v607_v12 = vld [vmem:[%s662_s24 + $0x10] sm:$0xff]  }
  0x11   : > { %v604_v5 = vld [vmem:[%s662_s24 + $0x20] sm:$0xff]   ;;  %555 = vmatprep.mubr.bf16.mxu0 %v603_v4  ;;  %v606_v11 = vld [vmem:[%s662_s24 + $0x28] sm:$0xff]   ;;  %v608_v13 = vld [vmem:[%s662_s24 + $0x30] sm:$0xff]  }
  0x12   : > { %563 = vmatprep.mubr.bf16.mxu1 %v604_v5  ;;  %v609_v14 = vld [vmem:[%s662_s24 + $0x18] sm:$0xff]  }
  0x13   : > { %546 = vmatpush3.bf16.msra.mxu0 %v598_v3  ;;  %582 = vmatpush3.bf16.msra.mxu1 %v598_v3  ;;  %v610_v15 = vld [vmem:[%s662_s24 + $0x38] sm:$0xff]  }
  0x14   : > { %547 = vmatprep.subr.bf16.mxu0 %v599_v6  ;;  %575 = vmatprep.subr.bf16.mxu1 %v599_v6 }
  0x17   : > { %548 = vmatpush3.bf16.msra.mxu0 %v599_v6  ;;  %583 = vmatpush3.bf16.msra.mxu1 %v599_v6 }
  0x18   : > { %549 = vmatprep.subr.bf16.mxu0 %v600_v7  ;;  %576 = vmatprep.subr.bf16.mxu1 %v600_v7 }
  0x1b   : > { %550 = vmatpush3.bf16.msra.mxu0 %v600_v7  ;;  %584 = vmatpush3.bf16.msra.mxu1 %v600_v7 }
  0x1c   : > { %551 = vmatprep.subr.bf16.mxu0 %v601_v8  ;;  %577 = vmatprep.subr.bf16.mxu1 %v601_v8 }
  0x1f   : > { %552 = vmatpush3.bf16.msra.mxu0 %v601_v8  ;;  %585 = vmatpush3.bf16.msra.mxu1 %v601_v8 }
  0x20   : > { %553 = vmatprep.subr.bf16.mxu0 %v602_v9  ;;  %578 = vmatprep.subr.bf16.mxu1 %v602_v9 }
  0x23   : > { %554 = vmatpush3.bf16.msra.mxu0 %v602_v9  ;;  %586 = vmatpush3.bf16.msra.mxu1 %v602_v9 }
  0x26   : > { %556 = vmatmul.mubr.bf16.vlgmr.msra.gmra.mrb[0].mxu0 %v605_v10  ;;  %564 = vmatmul.mubr.bf16.vlgmr.msra.gmra.mrb[0].mxu1 %v606_v11 }
  0x27   : > { %559 = vmatprep.mubr.bf16.mxu0 %v607_v12  ;;  %567 = vmatprep.mubr.bf16.mxu1 %v608_v13 }
  0x2e   : > { %560 = vmatmul.mubr.bf16.gmra.mrb[4].mxu0 %v609_v14  ;;  %568 = vmatmul.mubr.bf16.gmra.mrb[4].mxu1 %v610_v15 }
  0xf9   : > { %v557_v17 = vpop.f32.mrb[0].mxu0  ;;  %v565_v18 = vpop.f32.mrb[0].mxu1 }
  0xfa   : > { %v353_v19 = vadd.f32 %v557_v17, %v504_v16  ;;  %v385_v20 = vadd.f32 %v565_v18, %v504_v16  ;;  %v344_v21 = vpop.f32.mrb[1].mxu0  ;;  %v376_v22 = vpop.f32.mrb[1].mxu1 }
  0xfb   : > { %v345_v23 = vadd.f32 %v504_v16, %v344_v21  ;;  %v377_v24 = vadd.f32 %v504_v16, %v376_v22  ;;  %v558_v25 = vpop.f32.mrb[2].mxu0  ;;  %v566_v26 = vpop.f32.mrb[2].mxu1 }
  0xfc   : > { %v409_v27 = vmax.f32 %v353_v19, 0.0  ;;  %v417_v28 = vmax.f32 %v385_v20, 0.0  ;;  %v356_v29 = vadd.f32 %v558_v25, %v504_v16  ;;  %v388_v30 = vadd.f32 %v566_v26, %v504_v16  ;;  %v347_v31 = vpop.f32.mrb[3].mxu0  ;;  %v379_v32 = vpop.f32.mrb[3].mxu1 }
  0xfd   : > { %v407_v33 = vmax.f32 %v345_v23, 0.0  ;;  %v415_v34 = vmax.f32 %v377_v24, 0.0  ;;  %v348_v35 = vadd.f32 %v504_v16, %v347_v31  ;;  %v380_v36 = vadd.f32 %v504_v16, %v379_v32 }
  0xfe   : > { %425 = vst [vmem:[%s694_s14 + $0x10] sm:$0xff] %v409_v27  ;;  %433 = vst [vmem:[%s694_s14 + $0x50] sm:$0xff] %v417_v28  ;;  %v410_v37 = vmax.f32 %v356_v29, 0.0  ;;  %v418_v38 = vmax.f32 %v388_v30, 0.0 }
  0xff   : > { %423 = vst [vmem:[%s694_s14] sm:$0xff] %v407_v33  ;;  %431 = vst [vmem:[%s694_s14 + $0x40] sm:$0xff] %v415_v34  ;;  %v408_v39 = vmax.f32 %v348_v35, 0.0  ;;  %v416_v40 = vmax.f32 %v380_v36, 0.0 }
 0x100   : > { %426 = vst [vmem:[%s694_s14 + $0x18] sm:$0xff] %v410_v37  ;;  %434 = vst [vmem:[%s694_s14 + $0x58] sm:$0xff] %v418_v38 }
 0x101   : > { %424 = vst [vmem:[%s694_s14 + $0x8] sm:$0xff] %v408_v39  ;;  %432 = vst [vmem:[%s694_s14 + $0x48] sm:$0xff] %v416_v40  ;;  %v561_v41 = vpop.f32.mrb[4].mxu0  ;;  %v569_v42 = vpop.f32.mrb[4].mxu1 }
 0x102   : > { %v369_v43 = vadd.f32 %v561_v41, %v504_v16  ;;  %v401_v44 = vadd.f32 %v569_v42, %v504_v16  ;;  %v360_v45 = vpop.f32.mrb[5].mxu0  ;;  %v392_v46 = vpop.f32.mrb[5].mxu1 }
 0x103   : > { %v361_v47 = vadd.f32 %v504_v16, %v360_v45  ;;  %v393_v48 = vadd.f32 %v504_v16, %v392_v46  ;;  %v562_v49 = vpop.f32.mrb[6].mxu0  ;;  %v570_v50 = vpop.f32.mrb[6].mxu1 }
 0x104   : > { %v413_v51 = vmax.f32 %v369_v43, 0.0  ;;  %v421_v52 = vmax.f32 %v401_v44, 0.0  ;;  %v372_v53 = vadd.f32 %v562_v49, %v504_v16  ;;  %v404_v54 = vadd.f32 %v570_v50, %v504_v16  ;;  %v363_v55 = vpop.f32.mrb[7].mxu0  ;;  %v395_v56 = vpop.f32.mrb[7].mxu1 }
 0x105   : > { %v411_v57 = vmax.f32 %v361_v47, 0.0  ;;  %v419_v58 = vmax.f32 %v393_v48, 0.0  ;;  %v364_v59 = vadd.f32 %v504_v16, %v363_v55  ;;  %v396_v60 = vadd.f32 %v504_v16, %v395_v56 }
 0x106   : > { %429 = vst [vmem:[%s694_s14 + $0x30] sm:$0xff] %v413_v51  ;;  %437 = vst [vmem:[%s694_s14 + $0x70] sm:$0xff] %v421_v52  ;;  %v414_v61 = vmax.f32 %v372_v53, 0.0  ;;  %v422_v62 = vmax.f32 %v404_v54, 0.0 }
 0x107   : > { %427 = vst [vmem:[%s694_s14 + $0x20] sm:$0xff] %v411_v57  ;;  %435 = vst [vmem:[%s694_s14 + $0x60] sm:$0xff] %v419_v58  ;;  %v412_v63 = vmax.f32 %v364_v59, 0.0  ;;  %v420_v0 = vmax.f32 %v396_v60, 0.0 }
 0x108   : > { %430 = vst [vmem:[%s694_s14 + $0x38] sm:$0xff] %v414_v61  ;;  %438 = vst [vmem:[%s694_s14 + $0x78] sm:$0xff] %v422_v62 }
 0x109   : > { %428 = vst [vmem:[%s694_s14 + $0x28] sm:$0xff] %v412_v63  ;;  %436 = vst [vmem:[%s694_s14 + $0x68] sm:$0xff] %v420_v0 }
 0x10a PF: > { %s13_s12 = sadd.s32 1, %s617_s12  }
 0x10b   : > { %p10_p4 = scmp.ge.s32.totalorder %s13_s12, 5  }
 0x10d   :  { %12 = sbr.rel (!%p10_p4) target bundleno = 1 (0x1), region = 62 }

// kernel: forward.12
= control target key start
LH: loop header
LB: loop body
LE: loop exit
PB: predicated region body
PF: predicated region fallthrough
CT: control target
= control target key end

     0   :  { %v311_v0 = vmov 0.0   ;;  %vm312_vm0 = vmmov 0   ;;  %s407_s1 = inlined_call_operand.vmem [shape: bf16[128,128], index: 1, kind: input, shape index: {}]   ;;  %s408_s0 = inlined_call_operand.vmem [shape: bf16[72,128], index: 0, kind: input, shape index: {}]   ;;  %s409_s2 = inlined_call_operand.vmem [shape: f32[1,128], index: 2, kind: input, shape index: {}]   ;;  %s410_s3 = inlined_call_operand.vmem [shape: f32[72,128], index: 3, kind: output, shape index: {}]  }
   0x1   :  { %244 = vmatprep.subr.bf16.mxu0 %v311_v0  ;;  %v298_v1 = vld [vmem:[%s407_s1] sm:$0xff]   ;;  %280 = vmatprep.subr.bf16.mxu1 %v311_v0  ;;  %v299_v2 = vld [vmem:[%s407_s1 + $0x8] sm:$0xff]   ;;  %v300_v3 = vld [vmem:[%s407_s1 + $0x10] sm:$0xff]  }
   0x2   :  { %260 = vmatprep.mubr.msk.bf16.mxu0 %vm312_vm0, %v311_v0  ;;  %272 = vmatprep.mubr.msk.bf16.mxu1 %vm312_vm0, %v311_v0  ;;  %v301_v4 = vld [vmem:[%s407_s1 + $0x18] sm:$0xff]   ;;  %v302_v5 = vld [vmem:[%s407_s1 + $0x20] sm:$0xff]   ;;  %v303_v6 = vld [vmem:[%s407_s1 + $0x28] sm:$0xff]  }
   0x3   :  { %245 = vmatpush3.bf16.msra.mxu0 %v298_v1  ;;  %288 = vmatpush3.bf16.msra.mxu1 %v298_v1  ;;  %v304_v7 = vld [vmem:[%s407_s1 + $0x30] sm:$0xff]   ;;  %v305_v8 = vld [vmem:[%s407_s1 + $0x38] sm:$0xff]   ;;  %v306_v9 = vld [vmem:[%s408_s0] sm:$0xff]  }
   0x4   :  { %246 = vmatprep.subr.bf16.mxu0 %v311_v0  ;;  %281 = vmatprep.subr.bf16.mxu1 %v311_v0  ;;  %v307_v10 = vld [vmem:[%s408_s0 + $0x18] sm:$0xff]   ;;  %v308_v11 = vld [vmem:[%s408_s0 + $0x8] sm:$0xff]   ;;  %v309_v12 = vld [vmem:[%s408_s0 + $0x20] ss:$0 sps:$4 sm:$0xff]  }
   0x5   :  { %v310_v13 = vld [vmem:[%s408_s0 + $0x10] sm:$0xff]   ;;  %v217_v14 = vld [vmem:[%s409_s2] ss:$0 sm:$0xff] }
   0x7   :  { %247 = vmatpush3.bf16.msra.mxu0 %v299_v2  ;;  %289 = vmatpush3.bf16.msra.mxu1 %v299_v2 }
   0x8   :  { %248 = vmatprep.subr.bf16.mxu0 %v311_v0  ;;  %282 = vmatprep.subr.bf16.mxu1 %v311_v0 }
   0xb   :  { %249 = vmatpush3.bf16.msra.mxu0 %v300_v3  ;;  %290 = vmatpush3.bf16.msra.mxu1 %v300_v3 }
   0xc   :  { %250 = vmatprep.subr.bf16.mxu0 %v311_v0  ;;  %283 = vmatprep.subr.bf16.mxu1 %v311_v0 }
   0xf   :  { %251 = vmatpush3.bf16.msra.mxu0 %v301_v4  ;;  %291 = vmatpush3.bf16.msra.mxu1 %v301_v4 }
  0x10   :  { %252 = vmatprep.subr.bf16.mxu0 %v311_v0  ;;  %284 = vmatprep.subr.bf16.mxu1 %v311_v0 }
  0x13   :  { %253 = vmatpush3.bf16.msra.mxu0 %v302_v5  ;;  %292 = vmatpush3.bf16.msra.mxu1 %v302_v5 }
  0x14   :  { %254 = vmatprep.subr.bf16.mxu0 %v311_v0  ;;  %285 = vmatprep.subr.bf16.mxu1 %v311_v0 }
  0x17   :  { %255 = vmatpush3.bf16.msra.mxu0 %v303_v6  ;;  %293 = vmatpush3.bf16.msra.mxu1 %v303_v6 }
  0x18   :  { %256 = vmatprep.subr.bf16.mxu0 %v311_v0  ;;  %286 = vmatprep.subr.bf16.mxu1 %v311_v0 }
  0x1b   :  { %257 = vmatpush3.bf16.msra.mxu0 %v304_v7  ;;  %294 = vmatpush3.bf16.msra.mxu1 %v304_v7 }
  0x1c   :  { %258 = vmatprep.subr.bf16.mxu0 %v311_v0  ;;  %287 = vmatprep.subr.bf16.mxu1 %v311_v0 }
  0x1f   :  { %259 = vmatpush3.bf16.msra.mxu0 %v305_v8  ;;  %295 = vmatpush3.bf16.msra.mxu1 %v305_v8 }
  0x22   :  { %261 = vmatmul.mubr.bf16.vlgmr.msra.gmra.mrb[0].mxu0 %v306_v9  ;;  %273 = vmatmul.mubr.bf16.vlgmr.msra.gmra.mrb[0].mxu1 %v307_v10 }
  0x23   :  { %264 = vmatprep.mubr.msk.bf16.mxu0 %vm312_vm0, %v311_v0  ;;  %276 = vmatprep.mubr.msk.bf16.mxu1 %vm312_vm0, %v311_v0 }
  0x2a   :  { %265 = vmatmul.mubr.bf16.gmra.mrb[4].mxu0 %v308_v11  ;;  %277 = vmatmul.mubr.bf16.gmra.mrb[4].mxu1 %v309_v12 }
  0x2b   :  { %268 = vmatprep.mubr.msk.bf16.mxu0 %vm312_vm0, %v311_v0 }
  0x32   :  { %269 = vmatmul.mubr.bf16.gmra.mrb[8].mxu0 %v310_v13 }
  0xf5   :  { %v157_v15 = vpop.f32.mrb[0].mxu0  ;;  %v181_v16 = vpop.f32.mrb[0].mxu1 }
  0xf6   :  { %v158_v17 = vadd.f32 %v217_v14, %v157_v15  ;;  %v262_v18 = vpop.f32.mrb[1].mxu0  ;;  %v182_v19 = vadd.f32 %v217_v14, %v181_v16  ;;  %v274_v20 = vpop.f32.mrb[1].mxu1 }
  0xf7   :  { %v160_v21 = vpop.f32.mrb[2].mxu0  ;;  %v184_v22 = vpop.f32.mrb[2].mxu1 }
  0xf8   :  { %v195_v23 = vmax.f32 %v158_v17, 0.0  ;;  %v161_v24 = vadd.f32 %v217_v14, %v160_v21  ;;  %v263_v25 = vpop.f32.mrb[3].mxu0  ;;  %v201_v26 = vmax.f32 %v182_v19, 0.0  ;;  %v185_v27 = vadd.f32 %v217_v14, %v184_v22  ;;  %v275_v28 = vpop.f32.mrb[3].mxu1 }
  0xfa   :  { %204 = vst [vmem:[%s410_s3] sm:$0xff] %v195_v23  ;;  %v196_v29 = vmax.f32 %v161_v24, 0.0  ;;  %210 = vst [vmem:[%s410_s3 + $0x30] sm:$0xff] %v201_v26  ;;  %v202_v30 = vmax.f32 %v185_v27, 0.0 }
  0xfc   :  { %205 = vst [vmem:[%s410_s3 + $0x8] sm:$0xff] %v196_v29  ;;  %211 = vst [vmem:[%s410_s3 + $0x38] sm:$0xff] %v202_v30 }
  0xfd   :  { %v165_v31 = vpop.f32.mrb[4].mxu0  ;;  %v189_v32 = vpop.f32.mrb[4].mxu1 }
  0xfe   :  { %v166_v33 = vadd.f32 %v217_v14, %v165_v31  ;;  %v266_v34 = vpop.f32.mrb[5].mxu0  ;;  %v190_v35 = vadd.f32 %v217_v14, %v189_v32  ;;  %v278_v36 = vpop.f32.mrb[5].mxu1 }
  0xff   :  { %v168_v37 = vpop.f32.mrb[6].mxu0  ;;  %v192_v38 = vpop.f32.mrb[6].mxu1 }
 0x100   :  { %v197_v39 = vmax.f32 %v166_v33, 0.0  ;;  %v169_v40 = vadd.f32 %v217_v14, %v168_v37  ;;  %v267_v41 = vpop.f32.mrb[7].mxu0  ;;  %v203_v42 = vmax.f32 %v190_v35, 0.0  ;;  %v279_v43 = vpop.f32.mrb[7].mxu1 }
 0x102   :  { %206 = vst [vmem:[%s410_s3 + $0x10] sm:$0xff] %v197_v39  ;;  %v198_v44 = vmax.f32 %v169_v40, 0.0  ;;  %212 = vst [vmem:[%s410_s3 + $0x40] sm:$0xff] %v203_v42 }
 0x104   :  { %207 = vst [vmem:[%s410_s3 + $0x18] sm:$0xff] %v198_v44 }
 0x105   :  { %v173_v45 = vpop.f32.mrb[8].mxu0 }
 0x106   :  { %v174_v46 = vadd.f32 %v217_v14, %v173_v45  ;;  %v270_v47 = vpop.f32.mrb[9].mxu0 }
 0x107   :  { %v176_v48 = vpop.f32.mrb[10].mxu0 }
 0x108   :  { %v199_v49 = vmax.f32 %v174_v46, 0.0  ;;  %v177_v50 = vadd.f32 %v217_v14, %v176_v48  ;;  %v271_v51 = vpop.f32.mrb[11].mxu0 }
 0x10a   :  { %208 = vst [vmem:[%s410_s3 + $0x20] sm:$0xff] %v199_v49  ;;  %v200_v52 = vmax.f32 %v177_v50, 0.0 }
 0x10c   :  { %209 = vst [vmem:[%s410_s3 + $0x28] sm:$0xff] %v200_v52 }

// kernel: forward.11
= control target key start
LH: loop header
LB: loop body
LE: loop exit
PB: predicated region body
PF: predicated region fallthrough
CT: control target
= control target key end

     0   :  { %vm1305_vm0 = vcmask 1041409   ;;  %vm1308_vm1 = vcmask 1042434   ;;  %vm1311_vm2 = vcmask 1043459   ;;  %vm1314_vm3 = vcmask 1044484   ;;  %s6330_s0 = inlined_call_operand.vmem [shape: f32[72,9,16], index: 0, kind: input, shape index: {}]   ;;  %s6331_s1 = inlined_call_operand.vmem [shape: f32[72,16], index: 1, kind: output, shape index: {}]  }
   0x1   :  { %v1473_v0 = vld [vmem:[%s6330_s0] sm:$0x1]  ;;  %v1478_v1 = vld [vmem:[%s6330_s0 + $0x10] sm:$0x1]  ;;  %v1493_v4 = vld [vmem:[%s6330_s0 + $0x1] sm:$0x1] }
   0x2   :  { %v1483_v2 = vld [vmem:[%s6330_s0 + $0x20] sm:$0x1]  ;;  %v1488_v3 = vld [vmem:[%s6330_s0 + $0x30] sm:$0x1]  ;;  %v1498_v5 = vld [vmem:[%s6330_s0 + $0x11] sm:$0x1] }
   0x3   :  { %v1503_v6 = vld [vmem:[%s6330_s0 + $0x21] sm:$0x1]  ;;  %v1508_v7 = vld [vmem:[%s6330_s0 + $0x31] sm:$0x1]  ;;  %v1513_v8 = vld [vmem:[%s6330_s0 + $0x40] sm:$0x1] }
   0x4   :  { %v1518_v9 = vld [vmem:[%s6330_s0 + $0x50] sm:$0x1]  ;;  %v1523_v10 = vld [vmem:[%s6330_s0 + $0x60] sm:$0x1]  ;;  %v1533_v12 = vld [vmem:[%s6330_s0 + $0x41] sm:$0x1] }
   0x5   :  { %v1528_v11 = vld [vmem:[%s6330_s0 + $0x70] sm:$0x1]  ;;  %v1538_v13 = vld [vmem:[%s6330_s0 + $0x51] sm:$0x1]  ;;  %v1543_v14 = vld [vmem:[%s6330_s0 + $0x61] sm:$0x1] }
   0x6   :  { %6784 = vst [vmem:[#allocation2_spill] sm:$0xff] %v1528_v11  ;;  %v1548_v15 = vld [vmem:[%s6330_s0 + $0x71] sm:$0x1]  ;;  %v1553_v16 = vld [vmem:[%s6330_s0 + $0x80] sm:$0x1]  ;;  %vm1317_vm4 = vcmask 1045509  }
   0x7   :  { %6785 = vst [vmem:[#allocation3_spill] sm:$0xff] %v1548_v15  ;;  %6786 = vst [vmem:[#allocation4_spill] sm:$0xff] %v1553_v16  ;;  %v1558_v17 = vld [vmem:[%s6330_s0 + $0x90] sm:$0x1]  ;;  %v1563_v18 = vld [vmem:[%s6330_s0 + $0xa0] sm:$0x1] }
   0x8   :  { %6787 = vst [vmem:[#allocation5_spill] sm:$0xff] %v1558_v17  ;;  %6788 = vst [vmem:[#allocation6_spill] sm:$0xff] %v1563_v18  ;;  %v1568_v19 = vld [vmem:[%s6330_s0 + $0xb0] sm:$0x1]  ;;  %v1573_v20 = vld [vmem:[%s6330_s0 + $0x81] sm:$0x1] }
   0x9   :  { %6789 = vst [vmem:[#allocation7_spill] sm:$0xff] %v1568_v19  ;;  %6790 = vst [vmem:[#allocation8_spill] sm:$0xff] %v1573_v20  ;;  %v1578_v21 = vld [vmem:[%s6330_s0 + $0x91] sm:$0x1]  ;;  %v1583_v22 = vld [vmem:[%s6330_s0 + $0xa1] sm:$0x1] }
   0xa   :  { %6791 = vst [vmem:[#allocation9_spill] sm:$0xff] %v1578_v21  ;;  %6792 = vst [vmem:[#allocation10_spill] sm:$0xff] %v1583_v22  ;;  %v1588_v23 = vld [vmem:[%s6330_s0 + $0xb1] sm:$0x1]  ;;  %v1593_v24 = vld [vmem:[%s6330_s0 + $0xc0] sm:$0x1] }
   0xb   :  { %6793 = vst [vmem:[#allocation11_spill] sm:$0xff] %v1588_v23  ;;  %6794 = vst [vmem:[#allocation12_spill] sm:$0xff] %v1593_v24  ;;  %v1598_v25 = vld [vmem:[%s6330_s0 + $0xd0] sm:$0x1]  ;;  %v1603_v26 = vld [vmem:[%s6330_s0 + $0xe0] sm:$0x1] }
   0xc   :  { %6795 = vst [vmem:[#allocation13_spill] sm:$0xff] %v1598_v25  ;;  %6796 = vst [vmem:[#allocation14_spill] sm:$0xff] %v1603_v26  ;;  %v1608_v27 = vld [vmem:[%s6330_s0 + $0xf0] sm:$0x1]  ;;  %v1613_v28 = vld [vmem:[%s6330_s0 + $0xc1] sm:$0x1] }
   0xd   :  { %6797 = vst [vmem:[#allocation15_spill] sm:$0xff] %v1608_v27  ;;  %6798 = vst [vmem:[#allocation16_spill] sm:$0xff] %v1613_v28  ;;  %v1618_v29 = vld [vmem:[%s6330_s0 + $0xd1] sm:$0x1]  ;;  %v1623_v30 = vld [vmem:[%s6330_s0 + $0xe1] sm:$0x1] }
   0xe   :  { %6799 = vst [vmem:[#allocation17_spill] sm:$0xff] %v1618_v29  ;;  %6800 = vst [vmem:[#allocation18_spill] sm:$0xff] %v1623_v30  ;;  %v1628_v31 = vld [vmem:[%s6330_s0 + $0xf1] sm:$0x1]  ;;  %v1633_v32 = vld [vmem:[%s6330_s0 + $0x100] sm:$0x1] }
   0xf   :  { %6801 = vst [vmem:[#allocation19_spill] sm:$0xff] %v1628_v31  ;;  %6802 = vst [vmem:[#allocation20_spill] sm:$0xff] %v1633_v32  ;;  %v1638_v33 = vld [vmem:[%s6330_s0 + $0x110] sm:$0x1]  ;;  %v1643_v34 = vld [vmem:[%s6330_s0 + $0x120] sm:$0x1] }
  0x10   :  { %6803 = vst [vmem:[#allocation21_spill] sm:$0xff] %v1638_v33  ;;  %6804 = vst [vmem:[#allocation22_spill] sm:$0xff] %v1643_v34  ;;  %v1648_v35 = vld [vmem:[%s6330_s0 + $0x130] sm:$0x1]  ;;  %v1653_v36 = vld [vmem:[%s6330_s0 + $0x101] sm:$0x1] }
  0x11   :  { %6805 = vst [vmem:[#allocation23_spill] sm:$0xff] %v1648_v35  ;;  %6806 = vst [vmem:[#allocation24_spill] sm:$0xff] %v1653_v36  ;;  %v1658_v37 = vld [vmem:[%s6330_s0 + $0x111] sm:$0x1]  ;;  %v1663_v38 = vld [vmem:[%s6330_s0 + $0x121] sm:$0x1] }
  0x12   :  { %6807 = vst [vmem:[#allocation25_spill] sm:$0xff] %v1658_v37  ;;  %6808 = vst [vmem:[#allocation26_spill] sm:$0xff] %v1663_v38  ;;  %v1668_v39 = vld [vmem:[%s6330_s0 + $0x131] sm:$0x1]  ;;  %v1673_v40 = vld [vmem:[%s6330_s0 + $0x140] sm:$0x1] }
  0x13   :  { %6809 = vst [vmem:[#allocation27_spill] sm:$0xff] %v1668_v39  ;;  %6810 = vst [vmem:[#allocation28_spill] sm:$0xff] %v1673_v40  ;;  %v1678_v41 = vld [vmem:[%s6330_s0 + $0x150] sm:$0x1]  ;;  %v1683_v42 = vld [vmem:[%s6330_s0 + $0x160] sm:$0x1] }
  0x14   :  { %6811 = vst [vmem:[#allocation29_spill] sm:$0xff] %v1678_v41  ;;  %6812 = vst [vmem:[#allocation30_spill] sm:$0xff] %v1683_v42  ;;  %v1688_v43 = vld [vmem:[%s6330_s0 + $0x170] sm:$0x1]  ;;  %v1701_v48 = vld [vmem:[%s6330_s0 + $0x141] sm:$0x1] }
  0x15   :  { %6813 = vst [vmem:[#allocation31_spill] sm:$0xff] %v1688_v43  ;;  %6814 = vst [vmem:[#allocation32_spill] sm:$0xff] %v1701_v48  ;;  %v1706_v49 = vld [vmem:[%s6330_s0 + $0x151] sm:$0x1]  ;;  %v1711_v50 = vld [vmem:[%s6330_s0 + $0x161] sm:$0x1] }
  0x16   :  { %6815 = vst [vmem:[#allocation33_spill] sm:$0xff] %v1706_v49  ;;  %6816 = vst [vmem:[#allocation34_spill] sm:$0xff] %v1711_v50  ;;  %v1716_v51 = vld [vmem:[%s6330_s0 + $0x171] sm:$0x1]  ;;  %v1721_v52 = vld [vmem:[%s6330_s0 + $0x180] sm:$0x1] }
  0x17   :  { %6817 = vst [vmem:[#allocation35_spill] sm:$0xff] %v1716_v51  ;;  %6818 = vst [vmem:[#allocation36_spill] sm:$0xff] %v1721_v52  ;;  %v1726_v53 = vld [vmem:[%s6330_s0 + $0x190] sm:$0x1]  ;;  %v1731_v54 = vld [vmem:[%s6330_s0 + $0x1a0] sm:$0x1] }
  0x18   :  { %6819 = vst [vmem:[#allocation37_spill] sm:$0xff] %v1726_v53  ;;  %6820 = vst [vmem:[#allocation38_spill] sm:$0xff] %v1731_v54  ;;  %v1736_v55 = vld [vmem:[%s6330_s0 + $0x1b0] sm:$0x1]  ;;  %v1749_v60 = vld [vmem:[%s6330_s0 + $0x181] sm:$0x1] }
  0x19   :  { %6821 = vst [vmem:[#allocation39_spill] sm:$0xff] %v1736_v55  ;;  %6822 = vst [vmem:[#allocation40_spill] sm:$0xff] %v1749_v60  ;;  %v1754_v61 = vld [vmem:[%s6330_s0 + $0x191] sm:$0x1]  ;;  %v1759_v62 = vld [vmem:[%s6330_s0 + $0x1a1] sm:$0x1] }
  0x1a   :  { %6823 = vst [vmem:[#allocation41_spill] sm:$0xff] %v1754_v61  ;;  %6824 = vst [vmem:[#allocation42_spill] sm:$0xff] %v1759_v62  ;;  %v1764_v63 = vld [vmem:[%s6330_s0 + $0x1b1] sm:$0x1]  ;;  %v1769_v59 = vld [vmem:[%s6330_s0 + $0x1c0] sm:$0x1] }
  0x1b   :  { %6825 = vst [vmem:[#allocation43_spill] sm:$0xff] %v1764_v63  ;;  %6826 = vst [vmem:[#allocation44_spill] sm:$0xff] %v1769_v59  ;;  %v1774_v58 = vld [vmem:[%s6330_s0 + $0x1d0] sm:$0x1]  ;;  %v1779_v57 = vld [vmem:[%s6330_s0 + $0x1e0] sm:$0x1] }
  0x1c   :  { %6827 = vst [vmem:[#allocation45_spill] sm:$0xff] %v1774_v58  ;;  %6828 = vst [vmem:[#allocation46_spill] sm:$0xff] %v1779_v57  ;;  %v1784_v56 = vld [vmem:[%s6330_s0 + $0x1f0] sm:$0x1]  ;;  %v1797_v15 = vld [vmem:[%s6330_s0 + $0x1c1] sm:$0x1] }
  0x1d   :  { %6829 = vst [vmem:[#allocation47_spill] sm:$0xff] %v1784_v56  ;;  %6830 = vst [vmem:[#allocation48_spill] sm:$0xff] %v1797_v15  ;;  %v1802_v11 = vld [vmem:[%s6330_s0 + $0x1d1] sm:$0x1]  ;;  %v1807_v46 = vld [vmem:[%s6330_s0 + $0x1e1] sm:$0x1] }
  0x1e   :  { %6831 = vst [vmem:[#allocation49_spill] sm:$0xff] %v1802_v11  ;;  %6832 = vst [vmem:[#allocation50_spill] sm:$0xff] %v1807_v46  ;;  %v1812_v45 = vld [vmem:[%s6330_s0 + $0x1f1] sm:$0x1]  ;;  %v1817_v44 = vld [vmem:[%s6330_s0 + $0x200] sm:$0x1] }
  0x1f   :  { %6833 = vst [vmem:[#allocation51_spill] sm:$0xff] %v1812_v45  ;;  %6834 = vst [vmem:[#allocation52_spill] sm:$0xff] %v1817_v44  ;;  %v1822_v47 = vld [vmem:[%s6330_s0 + $0x210] sm:$0x1]  ;;  %v1827_v23 = vld [vmem:[%s6330_s0 + $0x220] sm:$0x1] }
  0x20   :  { %6835 = vst [vmem:[#allocation53_spill] sm:$0xff] %v1822_v47  ;;  %6836 = vst [vmem:[#allocation54_spill] sm:$0xff] %v1827_v23  ;;  %v1832_v19 = vld [vmem:[%s6330_s0 + $0x230] sm:$0x1]  ;;  %v1845_v20 = vld [vmem:[%s6330_s0 + $0x201] sm:$0x1] }
  0x21   :  { %6837 = vst [vmem:[#allocation55_spill] sm:$0xff] %v1832_v19  ;;  %6838 = vst [vmem:[#allocation56_spill] sm:$0xff] %v1845_v20  ;;  %v1850_v16 = vld [vmem:[%s6330_s0 + $0x211] sm:$0x1]  ;;  %v1855_v18 = vld [vmem:[%s6330_s0 + $0x221] sm:$0x1] }
  0x22   :  { %6839 = vst [vmem:[#allocation57_spill] sm:$0xff] %v1850_v16  ;;  %6840 = vst [vmem:[#allocation58_spill] sm:$0xff] %v1855_v18  ;;  %v1860_v21 = vld [vmem:[%s6330_s0 + $0x231] sm:$0x1]  ;;  %v1865_v17 = vld [vmem:[%s6330_s0 + $0x240] sm:$0x1] }
  0x23   :  { %6841 = vst [vmem:[#allocation59_spill] sm:$0xff] %v1860_v21  ;;  %6842 = vst [vmem:[#allocation60_spill] sm:$0xff] %v1865_v17  ;;  %v1870_v22 = vld [vmem:[%s6330_s0 + $0x250] sm:$0x1]  ;;  %v1875_v31 = vld [vmem:[%s6330_s0 + $0x260] sm:$0x1] }
  0x24   :  { %6843 = vst [vmem:[#allocation61_spill] sm:$0xff] %v1870_v22  ;;  %6844 = vst [vmem:[#allocation62_spill] sm:$0xff] %v1875_v31  ;;  %v1880_v27 = vld [vmem:[%s6330_s0 + $0x270] sm:$0x1]  ;;  %v1893_v28 = vld [vmem:[%s6330_s0 + $0x241] sm:$0x1] }
  0x25   :  { %6845 = vst [vmem:[#allocation63_spill] sm:$0xff] %v1880_v27  ;;  %6846 = vst [vmem:[#allocation64_spill] sm:$0xff] %v1893_v28  ;;  %v1898_v24 = vld [vmem:[%s6330_s0 + $0x251] sm:$0x1]  ;;  %v1903_v26 = vld [vmem:[%s6330_s0 + $0x261] sm:$0x1] }
  0x26   :  { %6847 = vst [vmem:[#allocation65_spill] sm:$0xff] %v1898_v24  ;;  %6848 = vst [vmem:[#allocation66_spill] sm:$0xff] %v1903_v26  ;;  %v1908_v29 = vld [vmem:[%s6330_s0 + $0x271] sm:$0x1]  ;;  %v1913_v25 = vld [vmem:[%s6330_s0 + $0x280] sm:$0x1] }
  0x27   :  { %6849 = vst [vmem:[#allocation67_spill] sm:$0xff] %v1908_v29  ;;  %6850 = vst [vmem:[#allocation68_spill] sm:$0xff] %v1913_v25  ;;  %v1918_v30 = vld [vmem:[%s6330_s0 + $0x290] sm:$0x1]  ;;  %v1923_v39 = vld [vmem:[%s6330_s0 + $0x2a0] sm:$0x1] }
  0x28   :  { %6851 = vst [vmem:[#allocation69_spill] sm:$0xff] %v1918_v30  ;;  %6852 = vst [vmem:[#allocation70_spill] sm:$0xff] %v1923_v39  ;;  %v1928_v35 = vld [vmem:[%s6330_s0 + $0x2b0] sm:$0x1]  ;;  %v1941_v36 = vld [vmem:[%s6330_s0 + $0x281] sm:$0x1] }
  0x29   :  { %6853 = vst [vmem:[#allocation71_spill] sm:$0xff] %v1928_v35  ;;  %6854 = vst [vmem:[#allocation72_spill] sm:$0xff] %v1941_v36  ;;  %v1946_v32 = vld [vmem:[%s6330_s0 + $0x291] sm:$0x1]  ;;  %v1951_v34 = vld [vmem:[%s6330_s0 + $0x2a1] sm:$0x1] }
  0x2a   :  { %6855 = vst [vmem:[#allocation73_spill] sm:$0xff] %v1946_v32  ;;  %6856 = vst [vmem:[#allocation74_spill] sm:$0xff] %v1951_v34  ;;  %v1956_v37 = vld [vmem:[%s6330_s0 + $0x2b1] sm:$0x1]  ;;  %v1961_v33 = vld [vmem:[%s6330_s0 + $0x2c0] sm:$0x1] }
  0x2b   :  { %6857 = vst [vmem:[#allocation75_spill] sm:$0xff] %v1956_v37  ;;  %6858 = vst [vmem:[#allocation76_spill] sm:$0xff] %v1961_v33  ;;  %v1966_v38 = vld [vmem:[%s6330_s0 + $0x2d0] sm:$0x1]  ;;  %v1971_v51 = vld [vmem:[%s6330_s0 + $0x2e0] sm:$0x1] }
  0x2c   :  { %6859 = vst [vmem:[#allocation77_spill] sm:$0xff] %v1966_v38  ;;  %6860 = vst [vmem:[#allocation78_spill] sm:$0xff] %v1971_v51  ;;  %v1976_v43 = vld [vmem:[%s6330_s0 + $0x2f0] sm:$0x1]  ;;  %v1989_v48 = vld [vmem:[%s6330_s0 + $0x2c1] sm:$0x1] }
  0x2d   :  { %6861 = vst [vmem:[#allocation79_spill] sm:$0xff] %v1976_v43  ;;  %6862 = vst [vmem:[#allocation80_spill] sm:$0xff] %v1989_v48  ;;  %v1994_v40 = vld [vmem:[%s6330_s0 + $0x2d1] sm:$0x1]  ;;  %v1999_v42 = vld [vmem:[%s6330_s0 + $0x2e1] sm:$0x1] }
  0x2e   :  { %6863 = vst [vmem:[#allocation81_spill] sm:$0xff] %v1994_v40  ;;  %6864 = vst [vmem:[#allocation82_spill] sm:$0xff] %v1999_v42  ;;  %v2004_v49 = vld [vmem:[%s6330_s0 + $0x2f1] sm:$0x1]  ;;  %v2009_v41 = vld [vmem:[%s6330_s0 + $0x300] sm:$0x1] }
  0x2f   :  { %6865 = vst [vmem:[#allocation83_spill] sm:$0xff] %v2004_v49  ;;  %v2014_v50 = vld [vmem:[%s6330_s0 + $0x310] sm:$0x1]  ;;  %v2019_v63 = vld [vmem:[%s6330_s0 + $0x320] sm:$0x1]  ;;  %vm1320_vm5 = vcmask 1046534  }
  0x30   :  { %6866 = vst [vmem:[#allocation84_spill] sm:$0xff] %v2019_v63  ;;  %v2024_v55 = vld [vmem:[%s6330_s0 + $0x330] sm:$0x1]  ;;  %v2037_v60 = vld [vmem:[%s6330_s0 + $0x301] sm:$0x1]  ;;  %vm1323_vm6 = vcmask 1047559  }
  0x31   :  { %6867 = vst [vmem:[#allocation85_spill] sm:$0xff] %v2024_v55  ;;  %v2042_v52 = vld [vmem:[%s6330_s0 + $0x311] sm:$0x1]  ;;  %v2047_v54 = vld [vmem:[%s6330_s0 + $0x321] sm:$0x1]  ;;  %vm1446_vm7 = vcmask 130048  }
  0x32   :  { %6868 = vst [vmem:[#allocation86_spill] sm:$0xff] %v2047_v54  ;;  %v2052_v61 = vld [vmem:[%s6330_s0 + $0x331] sm:$0x1]  ;;  %v2057_v53 = vld [vmem:[%s6330_s0 + $0x340] sm:$0x1] }
  0x33   :  { %6869 = vst [vmem:[#allocation87_spill] sm:$0xff] %v2052_v61  ;;  %v2062_v62 = vld [vmem:[%s6330_s0 + $0x350] sm:$0x1]  ;;  %v2067_v45 = vld [vmem:[%s6330_s0 + $0x360] sm:$0x1] }
  0x34   :  { %6870 = vst [vmem:[#allocation88_spill] sm:$0xff] %v2067_v45  ;;  %v2072_v56 = vld [vmem:[%s6330_s0 + $0x370] sm:$0x1]  ;;  %v2085_v15 = vld [vmem:[%s6330_s0 + $0x341] sm:$0x1] }
  0x35   :  { %6871 = vst [vmem:[#allocation89_spill] sm:$0xff] %v2072_v56  ;;  %v2090_v59 = vld [vmem:[%s6330_s0 + $0x351] sm:$0x1]  ;;  %v2095_v57 = vld [vmem:[%s6330_s0 + $0x361] sm:$0x1] }
  0x36   :  { %6872 = vst [vmem:[#allocation90_spill] sm:$0xff] %v2095_v57  ;;  %v2100_v11 = vld [vmem:[%s6330_s0 + $0x371] sm:$0x1]  ;;  %v2105_v58 = vld [vmem:[%s6330_s0 + $0x380] sm:$0x1] }
  0x37   :  { %6873 = vst [vmem:[#allocation91_spill] sm:$0xff] %v2100_v11  ;;  %v2110_v46 = vld [vmem:[%s6330_s0 + $0x390] sm:$0x1]  ;;  %v2115_v21 = vld [vmem:[%s6330_s0 + $0x3a0] sm:$0x1] }
  0x38   :  { %6874 = vst [vmem:[#allocation92_spill] sm:$0xff] %v2115_v21  ;;  %v2120_v19 = vld [vmem:[%s6330_s0 + $0x3b0] sm:$0x1]  ;;  %v2133_v20 = vld [vmem:[%s6330_s0 + $0x381] sm:$0x1] }
  0x39   :  { %6875 = vst [vmem:[#allocation93_spill] sm:$0xff] %v2120_v19  ;;  %v2138_v44 = vld [vmem:[%s6330_s0 + $0x391] sm:$0x1]  ;;  %v2143_v23 = vld [vmem:[%s6330_s0 + $0x3a1] sm:$0x1] }
  0x3a   :  { %6876 = vst [vmem:[#allocation94_spill] sm:$0xff] %v2143_v23  ;;  %v2148_v16 = vld [vmem:[%s6330_s0 + $0x3b1] sm:$0x1]  ;;  %v2153_v47 = vld [vmem:[%s6330_s0 + $0x3c0] sm:$0x1] }
  0x3b   :  { %6877 = vst [vmem:[#allocation95_spill] sm:$0xff] %v2148_v16  ;;  %v2158_v18 = vld [vmem:[%s6330_s0 + $0x3d0] sm:$0x1]  ;;  %v2163_v29 = vld [vmem:[%s6330_s0 + $0x3e0] sm:$0x1] }
  0x3c   :  { %6878 = vst [vmem:[#allocation96_spill] sm:$0xff] %v2163_v29  ;;  %v2168_v27 = vld [vmem:[%s6330_s0 + $0x3f0] sm:$0x1]  ;;  %v2181_v28 = vld [vmem:[%s6330_s0 + $0x3c1] sm:$0x1] }
  0x3d   :  { %6879 = vst [vmem:[#allocation97_spill] sm:$0xff] %v2168_v27  ;;  %v2186_v17 = vld [vmem:[%s6330_s0 + $0x3d1] sm:$0x1]  ;;  %v2191_v31 = vld [vmem:[%s6330_s0 + $0x3e1] sm:$0x1] }
  0x3e   :  { %6880 = vst [vmem:[#allocation98_spill] sm:$0xff] %v2191_v31  ;;  %v2196_v24 = vld [vmem:[%s6330_s0 + $0x3f1] sm:$0x1]  ;;  %v2201_v22 = vld [vmem:[%s6330_s0 + $0x400] sm:$0x1] }
  0x3f   :  { %6881 = vst [vmem:[#allocation99_spill] sm:$0xff] %v2196_v24  ;;  %v2206_v26 = vld [vmem:[%s6330_s0 + $0x410] sm:$0x1]  ;;  %v2211_v37 = vld [vmem:[%s6330_s0 + $0x420] sm:$0x1] }
  0x40   :  { %6882 = vst [vmem:[#allocation100_spill] sm:$0xff] %v2211_v37  ;;  %v2216_v35 = vld [vmem:[%s6330_s0 + $0x430] sm:$0x1]  ;;  %v2229_v36 = vld [vmem:[%s6330_s0 + $0x401] sm:$0x1] }
  0x41   :  { %6883 = vst [vmem:[#allocation101_spill] sm:$0xff] %v2216_v35  ;;  %v2234_v25 = vld [vmem:[%s6330_s0 + $0x411] sm:$0x1]  ;;  %v2239_v39 = vld [vmem:[%s6330_s0 + $0x421] sm:$0x1] }
  0x42   :  { %6884 = vst [vmem:[#allocation102_spill] sm:$0xff] %v2239_v39  ;;  %v2244_v32 = vld [vmem:[%s6330_s0 + $0x431] sm:$0x1]  ;;  %v2249_v30 = vld [vmem:[%s6330_s0 + $0x440] sm:$0x1] }
  0x43   :  { %6885 = vst [vmem:[#allocation103_spill] sm:$0xff] %v2244_v32  ;;  %v2254_v34 = vld [vmem:[%s6330_s0 + $0x450] sm:$0x1]  ;;  %v2259_v49 = vld [vmem:[%s6330_s0 + $0x460] sm:$0x1]  ;;  %v6892_v32 = vmax.f32 %v1473_v0, %v1493_v4 }
  0x44   :  { %6886 = vst [vmem:[#allocation104_spill] sm:$0xff] %v2254_v34  ;;  %6887 = vst [vmem:[#allocation105_spill] sm:$0xff] %v2259_v49  ;;  %v2264_v43 = vld [vmem:[%s6330_s0 + $0x470] sm:$0x1]  ;;  %v2277_v48 = vld [vmem:[%s6330_s0 + $0x441] sm:$0x1] }
  0x45   :  { %6888 = vst [vmem:[#allocation106_spill] sm:$0xff] %v2264_v43  ;;  %v2282_v33 = vld [vmem:[%s6330_s0 + $0x451] sm:$0x1]  ;;  %v2287_v51 = vld [vmem:[%s6330_s0 + $0x461] sm:$0x1] }
  0x46   :  { %6889 = vst [vmem:[#allocation107_spill] sm:$0xff] %v2282_v33  ;;  %6890 = vst [vmem:[#allocation108_spill] sm:$0xff] %v2287_v51  ;;  %v2292_v40 = vld [vmem:[%s6330_s0 + $0x471] sm:$0x1]  ;;  %v224_v54 = vld [vmem:[%s6330_s0 + $0x2] sm:$0x1]  ;;  %v6894_v51 = vmax.f32 %v1483_v2, %v1503_v6  ;;  %v6895_v33 = vmax.f32 %v1488_v3, %v1508_v7  ;;  %v6896_v3 = vmax.f32 %v1513_v8, %v1533_v12 }
  0x47   :  { %6891 = vst [vmem:[#allocation109_spill] sm:$0xff] %v2292_v40  ;;  %v225_v63 = vld [vmem:[%s6330_s0 + $0x12] sm:$0x1]  ;;  %v226_v38 = vld [vmem:[%s6330_s0 + $0x22] sm:$0x1]  ;;  %v2397_v35 = vmax.f32 %v6892_v32, %v224_v54  ;;  %v6893_v40 = vmax.f32 %v1478_v1, %v1498_v5  ;;  %v6898_v6 = vmax.f32 %v1518_v9, %v1538_v13  ;;  %v6900_v32 = vmax.f32 %v1523_v10, %v1543_v14 }
  0x48   :  { %v227_v42 = vld [vmem:[%s6330_s0 + $0x32] sm:$0x1]  ;;  %v228_v57 = vld [vmem:[%s6330_s0 + $0x42] sm:$0x1]  ;;  %v2407_v49 = vmax.f32 %v6894_v51, %v226_v38 }
  0x49   :  { %v229_v45 = vld [vmem:[%s6330_s0 + $0x52] sm:$0x1]  ;;  %v230_v61 = vld [vmem:[%s6330_s0 + $0x62] sm:$0x1]  ;;  %v2402_v43 = vmax.f32 %v6893_v40, %v225_v63  ;;  %v2412_v34 = vmax.f32 %v6895_v33, %v227_v42  ;;  %v2429_v5 = vmax.f32 %v6896_v3, %v228_v57  ;;  %v6903_v40 = vld [vmem:[#allocation3_spill] sm:$0xff] }
  0x4a   :  { %v231_v55 = vld [vmem:[%s6330_s0 + $0x72] sm:$0x1]  ;;  %v232_v23 = vld [vmem:[%s6330_s0 + $0x82] sm:$0x1]  ;;  %v2434_v7 = vmax.f32 %v6898_v6, %v229_v45  ;;  %v2439_v33 = vmax.f32 %v6900_v32, %v230_v61  ;;  %v6911_v57 = vld [vmem:[#allocation9_spill] sm:$0xff] }
  0x4b   :  { %v233_v21 = vld [vmem:[%s6330_s0 + $0x92] sm:$0x1]  ;;  %v234_v11 = vld [vmem:[%s6330_s0 + $0xa2] sm:$0x1]  ;;  %6897 = vst [vmem:[#allocation110_spill] sm:$0xff] %v2429_v5 }
  0x4c   :  { %v235_v56 = vld [vmem:[%s6330_s0 + $0xb2] sm:$0x1]  ;;  %v236_v31 = vld [vmem:[%s6330_s0 + $0xc2] sm:$0x1]  ;;  %6899 = vst [vmem:[#allocation111_spill] sm:$0xff] %v2434_v7  ;;  %6901 = vst [vmem:[#allocation112_spill] sm:$0xff] %v2439_v33 }
  0x4d   :  { %v237_v29 = vld [vmem:[%s6330_s0 + $0xd2] sm:$0x1]  ;;  %v238_v16 = vld [vmem:[%s6330_s0 + $0xe2] sm:$0x1]  ;;  %v3082_v5 = vld [vmem:[%s6330_s0 + $0x1d3] sm:$0x1] }
  0x4e   :  { %v239_v19 = vld [vmem:[%s6330_s0 + $0xf2] sm:$0x1]  ;;  %v240_v39 = vld [vmem:[%s6330_s0 + $0x102] sm:$0x1]  ;;  %v3138_v7 = vld [vmem:[%s6330_s0 + $0x253] sm:$0x1] }
  0x4f   :  { %v241_v37 = vld [vmem:[%s6330_s0 + $0x112] sm:$0x1]  ;;  %v242_v24 = vld [vmem:[%s6330_s0 + $0x122] sm:$0x1] }
  0x50   :  { %v243_v27 = vld [vmem:[%s6330_s0 + $0x132] sm:$0x1]  ;;  %v244_v0 = vld [vmem:[%s6330_s0 + $0x142] sm:$0x1] }
  0x51   :  { %v245_v1 = vld [vmem:[%s6330_s0 + $0x152] sm:$0x1]  ;;  %v246_v4 = vld [vmem:[%s6330_s0 + $0x162] sm:$0x1] }
  0x52   :  { %v247_v2 = vld [vmem:[%s6330_s0 + $0x172] sm:$0x1]  ;;  %v6902_v38 = vld [vmem:[#allocation2_spill] sm:$0xff] }
  0x53   :  { %v6904_v42 = vmax.f32 %v6902_v38, %v6903_v40  ;;  %v248_v8 = vld [vmem:[%s6330_s0 + $0x182] sm:$0x1]  ;;  %v249_v9 = vld [vmem:[%s6330_s0 + $0x192] sm:$0x1]  ;;  %v6918_v40 = vld [vmem:[#allocation7_spill] sm:$0xff] }
  0x54   :  { %v250_v12 = vld [vmem:[%s6330_s0 + $0x1a2] sm:$0x1]  ;;  %v251_v10 = vld [vmem:[%s6330_s0 + $0x1b2] sm:$0x1] }
  0x55   :  { %v2444_v51 = vmax.f32 %v6904_v42, %v231_v55  ;;  %v6906_v13 = vld [vmem:[#allocation4_spill] sm:$0xff]  ;;  %v6910_v55 = vld [vmem:[#allocation5_spill] sm:$0xff]  ;;  %v6914_v3 = vld [vmem:[#allocation6_spill] sm:$0xff] }
  0x56   :  { %v6907_v14 = vld [vmem:[#allocation8_spill] sm:$0xff]  ;;  %v6912_v61 = vmax.f32 %v6910_v55, %v6911_v57  ;;  %v6915_v6 = vld [vmem:[#allocation10_spill] sm:$0xff]  ;;  %v6919_v42 = vld [vmem:[#allocation11_spill] sm:$0xff] }
  0x57   :  { %6905 = vst [vmem:[#allocation2_spill] sm:$0xff] %v2444_v51  ;;  %v6908_v45 = vmax.f32 %v6906_v13, %v6907_v14  ;;  %v6916_v32 = vmax.f32 %v6914_v3, %v6915_v6  ;;  %v6920_v51 = vmax.f32 %v6918_v40, %v6919_v42  ;;  %v253_v13 = vld [vmem:[%s6330_s0 + $0x1d2] sm:$0x1]  ;;  %v6926_v55 = vld [vmem:[#allocation13_spill] sm:$0xff]  ;;  %v6930_v6 = vld [vmem:[#allocation14_spill] sm:$0xff] }
  0x58   :  { %v2466_v63 = vmax.f32 %v6912_v61, %v233_v21  ;;  %v254_v21 = vld [vmem:[%s6330_s0 + $0x1e2] sm:$0x1]  ;;  %v6922_v14 = vld [vmem:[#allocation12_spill] sm:$0xff]  ;;  %v6927_v57 = vld [vmem:[#allocation17_spill] sm:$0xff] }
  0x59   :  { %v2461_v54 = vmax.f32 %v6908_v45, %v232_v23  ;;  %v2471_v38 = vmax.f32 %v6916_v32, %v234_v11  ;;  %v2476_v33 = vmax.f32 %v6920_v51, %v235_v56  ;;  %v252_v23 = vld [vmem:[%s6330_s0 + $0x1c2] sm:$0x1]  ;;  %v255_v11 = vld [vmem:[%s6330_s0 + $0x1f2] sm:$0x1]  ;;  %v6928_v61 = vmax.f32 %v6926_v55, %v6927_v57 }
  0x5a   :  { %6913 = vst [vmem:[#allocation4_spill] sm:$0xff] %v2466_v63  ;;  %v6923_v45 = vld [vmem:[#allocation16_spill] sm:$0xff]  ;;  %v6931_v32 = vld [vmem:[#allocation18_spill] sm:$0xff] }
  0x5b   :  { %6909 = vst [vmem:[#allocation3_spill] sm:$0xff] %v2461_v54  ;;  %6917 = vst [vmem:[#allocation8_spill] sm:$0xff] %v2471_v38  ;;  %v6924_v56 = vmax.f32 %v6922_v14, %v6923_v45  ;;  %v2498_v3 = vmax.f32 %v6928_v61, %v237_v29  ;;  %v6932_v40 = vmax.f32 %v6930_v6, %v6931_v32  ;;  %v6935_v38 = vld [vmem:[#allocation19_spill] sm:$0xff]  ;;  %v257_v14 = vld [vmem:[%s6330_s0 + $0x212] sm:$0x1] }
  0x5c   :  { %6921 = vst [vmem:[#allocation5_spill] sm:$0xff] %v2476_v33  ;;  %v6934_v33 = vld [vmem:[#allocation15_spill] sm:$0xff]  ;;  %v258_v29 = vld [vmem:[%s6330_s0 + $0x222] sm:$0x1]  ;;  %v6938_v45 = vld [vmem:[#allocation20_spill] sm:$0xff] }
  0x5d   :  { %v2493_v51 = vmax.f32 %v6924_v56, %v236_v31  ;;  %6929 = vst [vmem:[#allocation6_spill] sm:$0xff] %v2498_v3  ;;  %v2503_v42 = vmax.f32 %v6932_v40, %v238_v16  ;;  %v6936_v63 = vmax.f32 %v6934_v33, %v6935_v38  ;;  %v256_v31 = vld [vmem:[%s6330_s0 + $0x202] sm:$0x1]  ;;  %v259_v16 = vld [vmem:[%s6330_s0 + $0x232] sm:$0x1]  ;;  %v6942_v38 = vld [vmem:[#allocation21_spill] sm:$0xff] }
  0x5e   :  { %v6939_v33 = vld [vmem:[#allocation24_spill] sm:$0xff]  ;;  %v6943_v56 = vld [vmem:[#allocation25_spill] sm:$0xff]  ;;  %v6946_v61 = vld [vmem:[#allocation22_spill] sm:$0xff] }
  0x5f   :  { %6925 = vst [vmem:[#allocation9_spill] sm:$0xff] %v2493_v51  ;;  %6933 = vst [vmem:[#allocation10_spill] sm:$0xff] %v2503_v42  ;;  %v2508_v54 = vmax.f32 %v6936_v63, %v239_v19  ;;  %v6940_v19 = vmax.f32 %v6938_v45, %v6939_v33  ;;  %v6944_v55 = vmax.f32 %v6942_v38, %v6943_v56  ;;  %v6947_v6 = vld [vmem:[#allocation26_spill] sm:$0xff]  ;;  %v6951_v42 = vld [vmem:[#allocation27_spill] sm:$0xff] }
  0x60   :  { %v6948_v32 = vmax.f32 %v6946_v61, %v6947_v6  ;;  %v261_v45 = vld [vmem:[%s6330_s0 + $0x252] sm:$0x1]  ;;  %v6963_v61 = vld [vmem:[#allocation34_spill] sm:$0xff] }
  0x61   :  { %6937 = vst [vmem:[#allocation7_spill] sm:$0xff] %v2508_v54  ;;  %v2525_v63 = vmax.f32 %v6940_v19, %v240_v39  ;;  %v2530_v57 = vmax.f32 %v6944_v55, %v241_v37  ;;  %v6950_v54 = vld [vmem:[#allocation23_spill] sm:$0xff]  ;;  %v260_v39 = vld [vmem:[%s6330_s0 + $0x242] sm:$0x1]  ;;  %v6954_v33 = vld [vmem:[#allocation28_spill] sm:$0xff] }
  0x62   :  { %v2535_v40 = vmax.f32 %v6948_v32, %v242_v24  ;;  %v6952_v3 = vmax.f32 %v6950_v54, %v6951_v42  ;;  %v262_v37 = vld [vmem:[%s6330_s0 + $0x262] sm:$0x1]  ;;  %v263_v24 = vld [vmem:[%s6330_s0 + $0x272] sm:$0x1]  ;;  %v6958_v42 = vld [vmem:[#allocation29_spill] sm:$0xff] }
  0x63   :  { %6941 = vst [vmem:[#allocation11_spill] sm:$0xff] %v2525_v63  ;;  %6945 = vst [vmem:[#allocation12_spill] sm:$0xff] %v2530_v57  ;;  %v6955_v54 = vld [vmem:[#allocation32_spill] sm:$0xff]  ;;  %v6959_v19 = vld [vmem:[#allocation33_spill] sm:$0xff] }
  0x64   :  { %6949 = vst [vmem:[#allocation16_spill] sm:$0xff] %v2535_v40  ;;  %v2540_v51 = vmax.f32 %v6952_v3, %v243_v27  ;;  %v6956_v27 = vmax.f32 %v6954_v33, %v6955_v54  ;;  %v6960_v38 = vmax.f32 %v6958_v42, %v6959_v19  ;;  %v6962_v55 = vld [vmem:[#allocation30_spill] sm:$0xff]  ;;  %v6967_v40 = vld [vmem:[#allocation35_spill] sm:$0xff]  ;;  %v265_v33 = vld [vmem:[%s6330_s0 + $0x292] sm:$0x1] }
  0x65   :  { %v6964_v6 = vmax.f32 %v6962_v55, %v6963_v61  ;;  %v6970_v54 = vld [vmem:[#allocation36_spill] sm:$0xff]  ;;  %v6979_v55 = vld [vmem:[#allocation42_spill] sm:$0xff] }
  0x66   :  { %6953 = vst [vmem:[#allocation13_spill] sm:$0xff] %v2540_v51  ;;  %v2557_v3 = vmax.f32 %v6956_v27, %v244_v0  ;;  %v2562_v56 = vmax.f32 %v6960_v38, %v245_v1  ;;  %v6966_v51 = vld [vmem:[#allocation31_spill] sm:$0xff]  ;;  %v264_v0 = vld [vmem:[%s6330_s0 + $0x282] sm:$0x1]  ;;  %v6975_v27 = vld [vmem:[#allocation41_spill] sm:$0xff] }
  0x67   :  { %v2567_v32 = vmax.f32 %v6964_v6, %v246_v4  ;;  %v6968_v57 = vmax.f32 %v6966_v51, %v6967_v40  ;;  %v266_v1 = vld [vmem:[%s6330_s0 + $0x2a2] sm:$0x1]  ;;  %v267_v4 = vld [vmem:[%s6330_s0 + $0x2b2] sm:$0x1]  ;;  %v6974_v40 = vld [vmem:[#allocation37_spill] sm:$0xff] }
  0x68   :  { %6957 = vst [vmem:[#allocation17_spill] sm:$0xff] %v2557_v3  ;;  %6961 = vst [vmem:[#allocation14_spill] sm:$0xff] %v2562_v56  ;;  %v6971_v51 = vld [vmem:[#allocation40_spill] sm:$0xff]  ;;  %v6976_v42 = vmax.f32 %v6974_v40, %v6975_v27  ;;  %v6978_v38 = vld [vmem:[#allocation38_spill] sm:$0xff] }
  0x69   :  { %6965 = vst [vmem:[#allocation18_spill] sm:$0xff] %v2567_v32  ;;  %v2572_v63 = vmax.f32 %v6968_v57, %v247_v2  ;;  %v6972_v2 = vmax.f32 %v6970_v54, %v6971_v51  ;;  %v6980_v61 = vmax.f32 %v6978_v38, %v6979_v55  ;;  %v6983_v32 = vld [vmem:[#allocation43_spill] sm:$0xff]  ;;  %v269_v54 = vld [vmem:[%s6330_s0 + $0x2d2] sm:$0x1]  ;;  %v6995_v38 = vld [vmem:[#allocation50_spill] sm:$0xff] }
  0x6a   :  { %v2594_v19 = vmax.f32 %v6976_v42, %v249_v9  ;;  %v270_v9 = vld [vmem:[%s6330_s0 + $0x2e2] sm:$0x1]  ;;  %v6986_v51 = vld [vmem:[#allocation44_spill] sm:$0xff] }
  0x6b   :  { %6969 = vst [vmem:[#allocation15_spill] sm:$0xff] %v2572_v63  ;;  %v2589_v57 = vmax.f32 %v6972_v2, %v248_v8  ;;  %v2599_v6 = vmax.f32 %v6980_v61, %v250_v12  ;;  %v6982_v63 = vld [vmem:[#allocation39_spill] sm:$0xff]  ;;  %v268_v8 = vld [vmem:[%s6330_s0 + $0x2c2] sm:$0x1]  ;;  %v271_v12 = vld [vmem:[%s6330_s0 + $0x2f2] sm:$0x1] }
  0x6c   :  { %6977 = vst [vmem:[#allocation20_spill] sm:$0xff] %v2594_v19  ;;  %v6984_v56 = vmax.f32 %v6982_v63, %v6983_v32  ;;  %v6987_v63 = vld [vmem:[#allocation48_spill] sm:$0xff]  ;;  %v6990_v32 = vld [vmem:[#allocation45_spill] sm:$0xff]  ;;  %v6994_v42 = vld [vmem:[#allocation46_spill] sm:$0xff] }
  0x6d   :  { %6973 = vst [vmem:[#allocation19_spill] sm:$0xff] %v2589_v57  ;;  %6981 = vst [vmem:[#allocation24_spill] sm:$0xff] %v2599_v6  ;;  %v6991_v2 = vld [vmem:[#allocation49_spill] sm:$0xff]  ;;  %v6996_v55 = vmax.f32 %v6994_v42, %v6995_v38  ;;  %v6999_v6 = vld [vmem:[#allocation51_spill] sm:$0xff] }
  0x6e   :  { %v2604_v3 = vmax.f32 %v6984_v56, %v251_v10  ;;  %v6988_v10 = vmax.f32 %v6986_v51, %v6987_v63  ;;  %v6992_v40 = vmax.f32 %v6990_v32, %v6991_v2  ;;  %v273_v51 = vld [vmem:[%s6330_s0 + $0x312] sm:$0x1]  ;;  %v7011_v42 = vld [vmem:[#allocation58_spill] sm:$0xff] }
  0x6f   :  { %v2631_v61 = vmax.f32 %v6996_v55, %v254_v21  ;;  %v275_v21 = vld [vmem:[%s6330_s0 + $0x332] sm:$0x1] }
  0x70   :  { %6985 = vst [vmem:[#allocation21_spill] sm:$0xff] %v2604_v3  ;;  %v2621_v56 = vmax.f32 %v6988_v10, %v252_v23  ;;  %v2626_v27 = vmax.f32 %v6992_v40, %v253_v13  ;;  %v6998_v3 = vld [vmem:[#allocation47_spill] sm:$0xff]  ;;  %v272_v23 = vld [vmem:[%s6330_s0 + $0x302] sm:$0x1]  ;;  %v7002_v63 = vld [vmem:[#allocation52_spill] sm:$0xff] }
  0x71   :  { %6997 = vst [vmem:[#allocation26_spill] sm:$0xff] %v2631_v61  ;;  %v7000_v19 = vmax.f32 %v6998_v3, %v6999_v6  ;;  %v274_v13 = vld [vmem:[%s6330_s0 + $0x322] sm:$0x1]  ;;  %v7003_v3 = vld [vmem:[#allocation56_spill] sm:$0xff]  ;;  %v7006_v6 = vld [vmem:[#allocation53_spill] sm:$0xff] }
  0x72   :  { %6989 = vst [vmem:[#allocation25_spill] sm:$0xff] %v2621_v56  ;;  %6993 = vst [vmem:[#allocation22_spill] sm:$0xff] %v2626_v27  ;;  %v7007_v10 = vld [vmem:[#allocation57_spill] sm:$0xff]  ;;  %v7010_v40 = vld [vmem:[#allocation54_spill] sm:$0xff] }
  0x73   :  { %v2636_v57 = vmax.f32 %v7000_v19, %v255_v11  ;;  %v7004_v11 = vmax.f32 %v7002_v63, %v7003_v3  ;;  %v7008_v32 = vmax.f32 %v7006_v6, %v7007_v10  ;;  %v7012_v38 = vmax.f32 %v7010_v40, %v7011_v42  ;;  %v7015_v61 = vld [vmem:[#allocation59_spill] sm:$0xff]  ;;  %v277_v63 = vld [vmem:[%s6330_s0 + $0x352] sm:$0x1]  ;;  %v7027_v40 = vld [vmem:[#allocation66_spill] sm:$0xff] }
  0x74   :  { %v7018_v3 = vld [vmem:[#allocation60_spill] sm:$0xff] }
  0x75   :  { %7001 = vst [vmem:[#allocation23_spill] sm:$0xff] %v2636_v57  ;;  %v2653_v19 = vmax.f32 %v7004_v11, %v256_v31  ;;  %v2658_v2 = vmax.f32 %v7008_v32, %v257_v14  ;;  %v2663_v55 = vmax.f32 %v7012_v38, %v258_v29  ;;  %v7014_v57 = vld [vmem:[#allocation55_spill] sm:$0xff]  ;;  %v276_v31 = vld [vmem:[%s6330_s0 + $0x342] sm:$0x1]  ;;  %v279_v29 = vld [vmem:[%s6330_s0 + $0x372] sm:$0x1] }
  0x76   :  { %v7016_v27 = vmax.f32 %v7014_v57, %v7015_v61  ;;  %v278_v14 = vld [vmem:[%s6330_s0 + $0x362] sm:$0x1]  ;;  %v7019_v57 = vld [vmem:[#allocation64_spill] sm:$0xff]  ;;  %v7022_v61 = vld [vmem:[#allocation61_spill] sm:$0xff] }
  0x77   :  { %7005 = vst [vmem:[#allocation27_spill] sm:$0xff] %v2653_v19  ;;  %7009 = vst [vmem:[#allocation28_spill] sm:$0xff] %v2658_v2  ;;  %v7023_v11 = vld [vmem:[#allocation65_spill] sm:$0xff]  ;;  %v7026_v32 = vld [vmem:[#allocation62_spill] sm:$0xff] }
  0x78   :  { %7013 = vst [vmem:[#allocation32_spill] sm:$0xff] %v2663_v55  ;;  %v2668_v56 = vmax.f32 %v7016_v27, %v259_v16  ;;  %v7020_v16 = vmax.f32 %v7018_v3, %v7019_v57  ;;  %v7024_v6 = vmax.f32 %v7022_v61, %v7023_v11  ;;  %v7028_v42 = vmax.f32 %v7026_v32, %v7027_v40  ;;  %v7031_v55 = vld [vmem:[#allocation67_spill] sm:$0xff]  ;;  %v281_v3 = vld [vmem:[%s6330_s0 + $0x392] sm:$0x1]  ;;  %v7043_v32 = vld [vmem:[#allocation74_spill] sm:$0xff] }
  0x79   :  { %v7034_v57 = vld [vmem:[#allocation68_spill] sm:$0xff] }
  0x7a   :  { %7017 = vst [vmem:[#allocation29_spill] sm:$0xff] %v2668_v56  ;;  %v2685_v27 = vmax.f32 %v7020_v16, %v260_v39  ;;  %v2690_v10 = vmax.f32 %v7024_v6, %v261_v45  ;;  %v2695_v38 = vmax.f32 %v7028_v42, %v262_v37  ;;  %v7030_v56 = vld [vmem:[#allocation63_spill] sm:$0xff]  ;;  %v280_v39 = vld [vmem:[%s6330_s0 + $0x382] sm:$0x1]  ;;  %v283_v37 = vld [vmem:[%s6330_s0 + $0x3b2] sm:$0x1] }
  0x7b   :  { %v7032_v2 = vmax.f32 %v7030_v56, %v7031_v55  ;;  %v282_v45 = vld [vmem:[%s6330_s0 + $0x3a2] sm:$0x1]  ;;  %v7035_v56 = vld [vmem:[#allocation72_spill] sm:$0xff]  ;;  %v7038_v55 = vld [vmem:[#allocation69_spill] sm:$0xff] }
  0x7c   :  { %7021 = vst [vmem:[#allocation33_spill] sm:$0xff] %v2685_v27  ;;  %7025 = vst [vmem:[#allocation30_spill] sm:$0xff] %v2690_v10  ;;  %v7039_v16 = vld [vmem:[#allocation73_spill] sm:$0xff]  ;;  %v7042_v6 = vld [vmem:[#allocation70_spill] sm:$0xff] }
  0x7d   :  { %7029 = vst [vmem:[#allocation34_spill] sm:$0xff] %v2695_v38  ;;  %v2700_v19 = vmax.f32 %v7032_v2, %v263_v24  ;;  %v7036_v24 = vmax.f32 %v7034_v57, %v7035_v56  ;;  %v7040_v61 = vmax.f32 %v7038_v55, %v7039_v16  ;;  %v7044_v40 = vmax.f32 %v7042_v6, %v7043_v32  ;;  %v7047_v38 = vld [vmem:[#allocation75_spill] sm:$0xff]  ;;  %v285_v57 = vld [vmem:[%s6330_s0 + $0x3d2] sm:$0x1]  ;;  %v7057_v6 = vld [vmem:[#allocation82_spill] sm:$0xff] }
  0x7e   :  { %v7050_v56 = vld [vmem:[#allocation76_spill] sm:$0xff] }
  0x7f   :  { %7033 = vst [vmem:[#allocation31_spill] sm:$0xff] %v2700_v19  ;;  %v2717_v2 = vmax.f32 %v7036_v24, %v264_v0  ;;  %v2722_v11 = vmax.f32 %v7040_v61, %v265_v33  ;;  %v2727_v42 = vmax.f32 %v7044_v40, %v266_v1  ;;  %v7046_v19 = vld [vmem:[#allocation71_spill] sm:$0xff]  ;;  %v284_v0 = vld [vmem:[%s6330_s0 + $0x3c2] sm:$0x1]  ;;  %v287_v1 = vld [vmem:[%s6330_s0 + $0x3f2] sm:$0x1] }
  0x80   :  { %v7048_v10 = vmax.f32 %v7046_v19, %v7047_v38  ;;  %v286_v33 = vld [vmem:[%s6330_s0 + $0x3e2] sm:$0x1]  ;;  %v7051_v19 = vld [vmem:[#allocation80_spill] sm:$0xff]  ;;  %v7053_v38 = vld [vmem:[#allocation77_spill] sm:$0xff] }
  0x81   :  { %7037 = vst [vmem:[#allocation35_spill] sm:$0xff] %v2717_v2  ;;  %7041 = vst [vmem:[#allocation36_spill] sm:$0xff] %v2722_v11  ;;  %v7054_v24 = vld [vmem:[#allocation81_spill] sm:$0xff]  ;;  %v7056_v61 = vld [vmem:[#allocation78_spill] sm:$0xff] }
  0x82   :  { %7045 = vst [vmem:[#allocation40_spill] sm:$0xff] %v2727_v42  ;;  %v2732_v27 = vmax.f32 %v7048_v10, %v267_v4  ;;  %v7052_v4 = vmax.f32 %v7050_v56, %v7051_v19  ;;  %v7055_v55 = vmax.f32 %v7053_v38, %v7054_v24  ;;  %v7058_v32 = vmax.f32 %v7056_v61, %v7057_v6  ;;  %v7061_v42 = vld [vmem:[#allocation83_spill] sm:$0xff]  ;;  %v289_v56 = vld [vmem:[%s6330_s0 + $0x412] sm:$0x1] }
  0x83   :  { %v7066_v19 = vld [vmem:[#allocation84_spill] sm:$0xff]  ;;  %v7071_v61 = vld [vmem:[#allocation87_spill] sm:$0xff]  ;;  %7159 = vst [vmem:[#allocation78_spill] sm:$0xff] %v3082_v5  ;;  %v3283_v5 = vld [vmem:[%s6330_s0 + $0x3a3] sm:$0x1] }
  0x84   :  { %7049 = vst [vmem:[#allocation37_spill] sm:$0xff] %v2732_v27  ;;  %v2749_v10 = vmax.f32 %v7052_v4, %v268_v8  ;;  %v2754_v16 = vmax.f32 %v7055_v55, %v269_v54  ;;  %v2759_v40 = vmax.f32 %v7058_v32, %v270_v9  ;;  %v7060_v27 = vld [vmem:[#allocation79_spill] sm:$0xff]  ;;  %v288_v8 = vld [vmem:[%s6330_s0 + $0x402] sm:$0x1]  ;;  %v291_v9 = vld [vmem:[%s6330_s0 + $0x432] sm:$0x1] }
  0x85   :  { %v7062_v11 = vmax.f32 %v7060_v27, %v7061_v42  ;;  %v290_v54 = vld [vmem:[%s6330_s0 + $0x422] sm:$0x1]  ;;  %v7070_v55 = vld [vmem:[#allocation85_spill] sm:$0xff] }
  0x86   :  { %7059 = vst [vmem:[#allocation41_spill] sm:$0xff] %v2759_v40  ;;  %v7067_v4 = vld [vmem:[#allocation86_spill] sm:$0xff]  ;;  %v7072_v6 = vmax.f32 %v7070_v55, %v7071_v61  ;;  %v7081_v55 = vld [vmem:[#allocation91_spill] sm:$0xff]  ;;  %v3362_v40 = vld [vmem:[%s6330_s0 + $0x453] sm:$0x1] }
  0x87   :  { %v2764_v2 = vmax.f32 %v7062_v11, %v271_v12  ;;  %v7064_v12 = vmax.f32 %v2009_v41, %v2037_v60  ;;  %v7065_v11 = vmax.f32 %v2014_v50, %v2042_v52  ;;  %v7068_v38 = vmax.f32 %v7066_v19, %v7067_v4  ;;  %v292_v41 = vld [vmem:[%s6330_s0 + $0x442] sm:$0x1]  ;;  %v293_v50 = vld [vmem:[%s6330_s0 + $0x452] sm:$0x1] }
  0x88   :  { %v2796_v32 = vmax.f32 %v7072_v6, %v275_v21  ;;  %v294_v52 = vld [vmem:[%s6330_s0 + $0x462] sm:$0x1]  ;;  %v295_v60 = vld [vmem:[%s6330_s0 + $0x472] sm:$0x1] }
  0x89   :  { %7063 = vst [vmem:[#allocation38_spill] sm:$0xff] %v2764_v2  ;;  %v2781_v27 = vmax.f32 %v7064_v12, %v272_v23  ;;  %v2786_v42 = vmax.f32 %v7065_v11, %v273_v51  ;;  %v2791_v24 = vmax.f32 %v7068_v38, %v274_v13  ;;  %v7074_v23 = vmax.f32 %v2057_v53, %v2085_v15  ;;  %v7076_v12 = vld [vmem:[#allocation88_spill] sm:$0xff]  ;;  %v7077_v11 = vld [vmem:[#allocation90_spill] sm:$0xff]  ;;  %v7080_v38 = vld [vmem:[#allocation89_spill] sm:$0xff] }
  0x8a   :  { %7073 = vst [vmem:[#allocation39_spill] sm:$0xff] %v2796_v32  ;;  %v7075_v13 = vmax.f32 %v2062_v62, %v2090_v59  ;;  %v7078_v19 = vmax.f32 %v7076_v12, %v7077_v11  ;;  %v7082_v61 = vmax.f32 %v7080_v38, %v7081_v55  ;;  %v2833_v15 = vld [vmem:[%s6330_s0 + $0x3] sm:$0x1]  ;;  %v2838_v53 = vld [vmem:[%s6330_s0 + $0x13] sm:$0x1]  ;;  %v7091_v38 = vld [vmem:[#allocation95_spill] sm:$0xff] }
  0x8b   :  { %7069 = vst [vmem:[#allocation42_spill] sm:$0xff] %v2791_v24  ;;  %v2813_v51 = vmax.f32 %v7074_v23, %v276_v31  ;;  %v2843_v59 = vld [vmem:[%s6330_s0 + $0x23] sm:$0x1]  ;;  %v2848_v62 = vld [vmem:[%s6330_s0 + $0x33] sm:$0x1]  ;;  %v7084_v31 = vmax.f32 %v2105_v58, %v2133_v20  ;;  %7175 = vst [vmem:[#allocation88_spill] sm:$0xff] %v3138_v7 }
  0x8c   :  { %v2818_v21 = vmax.f32 %v7075_v13, %v277_v63  ;;  %v2823_v4 = vmax.f32 %v7078_v19, %v278_v14  ;;  %v2828_v6 = vmax.f32 %v7082_v61, %v279_v29  ;;  %v7085_v14 = vmax.f32 %v2110_v46, %v2138_v44  ;;  %v7086_v23 = vld [vmem:[#allocation92_spill] sm:$0xff]  ;;  %v7087_v13 = vld [vmem:[#allocation94_spill] sm:$0xff]  ;;  %v7090_v19 = vld [vmem:[#allocation93_spill] sm:$0xff] }
  0x8d   :  { %v2853_v63 = vmax.f32 %v7084_v31, %v280_v39  ;;  %v7088_v12 = vmax.f32 %v7086_v23, %v7087_v13  ;;  %v7092_v55 = vmax.f32 %v7090_v19, %v7091_v38  ;;  %v2873_v20 = vld [vmem:[%s6330_s0 + $0x43] sm:$0x1]  ;;  %v2878_v44 = vld [vmem:[%s6330_s0 + $0x53] sm:$0x1]  ;;  %v7098_v39 = vmax.f32 %v2153_v47, %v2181_v28  ;;  %v7106_v19 = vld [vmem:[#allocation99_spill] sm:$0xff] }
  0x8e   :  { %7079 = vst [vmem:[#allocation43_spill] sm:$0xff] %v2823_v4  ;;  %7083 = vst [vmem:[#allocation44_spill] sm:$0xff] %v2828_v6  ;;  %v2858_v29 = vmax.f32 %v7085_v14, %v281_v3  ;;  %v2883_v46 = vld [vmem:[%s6330_s0 + $0x63] sm:$0x1]  ;;  %v2888_v58 = vld [vmem:[%s6330_s0 + $0x73] sm:$0x1] }
  0x8f   :  { %v2863_v11 = vmax.f32 %v7088_v12, %v282_v45  ;;  %v2868_v61 = vmax.f32 %v7092_v55, %v283_v37  ;;  %7094 = vst [vmem:[#allocation49_spill] sm:$0xff] %v2873_v20  ;;  %7095 = vst [vmem:[#allocation46_spill] sm:$0xff] %v2878_v44  ;;  %v2893_v3 = vmax.f32 %v7098_v39, %v284_v0  ;;  %v7101_v31 = vld [vmem:[#allocation96_spill] sm:$0xff]  ;;  %v7102_v14 = vld [vmem:[#allocation98_spill] sm:$0xff] }
  0x90   :  { %7096 = vst [vmem:[#allocation50_spill] sm:$0xff] %v2883_v46  ;;  %7097 = vst [vmem:[#allocation47_spill] sm:$0xff] %v2888_v58  ;;  %v7099_v45 = vmax.f32 %v2158_v18, %v2186_v17  ;;  %v7103_v23 = vmax.f32 %v7101_v31, %v7102_v14  ;;  %v7105_v12 = vld [vmem:[#allocation97_spill] sm:$0xff]  ;;  %v2913_v28 = vld [vmem:[%s6330_s0 + $0x83] sm:$0x1]  ;;  %v7113_v0 = vmax.f32 %v2201_v22, %v2229_v36 }
  0x91   :  { %7089 = vst [vmem:[#allocation48_spill] sm:$0xff] %v2863_v11  ;;  %7093 = vst [vmem:[#allocation45_spill] sm:$0xff] %v2868_v61  ;;  %v7107_v38 = vmax.f32 %v7105_v12, %v7106_v19  ;;  %v2918_v17 = vld [vmem:[%s6330_s0 + $0x93] sm:$0x1]  ;;  %v2923_v18 = vld [vmem:[%s6330_s0 + $0xa3] sm:$0x1] }
  0x92   :  { %v2898_v37 = vmax.f32 %v7099_v45, %v285_v57  ;;  %v2903_v13 = vmax.f32 %v7103_v23, %v286_v33  ;;  %7109 = vst [vmem:[#allocation53_spill] sm:$0xff] %v2913_v28  ;;  %7110 = vst [vmem:[#allocation57_spill] sm:$0xff] %v2918_v17  ;;  %v2928_v47 = vld [vmem:[%s6330_s0 + $0xb3] sm:$0x1]  ;;  %v2933_v57 = vmax.f32 %v7113_v0, %v288_v8  ;;  %v7116_v45 = vld [vmem:[#allocation102_spill] sm:$0xff] }
  0x93   :  { %v2908_v55 = vmax.f32 %v7107_v38, %v287_v1  ;;  %7111 = vst [vmem:[#allocation54_spill] sm:$0xff] %v2923_v18  ;;  %7112 = vst [vmem:[#allocation58_spill] sm:$0xff] %v2928_v47  ;;  %v7114_v33 = vmax.f32 %v2206_v26, %v2234_v25  ;;  %v7115_v39 = vld [vmem:[#allocation100_spill] sm:$0xff]  ;;  %v7119_v23 = vld [vmem:[#allocation101_spill] sm:$0xff]  ;;  %v7127_v8 = vmax.f32 %v2249_v30, %v2277_v48 }
  0x94   :  { %7100 = vst [vmem:[#allocation51_spill] sm:$0xff] %v2898_v37  ;;  %7104 = vst [vmem:[#allocation52_spill] sm:$0xff] %v2903_v13  ;;  %v7117_v31 = vmax.f32 %v7115_v39, %v7116_v45  ;;  %v7120_v12 = vld [vmem:[#allocation103_spill] sm:$0xff]  ;;  %v2953_v22 = vld [vmem:[%s6330_s0 + $0xc3] sm:$0x1] }
  0x95   :  { %7108 = vst [vmem:[#allocation56_spill] sm:$0xff] %v2908_v55  ;;  %v2938_v1 = vmax.f32 %v7114_v33, %v289_v56  ;;  %v7121_v19 = vmax.f32 %v7119_v23, %v7120_v12  ;;  %7123 = vst [vmem:[#allocation60_spill] sm:$0xff] %v2953_v22  ;;  %v2958_v25 = vld [vmem:[%s6330_s0 + $0xd3] sm:$0x1]  ;;  %v2963_v26 = vld [vmem:[%s6330_s0 + $0xe3] sm:$0x1]  ;;  %v2973_v56 = vmax.f32 %v7127_v8, %v292_v41 }
  0x96   :  { %v2943_v14 = vmax.f32 %v7117_v31, %v290_v54  ;;  %7124 = vst [vmem:[#allocation64_spill] sm:$0xff] %v2958_v25  ;;  %7125 = vst [vmem:[#allocation61_spill] sm:$0xff] %v2963_v26  ;;  %v2968_v36 = vld [vmem:[%s6330_s0 + $0xf3] sm:$0x1]  ;;  %v7132_v39 = vld [vmem:[#allocation105_spill] sm:$0xff] }
  0x97   :  { %v2948_v38 = vmax.f32 %v7121_v19, %v291_v9  ;;  %7126 = vst [vmem:[#allocation65_spill] sm:$0xff] %v2968_v36  ;;  %v7128_v54 = vld [vmem:[#allocation104_spill] sm:$0xff]  ;;  %v7129_v9 = vld [vmem:[#allocation107_spill] sm:$0xff]  ;;  %v7136_v12 = vld [vmem:[#allocation106_spill] sm:$0xff] }
  0x98   :  { %7118 = vst [vmem:[#allocation55_spill] sm:$0xff] %v2943_v14  ;;  %v7130_v0 = vmax.f32 %v7128_v54, %v7129_v9  ;;  %v7133_v45 = vld [vmem:[#allocation108_spill] sm:$0xff]  ;;  %v7137_v19 = vld [vmem:[#allocation109_spill] sm:$0xff]  ;;  %v2993_v30 = vld [vmem:[%s6330_s0 + $0x103] sm:$0x1] }
  0x99   :  { %7122 = vst [vmem:[#allocation59_spill] sm:$0xff] %v2948_v38  ;;  %v7134_v31 = vmax.f32 %v7132_v39, %v7133_v45  ;;  %v7138_v38 = vmax.f32 %v7136_v12, %v7137_v19  ;;  %7140 = vst [vmem:[#allocation67_spill] sm:$0xff] %v2993_v30  ;;  %v2998_v48 = vld [vmem:[%s6330_s0 + $0x113] sm:$0x1]  ;;  %v3003_v41 = vld [vmem:[%s6330_s0 + $0x123] sm:$0x1] }
  0x9a   :  { %v2978_v33 = vmax.f32 %v7130_v0, %v293_v50  ;;  %7141 = vst [vmem:[#allocation68_spill] sm:$0xff] %v2998_v48  ;;  %7142 = vst [vmem:[#allocation72_spill] sm:$0xff] %v3003_v41  ;;  %v3008_v50 = vld [vmem:[%s6330_s0 + $0x133] sm:$0x1]  ;;  %v3021_v54 = vld [vmem:[%s6330_s0 + $0x143] sm:$0x1] }
  0x9b   :  { %v2983_v23 = vmax.f32 %v7134_v31, %v294_v52  ;;  %v2988_v14 = vmax.f32 %v7138_v38, %v295_v60  ;;  %7143 = vst [vmem:[#allocation69_spill] sm:$0xff] %v3008_v50  ;;  %7144 = vst [vmem:[#allocation73_spill] sm:$0xff] %v3021_v54  ;;  %v3026_v9 = vld [vmem:[%s6330_s0 + $0x153] sm:$0x1]  ;;  %v3031_v0 = vld [vmem:[%s6330_s0 + $0x163] sm:$0x1] }
  0x9c   :  { %7131 = vst [vmem:[#allocation62_spill] sm:$0xff] %v2978_v33  ;;  %7145 = vst [vmem:[#allocation70_spill] sm:$0xff] %v3026_v9  ;;  %v3036_v39 = vld [vmem:[%s6330_s0 + $0x173] sm:$0x1]  ;;  %v3049_v60 = vld [vmem:[%s6330_s0 + $0x183] sm:$0x1] }
  0x9d   :  { %7135 = vst [vmem:[#allocation66_spill] sm:$0xff] %v2983_v23  ;;  %7139 = vst [vmem:[#allocation63_spill] sm:$0xff] %v2988_v14  ;;  %v3054_v52 = vld [vmem:[%s6330_s0 + $0x193] sm:$0x1]  ;;  %v3059_v31 = vld [vmem:[%s6330_s0 + $0x1a3] sm:$0x1] }
  0x9e   :  { %7146 = vst [vmem:[#allocation74_spill] sm:$0xff] %v3031_v0  ;;  %7147 = vst [vmem:[#allocation71_spill] sm:$0xff] %v3036_v39  ;;  %v3064_v19 = vld [vmem:[%s6330_s0 + $0x1b3] sm:$0x1]  ;;  %v3077_v20 = vld [vmem:[%s6330_s0 + $0x1c3] sm:$0x1] }
  0x9f   :  { %7150 = vst [vmem:[#allocation75_spill] sm:$0xff] %v3049_v60  ;;  %7151 = vst [vmem:[#allocation76_spill] sm:$0xff] %v3054_v52  ;;  %v3087_v8 = vld [vmem:[%s6330_s0 + $0x1e3] sm:$0x1]  ;;  %v3092_v12 = vld [vmem:[%s6330_s0 + $0x1f3] sm:$0x1] }
  0xa0   :  { %7152 = vst [vmem:[#allocation80_spill] sm:$0xff] %v3059_v31  ;;  %7153 = vst [vmem:[#allocation77_spill] sm:$0xff] %v3064_v19  ;;  %v3105_v28 = vld [vmem:[%s6330_s0 + $0x203] sm:$0x1]  ;;  %v3110_v38 = vld [vmem:[%s6330_s0 + $0x213] sm:$0x1] }
  0xa1   :  { %7158 = vst [vmem:[#allocation81_spill] sm:$0xff] %v3077_v20  ;;  %7160 = vst [vmem:[#allocation82_spill] sm:$0xff] %v3087_v8  ;;  %v3115_v44 = vld [vmem:[%s6330_s0 + $0x223] sm:$0x1]  ;;  %v3120_v46 = vld [vmem:[%s6330_s0 + $0x233] sm:$0x1] }
  0xa2   :  { %7161 = vst [vmem:[#allocation79_spill] sm:$0xff] %v3092_v12  ;;  %7166 = vst [vmem:[#allocation83_spill] sm:$0xff] %v3105_v28  ;;  %v3133_v22 = vld [vmem:[%s6330_s0 + $0x243] sm:$0x1]  ;;  %v3148_v18 = vld [vmem:[%s6330_s0 + $0x273] sm:$0x1] }
  0xa3   :  { %7167 = vst [vmem:[#allocation84_spill] sm:$0xff] %v3110_v38  ;;  %7168 = vst [vmem:[#allocation86_spill] sm:$0xff] %v3115_v44  ;;  %v3143_v17 = vld [vmem:[%s6330_s0 + $0x263] sm:$0x1]  ;;  %v3166_v58 = vld [vmem:[%s6330_s0 + $0x293] sm:$0x1] }
  0xa4   :  { %7169 = vst [vmem:[#allocation85_spill] sm:$0xff] %v3120_v46  ;;  %7174 = vst [vmem:[#allocation87_spill] sm:$0xff] %v3133_v22  ;;  %v3161_v30 = vld [vmem:[%s6330_s0 + $0x283] sm:$0x1]  ;;  %v3176_v26 = vld [vmem:[%s6330_s0 + $0x2b3] sm:$0x1] }
  0xa5   :  { %7176 = vst [vmem:[#allocation90_spill] sm:$0xff] %v3143_v17  ;;  %7177 = vst [vmem:[#allocation89_spill] sm:$0xff] %v3148_v18  ;;  %v3171_v25 = vld [vmem:[%s6330_s0 + $0x2a3] sm:$0x1]  ;;  %v3194_v47 = vld [vmem:[%s6330_s0 + $0x2d3] sm:$0x1] }
  0xa6   :  { %7182 = vst [vmem:[#allocation91_spill] sm:$0xff] %v3171_v25  ;;  %7183 = vst [vmem:[#allocation92_spill] sm:$0xff] %v3176_v26  ;;  %v3189_v54 = vld [vmem:[%s6330_s0 + $0x2c3] sm:$0x1]  ;;  %v3204_v41 = vld [vmem:[%s6330_s0 + $0x2f3] sm:$0x1] }
  0xa7   :  { %v3199_v48 = vld [vmem:[%s6330_s0 + $0x2e3] sm:$0x1]  ;;  %7189 = vst [vmem:[#allocation93_spill] sm:$0xff] %v3204_v41  ;;  %v3222_v36 = vld [vmem:[%s6330_s0 + $0x313] sm:$0x1]  ;;  %7206 = vst [vmem:[#allocation99_spill] sm:$0xff] %v3283_v5 }
  0xa8   :  { %7188 = vst [vmem:[#allocation94_spill] sm:$0xff] %v3199_v48  ;;  %v3217_v60 = vld [vmem:[%s6330_s0 + $0x303] sm:$0x1]  ;;  %v3232_v0 = vld [vmem:[%s6330_s0 + $0x333] sm:$0x1]  ;;  %v7208_v12 = vld [vmem:[#allocation35_spill] sm:$0xff] }
  0xa9   :  { %v3227_v9 = vld [vmem:[%s6330_s0 + $0x323] sm:$0x1]  ;;  %7195 = vst [vmem:[#allocation96_spill] sm:$0xff] %v3232_v0  ;;  %v3250_v50 = vld [vmem:[%s6330_s0 + $0x353] sm:$0x1]  ;;  %7217 = vst [vmem:[#allocation105_spill] sm:$0xff] %v3362_v40  ;;  %v7228_v40 = vmax.f32 %v2412_v34, %v2848_v62 }
  0xaa   :  { %7194 = vst [vmem:[#allocation95_spill] sm:$0xff] %v3227_v9  ;;  %v3245_v20 = vld [vmem:[%s6330_s0 + $0x343] sm:$0x1]  ;;  %v3260_v31 = vld [vmem:[%s6330_s0 + $0x373] sm:$0x1]  ;;  %v7231_v34 = vld [vmem:[#allocation49_spill] sm:$0xff] }
  0xab   :  { %v3255_v52 = vld [vmem:[%s6330_s0 + $0x363] sm:$0x1]  ;;  %7201 = vst [vmem:[#allocation97_spill] sm:$0xff] %v3260_v31  ;;  %v3278_v39 = vld [vmem:[%s6330_s0 + $0x393] sm:$0x1] }
  0xac   :  { %7200 = vst [vmem:[#allocation98_spill] sm:$0xff] %v3255_v52  ;;  %v3273_v28 = vld [vmem:[%s6330_s0 + $0x383] sm:$0x1]  ;;  %v3288_v8 = vld [vmem:[%s6330_s0 + $0x3b3] sm:$0x1] }
  0xad   :  { %7207 = vst [vmem:[#allocation100_spill] sm:$0xff] %v3288_v8  ;;  %v7209_v18 = vld [vmem:[#allocation36_spill] sm:$0xff]  ;;  %v3301_v22 = vld [vmem:[%s6330_s0 + $0x3c3] sm:$0x1]  ;;  %v512_v9 = vld [vmem:[%s6330_s0 + $0x4] sm:$0x1] }
  0xae   :  { %v3306_v19 = vld [vmem:[%s6330_s0 + $0x3d3] sm:$0x1]  ;;  %v3311_v38 = vld [vmem:[%s6330_s0 + $0x3e3] sm:$0x1]  ;;  %v513_v24 = vld [vmem:[%s6330_s0 + $0x14] sm:$0x1] }
  0xaf   :  { %7212 = vst [vmem:[#allocation102_spill] sm:$0xff] %v3306_v19  ;;  %7213 = vst [vmem:[#allocation101_spill] sm:$0xff] %v3311_v38  ;;  %v3316_v44 = vld [vmem:[%s6330_s0 + $0x3f3] sm:$0x1]  ;;  %v3329_v25 = vld [vmem:[%s6330_s0 + $0x403] sm:$0x1] }
  0xb0   :  { %7214 = vst [vmem:[#allocation103_spill] sm:$0xff] %v3316_v44  ;;  %v3334_v17 = vld [vmem:[%s6330_s0 + $0x413] sm:$0x1]  ;;  %v3339_v45 = vld [vmem:[%s6330_s0 + $0x423] sm:$0x1] }
  0xb1   :  { %7215 = vst [vmem:[#allocation104_spill] sm:$0xff] %v3339_v45  ;;  %v3344_v26 = vld [vmem:[%s6330_s0 + $0x433] sm:$0x1]  ;;  %v3357_v48 = vld [vmem:[%s6330_s0 + $0x443] sm:$0x1] }
  0xb2   :  { %7216 = vst [vmem:[#allocation107_spill] sm:$0xff] %v3344_v26  ;;  %v3367_v46 = vld [vmem:[%s6330_s0 + $0x463] sm:$0x1]  ;;  %v3372_v41 = vld [vmem:[%s6330_s0 + $0x473] sm:$0x1]  ;;  %v7222_v26 = vmax.f32 %v2397_v35, %v2833_v15  ;;  %v7234_v15 = vld [vmem:[#allocation111_spill] sm:$0xff] }
  0xb3   :  { %7218 = vst [vmem:[#allocation108_spill] sm:$0xff] %v3367_v46  ;;  %7219 = vst [vmem:[#allocation106_spill] sm:$0xff] %v3372_v41  ;;  %v514_v2 = vld [vmem:[%s6330_s0 + $0x24] sm:$0x1]  ;;  %v515_v7 = vld [vmem:[%s6330_s0 + $0x34] sm:$0x1]  ;;  %v7224_v41 = vmax.f32 %v2402_v43, %v2838_v53  ;;  %v7226_v46 = vmax.f32 %v2407_v49, %v2843_v59 }
  0xb4   :  { %v516_v52 = vld [vmem:[%s6330_s0 + $0x44] sm:$0x1]  ;;  %v517_v4 = vld [vmem:[%s6330_s0 + $0x54] sm:$0x1]  ;;  %v3477_v38 = vmax.f32 %v7222_v26, %v512_v9  ;;  %v3492_v33 = vmax.f32 %v7228_v40, %v515_v7 }
  0xb5   :  { %v518_v0 = vld [vmem:[%s6330_s0 + $0x64] sm:$0x1]  ;;  %v519_v32 = vld [vmem:[%s6330_s0 + $0x74] sm:$0x1]  ;;  %v3482_v14 = vmax.f32 %v7224_v41, %v513_v24  ;;  %v3487_v23 = vmax.f32 %v7226_v46, %v514_v2 }
  0xb6   :  { %v520_v5 = vld [vmem:[%s6330_s0 + $0x84] sm:$0x1]  ;;  %v521_v11 = vld [vmem:[%s6330_s0 + $0x94] sm:$0x1]  ;;  %7223 = vst [vmem:[#allocation109_spill] sm:$0xff] %v3477_v38  ;;  %7229 = vst [vmem:[#allocation113_spill] sm:$0xff] %v3492_v33 }
  0xb7   :  { %v522_v31 = vld [vmem:[%s6330_s0 + $0xa4] sm:$0x1]  ;;  %v523_v6 = vld [vmem:[%s6330_s0 + $0xb4] sm:$0x1]  ;;  %7225 = vst [vmem:[#allocation35_spill] sm:$0xff] %v3482_v14  ;;  %7227 = vst [vmem:[#allocation36_spill] sm:$0xff] %v3487_v23 }
  0xb8   :  { %v524_v19 = vld [vmem:[%s6330_s0 + $0xc4] sm:$0x1]  ;;  %v525_v37 = vld [vmem:[%s6330_s0 + $0xd4] sm:$0x1]  ;;  %v7243_v23 = vld [vmem:[#allocation47_spill] sm:$0xff] }
  0xb9   :  { %v526_v8 = vld [vmem:[%s6330_s0 + $0xe4] sm:$0x1]  ;;  %v527_v61 = vld [vmem:[%s6330_s0 + $0xf4] sm:$0x1] }
  0xba   :  { %v528_v45 = vld [vmem:[%s6330_s0 + $0x104] sm:$0x1]  ;;  %v529_v44 = vld [vmem:[%s6330_s0 + $0x114] sm:$0x1] }
  0xbb   :  { %v530_v55 = vld [vmem:[%s6330_s0 + $0x124] sm:$0x1]  ;;  %v531_v13 = vld [vmem:[%s6330_s0 + $0x134] sm:$0x1] }
  0xbc   :  { %v532_v35 = vld [vmem:[%s6330_s0 + $0x144] sm:$0x1]  ;;  %v533_v43 = vld [vmem:[%s6330_s0 + $0x154] sm:$0x1] }
  0xbd   :  { %v534_v24 = vld [vmem:[%s6330_s0 + $0x164] sm:$0x1]  ;;  %v535_v49 = vld [vmem:[%s6330_s0 + $0x174] sm:$0x1] }
  0xbe   :  { %v7230_v2 = vld [vmem:[#allocation110_spill] sm:$0xff]  ;;  %v7238_v46 = vld [vmem:[#allocation112_spill] sm:$0xff] }
  0xbf   :  { %v7232_v7 = vmax.f32 %v7230_v2, %v7231_v34  ;;  %v7235_v53 = vld [vmem:[#allocation46_spill] sm:$0xff]  ;;  %v537_v2 = vld [vmem:[%s6330_s0 + $0x194] sm:$0x1]  ;;  %v7246_v34 = vld [vmem:[#allocation3_spill] sm:$0xff] }
  0xc0   :  { %v7236_v59 = vmax.f32 %v7234_v15, %v7235_v53  ;;  %v7239_v26 = vld [vmem:[#allocation50_spill] sm:$0xff] }
  0xc1   :  { %v3509_v40 = vmax.f32 %v7232_v7, %v516_v52  ;;  %v7240_v41 = vmax.f32 %v7238_v46, %v7239_v26  ;;  %v7242_v33 = vld [vmem:[#allocation2_spill] sm:$0xff]  ;;  %v7251_v7 = vld [vmem:[#allocation57_spill] sm:$0xff] }
  0xc2   :  { %v3514_v62 = vmax.f32 %v7236_v59, %v517_v4  ;;  %v7244_v14 = vmax.f32 %v7242_v33, %v7243_v23  ;;  %v536_v52 = vld [vmem:[%s6330_s0 + $0x184] sm:$0x1]  ;;  %v7247_v33 = vld [vmem:[#allocation53_spill] sm:$0xff]  ;;  %v7250_v23 = vld [vmem:[#allocation4_spill] sm:$0xff] }
  0xc3   :  { %7233 = vst [vmem:[#allocation110_spill] sm:$0xff] %v3509_v40  ;;  %v3519_v9 = vmax.f32 %v7240_v41, %v518_v0  ;;  %v538_v4 = vld [vmem:[%s6330_s0 + $0x1a4] sm:$0x1]  ;;  %v539_v0 = vld [vmem:[%s6330_s0 + $0x1b4] sm:$0x1]  ;;  %v7252_v15 = vmax.f32 %v7250_v23, %v7251_v7 }
  0xc4   :  { %7237 = vst [vmem:[#allocation49_spill] sm:$0xff] %v3514_v62  ;;  %v3524_v38 = vmax.f32 %v7244_v14, %v519_v32  ;;  %v7248_v32 = vmax.f32 %v7246_v34, %v7247_v33  ;;  %v7254_v59 = vld [vmem:[#allocation8_spill] sm:$0xff]  ;;  %v7255_v46 = vld [vmem:[#allocation54_spill] sm:$0xff]  ;;  %v7262_v33 = vld [vmem:[#allocation9_spill] sm:$0xff] }
  0xc5   :  { %7241 = vst [vmem:[#allocation111_spill] sm:$0xff] %v3519_v9  ;;  %v3546_v53 = vmax.f32 %v7252_v15, %v521_v11  ;;  %v7256_v26 = vmax.f32 %v7254_v59, %v7255_v46  ;;  %v7259_v9 = vld [vmem:[#allocation58_spill] sm:$0xff]  ;;  %v541_v34 = vld [vmem:[%s6330_s0 + $0x1d4] sm:$0x1]  ;;  %v7271_v59 = vld [vmem:[#allocation61_spill] sm:$0xff] }
  0xc6   :  { %7245 = vst [vmem:[#allocation46_spill] sm:$0xff] %v3524_v38  ;;  %v3541_v14 = vmax.f32 %v7248_v32, %v520_v5  ;;  %v7258_v38 = vld [vmem:[#allocation5_spill] sm:$0xff]  ;;  %v540_v5 = vld [vmem:[%s6330_s0 + $0x1c4] sm:$0x1]  ;;  %v7267_v32 = vld [vmem:[#allocation64_spill] sm:$0xff] }
  0xc7   :  { %7253 = vst [vmem:[#allocation50_spill] sm:$0xff] %v3546_v53  ;;  %v3551_v41 = vmax.f32 %v7256_v26, %v522_v31  ;;  %v7260_v62 = vmax.f32 %v7258_v38, %v7259_v9  ;;  %v542_v11 = vld [vmem:[%s6330_s0 + $0x1e4] sm:$0x1]  ;;  %v543_v31 = vld [vmem:[%s6330_s0 + $0x1f4] sm:$0x1] }
  0xc8   :  { %7249 = vst [vmem:[#allocation112_spill] sm:$0xff] %v3541_v14  ;;  %v7263_v38 = vld [vmem:[#allocation60_spill] sm:$0xff]  ;;  %v7266_v9 = vld [vmem:[#allocation6_spill] sm:$0xff] }
  0xc9   :  { %7257 = vst [vmem:[#allocation2_spill] sm:$0xff] %v3551_v41  ;;  %v3556_v40 = vmax.f32 %v7260_v62, %v523_v6  ;;  %v7264_v6 = vmax.f32 %v7262_v33, %v7263_v38  ;;  %v7268_v23 = vmax.f32 %v7266_v9, %v7267_v32  ;;  %v7270_v15 = vld [vmem:[#allocation10_spill] sm:$0xff]  ;;  %v7275_v41 = vld [vmem:[#allocation65_spill] sm:$0xff]  ;;  %v545_v33 = vld [vmem:[%s6330_s0 + $0x214] sm:$0x1] }
  0xca   :  { %v7272_v46 = vmax.f32 %v7270_v15, %v7271_v59  ;;  %v7278_v38 = vld [vmem:[#allocation11_spill] sm:$0xff]  ;;  %v7287_v15 = vld [vmem:[#allocation72_spill] sm:$0xff] }
  0xcb   :  { %7261 = vst [vmem:[#allocation47_spill] sm:$0xff] %v3556_v40  ;;  %v3573_v62 = vmax.f32 %v7264_v6, %v524_v19  ;;  %v3578_v7 = vmax.f32 %v7268_v23, %v525_v37  ;;  %v7274_v40 = vld [vmem:[#allocation7_spill] sm:$0xff]  ;;  %v544_v19 = vld [vmem:[%s6330_s0 + $0x204] sm:$0x1]  ;;  %v7283_v6 = vld [vmem:[#allocation68_spill] sm:$0xff] }
  0xcc   :  { %v3583_v26 = vmax.f32 %v7272_v46, %v526_v8  ;;  %v7276_v53 = vmax.f32 %v7274_v40, %v7275_v41  ;;  %v546_v37 = vld [vmem:[%s6330_s0 + $0x224] sm:$0x1]  ;;  %v547_v8 = vld [vmem:[%s6330_s0 + $0x234] sm:$0x1]  ;;  %v7279_v40 = vld [vmem:[#allocation67_spill] sm:$0xff] }
  0xcd   :  { %7265 = vst [vmem:[#allocation3_spill] sm:$0xff] %v3573_v62  ;;  %7269 = vst [vmem:[#allocation53_spill] sm:$0xff] %v3578_v7  ;;  %v7282_v41 = vld [vmem:[#allocation12_spill] sm:$0xff] }
  0xce   :  { %7273 = vst [vmem:[#allocation4_spill] sm:$0xff] %v3583_v26  ;;  %v3588_v14 = vmax.f32 %v7276_v53, %v527_v61  ;;  %v7280_v61 = vmax.f32 %v7278_v38, %v7279_v40  ;;  %v7284_v9 = vmax.f32 %v7282_v41, %v7283_v6  ;;  %v7286_v23 = vld [vmem:[#allocation16_spill] sm:$0xff]  ;;  %v7291_v26 = vld [vmem:[#allocation69_spill] sm:$0xff] }
  0xcf   :  { %v7288_v59 = vmax.f32 %v7286_v23, %v7287_v15  ;;  %v549_v38 = vld [vmem:[%s6330_s0 + $0x254] sm:$0x1]  ;;  %v7294_v40 = vld [vmem:[#allocation17_spill] sm:$0xff]  ;;  %v7303_v23 = vld [vmem:[#allocation74_spill] sm:$0xff] }
  0xd0   :  { %7277 = vst [vmem:[#allocation57_spill] sm:$0xff] %v3588_v14  ;;  %v3605_v53 = vmax.f32 %v7280_v61, %v528_v45  ;;  %v3610_v32 = vmax.f32 %v7284_v9, %v529_v44  ;;  %v7290_v14 = vld [vmem:[#allocation13_spill] sm:$0xff]  ;;  %v548_v45 = vld [vmem:[%s6330_s0 + $0x244] sm:$0x1] }
  0xd1   :  { %v3615_v46 = vmax.f32 %v7288_v59, %v530_v55  ;;  %v7292_v7 = vmax.f32 %v7290_v14, %v7291_v26  ;;  %v550_v44 = vld [vmem:[%s6330_s0 + $0x264] sm:$0x1]  ;;  %v551_v55 = vld [vmem:[%s6330_s0 + $0x274] sm:$0x1]  ;;  %v7295_v14 = vld [vmem:[#allocation73_spill] sm:$0xff] }
  0xd2   :  { %7281 = vst [vmem:[#allocation8_spill] sm:$0xff] %v3605_v53  ;;  %7285 = vst [vmem:[#allocation54_spill] sm:$0xff] %v3610_v32  ;;  %v7298_v26 = vld [vmem:[#allocation14_spill] sm:$0xff] }
  0xd3   :  { %7289 = vst [vmem:[#allocation5_spill] sm:$0xff] %v3615_v46  ;;  %v3620_v62 = vmax.f32 %v7292_v7, %v531_v13  ;;  %v7296_v13 = vmax.f32 %v7294_v40, %v7295_v14  ;;  %v7299_v61 = vld [vmem:[#allocation70_spill] sm:$0xff]  ;;  %v7307_v46 = vld [vmem:[#allocation71_spill] sm:$0xff]  ;;  %v553_v40 = vld [vmem:[%s6330_s0 + $0x294] sm:$0x1] }
  0xd4   :  { %v7300_v41 = vmax.f32 %v7298_v26, %v7299_v61  ;;  %v7302_v9 = vld [vmem:[#allocation18_spill] sm:$0xff]  ;;  %v7310_v14 = vld [vmem:[#allocation19_spill] sm:$0xff] }
  0xd5   :  { %7293 = vst [vmem:[#allocation58_spill] sm:$0xff] %v3620_v62  ;;  %v3637_v7 = vmax.f32 %v7296_v13, %v532_v35  ;;  %v7304_v15 = vmax.f32 %v7302_v9, %v7303_v23  ;;  %v7306_v62 = vld [vmem:[#allocation15_spill] sm:$0xff]  ;;  %v552_v35 = vld [vmem:[%s6330_s0 + $0x284] sm:$0x1]  ;;  %v7315_v13 = vld [vmem:[#allocation76_spill] sm:$0xff] }
  0xd6   :  { %v3642_v6 = vmax.f32 %v7300_v41, %v533_v43  ;;  %v7308_v32 = vmax.f32 %v7306_v62, %v7307_v46  ;;  %v554_v43 = vld [vmem:[%s6330_s0 + $0x2a4] sm:$0x1]  ;;  %v7311_v62 = vld [vmem:[#allocation75_spill] sm:$0xff]  ;;  %v7314_v46 = vld [vmem:[#allocation20_spill] sm:$0xff] }
  0xd7   :  { %7297 = vst [vmem:[#allocation9_spill] sm:$0xff] %v3637_v7  ;;  %v3647_v59 = vmax.f32 %v7304_v15, %v534_v24  ;;  %v555_v24 = vld [vmem:[%s6330_s0 + $0x2b4] sm:$0x1]  ;;  %v7316_v26 = vmax.f32 %v7314_v46, %v7315_v13 }
  0xd8   :  { %7301 = vst [vmem:[#allocation60_spill] sm:$0xff] %v3642_v6  ;;  %v3652_v53 = vmax.f32 %v7308_v32, %v535_v49  ;;  %v7312_v49 = vmax.f32 %v7310_v14, %v7311_v62  ;;  %v7318_v41 = vld [vmem:[#allocation24_spill] sm:$0xff]  ;;  %v7326_v62 = vld [vmem:[#allocation25_spill] sm:$0xff] }
  0xd9   :  { %7305 = vst [vmem:[#allocation6_spill] sm:$0xff] %v3647_v59  ;;  %v3674_v61 = vmax.f32 %v7316_v26, %v537_v2  ;;  %v7319_v9 = vld [vmem:[#allocation80_spill] sm:$0xff]  ;;  %v7323_v59 = vld [vmem:[#allocation77_spill] sm:$0xff]  ;;  %v558_v2 = vld [vmem:[%s6330_s0 + $0x2e4] sm:$0x1] }
  0xda   :  { %7309 = vst [vmem:[#allocation64_spill] sm:$0xff] %v3652_v53  ;;  %v3669_v32 = vmax.f32 %v7312_v49, %v536_v52  ;;  %v7320_v23 = vmax.f32 %v7318_v41, %v7319_v9  ;;  %v7322_v53 = vld [vmem:[#allocation21_spill] sm:$0xff]  ;;  %v556_v52 = vld [vmem:[%s6330_s0 + $0x2c4] sm:$0x1]  ;;  %v557_v14 = vld [vmem:[%s6330_s0 + $0x2d4] sm:$0x1] }
  0xdb   :  { %7317 = vst [vmem:[#allocation61_spill] sm:$0xff] %v3674_v61  ;;  %v7324_v6 = vmax.f32 %v7322_v53, %v7323_v59  ;;  %v7327_v53 = vld [vmem:[#allocation81_spill] sm:$0xff]  ;;  %v7330_v59 = vld [vmem:[#allocation22_spill] sm:$0xff] }
  0xdc   :  { %7313 = vst [vmem:[#allocation10_spill] sm:$0xff] %v3669_v32  ;;  %v3679_v15 = vmax.f32 %v7320_v23, %v538_v4  ;;  %v559_v4 = vld [vmem:[%s6330_s0 + $0x2f4] sm:$0x1]  ;;  %v7331_v49 = vld [vmem:[#allocation78_spill] sm:$0xff] }
  0xdd   :  { %v3684_v7 = vmax.f32 %v7324_v6, %v539_v0  ;;  %v7328_v0 = vmax.f32 %v7326_v62, %v7327_v53  ;;  %v7332_v46 = vmax.f32 %v7330_v59, %v7331_v49  ;;  %v7334_v26 = vld [vmem:[#allocation26_spill] sm:$0xff]  ;;  %v561_v62 = vld [vmem:[%s6330_s0 + $0x314] sm:$0x1]  ;;  %v7342_v53 = vld [vmem:[#allocation27_spill] sm:$0xff] }
  0xde   :  { %7321 = vst [vmem:[#allocation7_spill] sm:$0xff] %v3679_v15  ;;  %v7335_v41 = vld [vmem:[#allocation82_spill] sm:$0xff]  ;;  %v7339_v15 = vld [vmem:[#allocation79_spill] sm:$0xff] }
  0xdf   :  { %7325 = vst [vmem:[#allocation65_spill] sm:$0xff] %v3684_v7  ;;  %v3701_v6 = vmax.f32 %v7328_v0, %v540_v5  ;;  %v3706_v13 = vmax.f32 %v7332_v46, %v541_v34  ;;  %v7336_v9 = vmax.f32 %v7334_v26, %v7335_v41  ;;  %v7338_v7 = vld [vmem:[#allocation23_spill] sm:$0xff]  ;;  %v560_v5 = vld [vmem:[%s6330_s0 + $0x304] sm:$0x1]  ;;  %v7347_v0 = vld [vmem:[#allocation84_spill] sm:$0xff] }
  0xe0   :  { %v7340_v61 = vmax.f32 %v7338_v7, %v7339_v15  ;;  %v562_v34 = vld [vmem:[%s6330_s0 + $0x324] sm:$0x1]  ;;  %v7343_v7 = vld [vmem:[#allocation83_spill] sm:$0xff]  ;;  %v7346_v15 = vld [vmem:[#allocation28_spill] sm:$0xff] }
  0xe1   :  { %7329 = vst [vmem:[#allocation11_spill] sm:$0xff] %v3701_v6  ;;  %7333 = vst [vmem:[#allocation67_spill] sm:$0xff] %v3706_v13  ;;  %v3711_v23 = vmax.f32 %v7336_v9, %v542_v11  ;;  %v563_v11 = vld [vmem:[%s6330_s0 + $0x334] sm:$0x1]  ;;  %v7348_v59 = vmax.f32 %v7346_v15, %v7347_v0  ;;  %v7351_v26 = vld [vmem:[#allocation86_spill] sm:$0xff] }
  0xe2   :  { %v3716_v32 = vmax.f32 %v7340_v61, %v543_v31  ;;  %v7344_v31 = vmax.f32 %v7342_v53, %v7343_v7  ;;  %v7350_v46 = vld [vmem:[#allocation32_spill] sm:$0xff]  ;;  %v7358_v7 = vld [vmem:[#allocation33_spill] sm:$0xff] }
  0xe3   :  { %7337 = vst [vmem:[#allocation12_spill] sm:$0xff] %v3711_v23  ;;  %v3738_v49 = vmax.f32 %v7348_v59, %v545_v33  ;;  %v7352_v41 = vmax.f32 %v7350_v46, %v7351_v26  ;;  %v7355_v23 = vld [vmem:[#allocation85_spill] sm:$0xff]  ;;  %v565_v53 = vld [vmem:[%s6330_s0 + $0x354] sm:$0x1]  ;;  %v566_v33 = vld [vmem:[%s6330_s0 + $0x364] sm:$0x1] }
  0xe4   :  { %7341 = vst [vmem:[#allocation68_spill] sm:$0xff] %v3716_v32  ;;  %v3733_v61 = vmax.f32 %v7344_v31, %v544_v19  ;;  %v7354_v32 = vld [vmem:[#allocation29_spill] sm:$0xff]  ;;  %v564_v19 = vld [vmem:[%s6330_s0 + $0x344] sm:$0x1]  ;;  %v7362_v31 = vld [vmem:[#allocation88_spill] sm:$0xff] }
  0xe5   :  { %7349 = vst [vmem:[#allocation72_spill] sm:$0xff] %v3738_v49  ;;  %v3743_v9 = vmax.f32 %v7352_v41, %v546_v37  ;;  %v7356_v13 = vmax.f32 %v7354_v32, %v7355_v23  ;;  %v567_v37 = vld [vmem:[%s6330_s0 + $0x374] sm:$0x1]  ;;  %v7359_v32 = vld [vmem:[#allocation87_spill] sm:$0xff]  ;;  %v7361_v23 = vld [vmem:[#allocation30_spill] sm:$0xff] }
  0xe6   :  { %7345 = vst [vmem:[#allocation16_spill] sm:$0xff] %v3733_v61  ;;  %v7363_v15 = vmax.f32 %v7361_v23, %v7362_v31  ;;  %v7364_v59 = vld [vmem:[#allocation34_spill] sm:$0xff] }
  0xe7   :  { %7353 = vst [vmem:[#allocation13_spill] sm:$0xff] %v3743_v9  ;;  %v3748_v6 = vmax.f32 %v7356_v13, %v547_v8  ;;  %v7360_v8 = vmax.f32 %v7358_v7, %v7359_v32  ;;  %v7365_v46 = vld [vmem:[#allocation90_spill] sm:$0xff]  ;;  %v7369_v9 = vld [vmem:[#allocation89_spill] sm:$0xff]  ;;  %v569_v7 = vld [vmem:[%s6330_s0 + $0x394] sm:$0x1] }
  0xe8   :  { %v3770_v0 = vmax.f32 %v7363_v15, %v549_v38  ;;  %v7366_v26 = vmax.f32 %v7364_v59, %v7365_v46  ;;  %v570_v38 = vld [vmem:[%s6330_s0 + $0x3a4] sm:$0x1]  ;;  %v7374_v32 = vld [vmem:[#allocation40_spill] sm:$0xff]  ;;  %v7378_v15 = vld [vmem:[#allocation37_spill] sm:$0xff] }
  0xe9   :  { %7357 = vst [vmem:[#allocation69_spill] sm:$0xff] %v3748_v6  ;;  %v3765_v13 = vmax.f32 %v7360_v8, %v548_v45  ;;  %v7368_v6 = vld [vmem:[#allocation31_spill] sm:$0xff]  ;;  %v568_v45 = vld [vmem:[%s6330_s0 + $0x384] sm:$0x1]  ;;  %v7379_v59 = vld [vmem:[#allocation92_spill] sm:$0xff] }
  0xea   :  { %v3775_v41 = vmax.f32 %v7366_v26, %v550_v44  ;;  %v7370_v49 = vmax.f32 %v7368_v6, %v7369_v9  ;;  %v571_v44 = vld [vmem:[%s6330_s0 + $0x3b4] sm:$0x1]  ;;  %v7375_v8 = vld [vmem:[#allocation91_spill] sm:$0xff]  ;;  %v7380_v46 = vmax.f32 %v7378_v15, %v7379_v59  ;;  %v7389_v15 = vld [vmem:[#allocation93_spill] sm:$0xff] }
  0xeb   :  { %v7376_v23 = vmax.f32 %v7374_v32, %v7375_v8 }
  0xec   :  { %7367 = vst [vmem:[#allocation17_spill] sm:$0xff] %v3775_v41  ;;  %v3780_v61 = vmax.f32 %v7370_v49, %v551_v55  ;;  %v7372_v55 = vmax.f32 %v7208_v12, %v3161_v30  ;;  %v7373_v49 = vmax.f32 %v7209_v18, %v3166_v58  ;;  %v3812_v26 = vmax.f32 %v7380_v46, %v555_v24  ;;  %v572_v30 = vld [vmem:[%s6330_s0 + $0x3c4] sm:$0x1]  ;;  %v573_v58 = vld [vmem:[%s6330_s0 + $0x3d4] sm:$0x1] }
  0xed   :  { %v3807_v31 = vmax.f32 %v7376_v23, %v554_v43  ;;  %v574_v18 = vld [vmem:[%s6330_s0 + $0x3e4] sm:$0x1]  ;;  %v575_v12 = vld [vmem:[%s6330_s0 + $0x3f4] sm:$0x1]  ;;  %v7383_v43 = vmax.f32 %v2754_v16, %v3194_v47  ;;  %v4386_v41 = vld [vmem:[%s6330_s0 + $0x3d5] sm:$0x1] }
  0xee   :  { %7371 = vst [vmem:[#allocation73_spill] sm:$0xff] %v3780_v61  ;;  %v3797_v6 = vmax.f32 %v7372_v55, %v552_v35  ;;  %v3802_v9 = vmax.f32 %v7373_v49, %v553_v40  ;;  %7381 = vst [vmem:[#allocation70_spill] sm:$0xff] %v3812_v26  ;;  %v7382_v35 = vmax.f32 %v2749_v10, %v3189_v54  ;;  %v7384_v55 = vld [vmem:[#allocation41_spill] sm:$0xff]  ;;  %v7385_v49 = vld [vmem:[#allocation94_spill] sm:$0xff] }
  0xef   :  { %7377 = vst [vmem:[#allocation14_spill] sm:$0xff] %v3807_v31  ;;  %v3834_v24 = vmax.f32 %v7383_v43, %v557_v14  ;;  %v7386_v32 = vmax.f32 %v7384_v55, %v7385_v49  ;;  %v7388_v23 = vld [vmem:[#allocation38_spill] sm:$0xff]  ;;  %v577_v16 = vld [vmem:[%s6330_s0 + $0x414] sm:$0x1]  ;;  %v7395_v43 = vld [vmem:[#allocation95_spill] sm:$0xff] }
  0xf0   :  { %v3829_v40 = vmax.f32 %v7382_v35, %v556_v52  ;;  %v7390_v59 = vmax.f32 %v7388_v23, %v7389_v15  ;;  %v576_v10 = vld [vmem:[%s6330_s0 + $0x404] sm:$0x1]  ;;  %v579_v54 = vld [vmem:[%s6330_s0 + $0x434] sm:$0x1]  ;;  %v7392_v52 = vmax.f32 %v2781_v27, %v3217_v60  ;;  %v4414_v31 = vld [vmem:[%s6330_s0 + $0x415] sm:$0x1] }
  0xf1   :  { %v3839_v8 = vmax.f32 %v7386_v32, %v558_v2  ;;  %v578_v47 = vld [vmem:[%s6330_s0 + $0x424] sm:$0x1]  ;;  %v7393_v2 = vmax.f32 %v2786_v42, %v3222_v36  ;;  %v7398_v32 = vld [vmem:[#allocation39_spill] sm:$0xff]  ;;  %v7399_v23 = vld [vmem:[#allocation96_spill] sm:$0xff] }
  0xf2   :  { %v3844_v46 = vmax.f32 %v7390_v59, %v559_v4  ;;  %v3861_v14 = vmax.f32 %v7392_v52, %v560_v5  ;;  %v7394_v35 = vld [vmem:[#allocation42_spill] sm:$0xff]  ;;  %v7400_v15 = vmax.f32 %v7398_v32, %v7399_v23  ;;  %v581_v42 = vld [vmem:[%s6330_s0 + $0x454] sm:$0x1]  ;;  %v7402_v5 = vmax.f32 %v2813_v51, %v3245_v20  ;;  %v7405_v52 = vld [vmem:[#allocation43_spill] sm:$0xff] }
  0xf3   :  { %7387 = vst [vmem:[#allocation18_spill] sm:$0xff] %v3839_v8  ;;  %v3866_v4 = vmax.f32 %v7393_v2, %v561_v62  ;;  %v7396_v55 = vmax.f32 %v7394_v35, %v7395_v43  ;;  %v580_v27 = vld [vmem:[%s6330_s0 + $0x444] sm:$0x1]  ;;  %v583_v60 = vld [vmem:[%s6330_s0 + $0x474] sm:$0x1]  ;;  %v7410_v32 = vld [vmem:[#allocation97_spill] sm:$0xff] }
  0xf4   :  { %7391 = vst [vmem:[#allocation74_spill] sm:$0xff] %v3844_v46  ;;  %v3876_v59 = vmax.f32 %v7400_v15, %v563_v11  ;;  %v582_v36 = vld [vmem:[%s6330_s0 + $0x464] sm:$0x1]  ;;  %v3893_v62 = vmax.f32 %v7402_v5, %v564_v19  ;;  %v3913_v51 = vld [vmem:[%s6330_s0 + $0x5] sm:$0x1]  ;;  %v7416_v19 = vmax.f32 %v2853_v63, %v3273_v28  ;;  %v7418_v5 = vld [vmem:[#allocation48_spill] sm:$0xff] }
  0xf5   :  { %v3871_v49 = vmax.f32 %v7396_v55, %v562_v34  ;;  %v7403_v34 = vmax.f32 %v2818_v21, %v3250_v50  ;;  %v7406_v2 = vld [vmem:[#allocation98_spill] sm:$0xff]  ;;  %v7409_v55 = vld [vmem:[#allocation44_spill] sm:$0xff] }
  0xf6   :  { %7401 = vst [vmem:[#allocation71_spill] sm:$0xff] %v3876_v59  ;;  %v7407_v35 = vmax.f32 %v7405_v52, %v7406_v2  ;;  %v7411_v23 = vmax.f32 %v7409_v55, %v7410_v32  ;;  %v3918_v21 = vld [vmem:[%s6330_s0 + $0x15] sm:$0x1]  ;;  %v3923_v20 = vld [vmem:[%s6330_s0 + $0x25] sm:$0x1] }
  0xf7   :  { %7397 = vst [vmem:[#allocation15_spill] sm:$0xff] %v3871_v49  ;;  %v3898_v11 = vmax.f32 %v7403_v34, %v565_v53  ;;  %7413 = vst [vmem:[#allocation76_spill] sm:$0xff] %v3918_v21  ;;  %v3928_v50 = vld [vmem:[%s6330_s0 + $0x35] sm:$0x1]  ;;  %v3933_v53 = vmax.f32 %v7416_v19, %v568_v45  ;;  %v7419_v34 = vld [vmem:[#allocation99_spill] sm:$0xff]  ;;  %v7430_v45 = vmax.f32 %v2893_v3, %v3301_v22 }
  0xf8   :  { %v3903_v43 = vmax.f32 %v7407_v35, %v566_v33  ;;  %v3908_v15 = vmax.f32 %v7411_v23, %v567_v37  ;;  %7414 = vst [vmem:[#allocation24_spill] sm:$0xff] %v3923_v20  ;;  %7415 = vst [vmem:[#allocation80_spill] sm:$0xff] %v3928_v50  ;;  %v7417_v33 = vmax.f32 %v2858_v29, %v3278_v39  ;;  %v7422_v35 = vld [vmem:[#allocation45_spill] sm:$0xff]  ;;  %v7423_v55 = vld [vmem:[#allocation100_spill] sm:$0xff] }
  0xf9   :  { %7404 = vst [vmem:[#allocation19_spill] sm:$0xff] %v3898_v11  ;;  %v7420_v52 = vmax.f32 %v7418_v5, %v7419_v34  ;;  %v7424_v32 = vmax.f32 %v7422_v35, %v7423_v55  ;;  %v3953_v63 = vld [vmem:[%s6330_s0 + $0x45] sm:$0x1]  ;;  %v3958_v29 = vld [vmem:[%s6330_s0 + $0x55] sm:$0x1]  ;;  %v7436_v34 = vld [vmem:[#allocation101_spill] sm:$0xff] }
  0xfa   :  { %7408 = vst [vmem:[#allocation75_spill] sm:$0xff] %v3903_v43  ;;  %7412 = vst [vmem:[#allocation20_spill] sm:$0xff] %v3908_v15  ;;  %v3938_v37 = vmax.f32 %v7417_v33, %v569_v7  ;;  %v3963_v28 = vld [vmem:[%s6330_s0 + $0x65] sm:$0x1]  ;;  %v3968_v39 = vld [vmem:[%s6330_s0 + $0x75] sm:$0x1]  ;;  %v3973_v7 = vmax.f32 %v7430_v45, %v572_v30 }
  0xfb   :  { %v3943_v2 = vmax.f32 %v7420_v52, %v570_v38  ;;  %v3948_v23 = vmax.f32 %v7424_v32, %v571_v44  ;;  %7426 = vst [vmem:[#allocation25_spill] sm:$0xff] %v3953_v63  ;;  %7427 = vst [vmem:[#allocation81_spill] sm:$0xff] %v3958_v29  ;;  %v7431_v38 = vld [vmem:[#allocation51_spill] sm:$0xff]  ;;  %v7432_v44 = vld [vmem:[#allocation102_spill] sm:$0xff] }
  0xfc   :  { %7428 = vst [vmem:[#allocation22_spill] sm:$0xff] %v3963_v28  ;;  %7429 = vst [vmem:[#allocation78_spill] sm:$0xff] %v3968_v39  ;;  %v7433_v19 = vmax.f32 %v7431_v38, %v7432_v44  ;;  %v7435_v5 = vld [vmem:[#allocation52_spill] sm:$0xff]  ;;  %v7440_v32 = vld [vmem:[#allocation103_spill] sm:$0xff] }
  0xfd   :  { %7421 = vst [vmem:[#allocation21_spill] sm:$0xff] %v3943_v2  ;;  %7425 = vst [vmem:[#allocation77_spill] sm:$0xff] %v3948_v23  ;;  %v7437_v52 = vmax.f32 %v7435_v5, %v7436_v34  ;;  %v7439_v55 = vld [vmem:[#allocation56_spill] sm:$0xff]  ;;  %v3993_v3 = vld [vmem:[%s6330_s0 + $0x85] sm:$0x1] }
  0xfe   :  { %v3978_v33 = vmax.f32 %v7433_v19, %v573_v58  ;;  %v7441_v23 = vmax.f32 %v7439_v55, %v7440_v32  ;;  %7443 = vst [vmem:[#allocation79_spill] sm:$0xff] %v3993_v3  ;;  %v3998_v22 = vld [vmem:[%s6330_s0 + $0x95] sm:$0x1]  ;;  %v4003_v30 = vld [vmem:[%s6330_s0 + $0xa5] sm:$0x1]  ;;  %v7451_v38 = vld [vmem:[#allocation55_spill] sm:$0xff] }
  0xff   :  { %v3983_v35 = vmax.f32 %v7437_v52, %v574_v18  ;;  %7444 = vst [vmem:[#allocation27_spill] sm:$0xff] %v3998_v22  ;;  %7445 = vst [vmem:[#allocation83_spill] sm:$0xff] %v4003_v30  ;;  %v4008_v58 = vld [vmem:[%s6330_s0 + $0xb5] sm:$0x1]  ;;  %v7447_v18 = vmax.f32 %v2933_v57, %v3329_v25  ;;  %v7455_v34 = vld [vmem:[#allocation59_spill] sm:$0xff] }
 0x100   :  { %7434 = vst [vmem:[#allocation26_spill] sm:$0xff] %v3978_v33  ;;  %v3988_v2 = vmax.f32 %v7441_v23, %v575_v12  ;;  %7446 = vst [vmem:[#allocation28_spill] sm:$0xff] %v4008_v58  ;;  %v7449_v23 = vmax.f32 %v2938_v1, %v3334_v17  ;;  %v7452_v44 = vld [vmem:[#allocation104_spill] sm:$0xff]  ;;  %v7456_v52 = vld [vmem:[#allocation107_spill] sm:$0xff] }
 0x101   :  { %7438 = vst [vmem:[#allocation82_spill] sm:$0xff] %v3983_v35  ;;  %v4013_v12 = vmax.f32 %v7447_v18, %v576_v10  ;;  %v7453_v19 = vmax.f32 %v7451_v38, %v7452_v44  ;;  %v7457_v55 = vmax.f32 %v7455_v34, %v7456_v52  ;;  %v4033_v57 = vld [vmem:[%s6330_s0 + $0xc5] sm:$0x1]  ;;  %v4038_v17 = vld [vmem:[%s6330_s0 + $0xd5] sm:$0x1]  ;;  %v7463_v10 = vmax.f32 %v2973_v56, %v3357_v48  ;;  %v7473_v52 = vld [vmem:[#allocation63_spill] sm:$0xff] }
 0x102   :  { %7442 = vst [vmem:[#allocation23_spill] sm:$0xff] %v3988_v2  ;;  %v4018_v45 = vmax.f32 %v7449_v23, %v577_v16  ;;  %7459 = vst [vmem:[#allocation85_spill] sm:$0xff] %v4033_v57  ;;  %v4043_v1 = vld [vmem:[%s6330_s0 + $0xe5] sm:$0x1]  ;;  %v4048_v25 = vld [vmem:[%s6330_s0 + $0xf5] sm:$0x1] }
 0x103   :  { %7448 = vst [vmem:[#allocation84_spill] sm:$0xff] %v4013_v12  ;;  %v4023_v5 = vmax.f32 %v7453_v19, %v578_v47  ;;  %v4028_v32 = vmax.f32 %v7457_v55, %v579_v54  ;;  %7460 = vst [vmem:[#allocation33_spill] sm:$0xff] %v4038_v17  ;;  %v4053_v16 = vmax.f32 %v7463_v10, %v580_v27  ;;  %v7465_v47 = vld [vmem:[#allocation62_spill] sm:$0xff]  ;;  %v7466_v54 = vld [vmem:[#allocation105_spill] sm:$0xff] }
 0x104   :  { %7450 = vst [vmem:[#allocation32_spill] sm:$0xff] %v4018_v45  ;;  %7461 = vst [vmem:[#allocation87_spill] sm:$0xff] %v4043_v1  ;;  %v7467_v18 = vmax.f32 %v7465_v47, %v7466_v54  ;;  %v7469_v38 = vld [vmem:[#allocation66_spill] sm:$0xff]  ;;  %v7470_v44 = vld [vmem:[#allocation108_spill] sm:$0xff] }
 0x105   :  { %7454 = vst [vmem:[#allocation86_spill] sm:$0xff] %v4023_v5  ;;  %7458 = vst [vmem:[#allocation29_spill] sm:$0xff] %v4028_v32  ;;  %v7471_v19 = vmax.f32 %v7469_v38, %v7470_v44  ;;  %v7474_v55 = vld [vmem:[#allocation106_spill] sm:$0xff]  ;;  %v4078_v48 = vld [vmem:[%s6330_s0 + $0x115] sm:$0x1] }
 0x106   :  { %7462 = vst [vmem:[#allocation30_spill] sm:$0xff] %v4048_v25  ;;  %7464 = vst [vmem:[#allocation88_spill] sm:$0xff] %v4053_v16  ;;  %v4058_v23 = vmax.f32 %v7467_v18, %v581_v42  ;;  %v7475_v32 = vmax.f32 %v7473_v52, %v7474_v55  ;;  %v4073_v56 = vld [vmem:[%s6330_s0 + $0x105] sm:$0x1]  ;;  %v4088_v42 = vld [vmem:[%s6330_s0 + $0x135] sm:$0x1] }
 0x107   :  { %v4063_v34 = vmax.f32 %v7471_v19, %v582_v36  ;;  %7477 = vst [vmem:[#allocation89_spill] sm:$0xff] %v4073_v56  ;;  %7478 = vst [vmem:[#allocation40_spill] sm:$0xff] %v4078_v48  ;;  %v4083_v27 = vld [vmem:[%s6330_s0 + $0x125] sm:$0x1]  ;;  %v7481_v36 = vld [vmem:[#allocation109_spill] sm:$0xff] }
 0x108   :  { %7468 = vst [vmem:[#allocation34_spill] sm:$0xff] %v4058_v23  ;;  %v4068_v5 = vmax.f32 %v7475_v32, %v583_v60  ;;  %7479 = vst [vmem:[#allocation91_spill] sm:$0xff] %v4083_v27  ;;  %v4101_v44 = vld [vmem:[%s6330_s0 + $0x145] sm:$0x1]  ;;  %v4106_v19 = vld [vmem:[%s6330_s0 + $0x155] sm:$0x1] }
 0x109   :  { %7472 = vst [vmem:[#allocation90_spill] sm:$0xff] %v4063_v34  ;;  %7480 = vst [vmem:[#allocation37_spill] sm:$0xff] %v4088_v42  ;;  %v4111_v52 = vld [vmem:[%s6330_s0 + $0x165] sm:$0x1]  ;;  %v4116_v55 = vld [vmem:[%s6330_s0 + $0x175] sm:$0x1] }
 0x10a   :  { %7476 = vst [vmem:[#allocation31_spill] sm:$0xff] %v4068_v5  ;;  %7485 = vst [vmem:[#allocation92_spill] sm:$0xff] %v4101_v44  ;;  %v4129_v21 = vld [vmem:[%s6330_s0 + $0x185] sm:$0x1]  ;;  %v4134_v32 = vld [vmem:[%s6330_s0 + $0x195] sm:$0x1] }
 0x10b   :  { %7486 = vst [vmem:[#allocation41_spill] sm:$0xff] %v4106_v19  ;;  %7487 = vst [vmem:[#allocation94_spill] sm:$0xff] %v4111_v52  ;;  %v4139_v60 = vld [vmem:[%s6330_s0 + $0x1a5] sm:$0x1]  ;;  %v4144_v18 = vld [vmem:[%s6330_s0 + $0x1b5] sm:$0x1] }
 0x10c   :  { %7488 = vst [vmem:[#allocation38_spill] sm:$0xff] %v4116_v55  ;;  %7493 = vst [vmem:[#allocation93_spill] sm:$0xff] %v4129_v21  ;;  %v4157_v63 = vld [vmem:[%s6330_s0 + $0x1c5] sm:$0x1]  ;;  %v4162_v38 = vld [vmem:[%s6330_s0 + $0x1d5] sm:$0x1] }
 0x10d   :  { %7494 = vst [vmem:[#allocation42_spill] sm:$0xff] %v4134_v32  ;;  %7495 = vst [vmem:[#allocation95_spill] sm:$0xff] %v4139_v60  ;;  %v4167_v20 = vld [vmem:[%s6330_s0 + $0x1e5] sm:$0x1]  ;;  %v4172_v50 = vld [vmem:[%s6330_s0 + $0x1f5] sm:$0x1] }
 0x10e   :  { %7496 = vst [vmem:[#allocation39_spill] sm:$0xff] %v4144_v18  ;;  %7501 = vst [vmem:[#allocation96_spill] sm:$0xff] %v4157_v63  ;;  %v4185_v3 = vld [vmem:[%s6330_s0 + $0x205] sm:$0x1]  ;;  %v4190_v47 = vld [vmem:[%s6330_s0 + $0x215] sm:$0x1] }
 0x10f   :  { %7502 = vst [vmem:[#allocation43_spill] sm:$0xff] %v4162_v38  ;;  %7503 = vst [vmem:[#allocation98_spill] sm:$0xff] %v4167_v20  ;;  %v4195_v29 = vld [vmem:[%s6330_s0 + $0x225] sm:$0x1]  ;;  %v4200_v28 = vld [vmem:[%s6330_s0 + $0x235] sm:$0x1] }
 0x110   :  { %7504 = vst [vmem:[#allocation44_spill] sm:$0xff] %v4172_v50  ;;  %7509 = vst [vmem:[#allocation97_spill] sm:$0xff] %v4195_v29  ;;  %v4213_v57 = vld [vmem:[%s6330_s0 + $0x245] sm:$0x1]  ;;  %v4218_v10 = vld [vmem:[%s6330_s0 + $0x255] sm:$0x1] }
 0x111   :  { %7510 = vst [vmem:[#allocation48_spill] sm:$0xff] %v4200_v28  ;;  %v4223_v22 = vld [vmem:[%s6330_s0 + $0x265] sm:$0x1]  ;;  %v4228_v30 = vld [vmem:[%s6330_s0 + $0x275] sm:$0x1]  ;;  %7544 = vst [vmem:[#allocation62_spill] sm:$0xff] %v4386_v41 }
 0x112   :  { %7515 = vst [vmem:[#allocation99_spill] sm:$0xff] %v4223_v22  ;;  %7516 = vst [vmem:[#allocation45_spill] sm:$0xff] %v4228_v30  ;;  %v4241_v56 = vld [vmem:[%s6330_s0 + $0x285] sm:$0x1]  ;;  %v4246_v39 = vld [vmem:[%s6330_s0 + $0x295] sm:$0x1] }
 0x113   :  { %v4251_v17 = vld [vmem:[%s6330_s0 + $0x2a5] sm:$0x1]  ;;  %v4256_v1 = vld [vmem:[%s6330_s0 + $0x2b5] sm:$0x1]  ;;  %7548 = vst [vmem:[#allocation63_spill] sm:$0xff] %v4414_v31  ;;  %v7569_v31 = vld [vmem:[#allocation113_spill] sm:$0xff] }
 0x114   :  { %7521 = vst [vmem:[#allocation100_spill] sm:$0xff] %v4251_v17  ;;  %7522 = vst [vmem:[#allocation51_spill] sm:$0xff] %v4256_v1  ;;  %v4269_v44 = vld [vmem:[%s6330_s0 + $0x2c5] sm:$0x1]  ;;  %v4274_v58 = vld [vmem:[%s6330_s0 + $0x2d5] sm:$0x1] }
 0x115   :  { %v4279_v48 = vld [vmem:[%s6330_s0 + $0x2e5] sm:$0x1]  ;;  %v4284_v27 = vld [vmem:[%s6330_s0 + $0x2f5] sm:$0x1]  ;;  %v801_v49 = vld [vmem:[%s6330_s0 + $0x16] sm:$0x1] }
 0x116   :  { %7527 = vst [vmem:[#allocation102_spill] sm:$0xff] %v4279_v48  ;;  %7528 = vst [vmem:[#allocation52_spill] sm:$0xff] %v4284_v27  ;;  %v4297_v21 = vld [vmem:[%s6330_s0 + $0x305] sm:$0x1]  ;;  %v4302_v25 = vld [vmem:[%s6330_s0 + $0x315] sm:$0x1] }
 0x117   :  { %v4307_v19 = vld [vmem:[%s6330_s0 + $0x325] sm:$0x1]  ;;  %v4312_v52 = vld [vmem:[%s6330_s0 + $0x335] sm:$0x1]  ;;  %v802_v46 = vld [vmem:[%s6330_s0 + $0x26] sm:$0x1] }
 0x118   :  { %7533 = vst [vmem:[#allocation101_spill] sm:$0xff] %v4307_v19  ;;  %7534 = vst [vmem:[#allocation56_spill] sm:$0xff] %v4312_v52  ;;  %v7535_v55 = vld [vmem:[#allocation16_spill] sm:$0xff]  ;;  %v4325_v63 = vld [vmem:[%s6330_s0 + $0x345] sm:$0x1] }
 0x119   :  { %v7536_v50 = vld [vmem:[#allocation72_spill] sm:$0xff]  ;;  %v4335_v32 = vld [vmem:[%s6330_s0 + $0x365] sm:$0x1]  ;;  %v800_v19 = vld [vmem:[%s6330_s0 + $0x6] sm:$0x1] }
 0x11a   :  { %v4330_v42 = vld [vmem:[%s6330_s0 + $0x355] sm:$0x1]  ;;  %7540 = vst [vmem:[#allocation55_spill] sm:$0xff] %v4335_v32  ;;  %v4353_v29 = vld [vmem:[%s6330_s0 + $0x385] sm:$0x1] }
 0x11b   :  { %7539 = vst [vmem:[#allocation103_spill] sm:$0xff] %v4330_v42  ;;  %v4340_v60 = vld [vmem:[%s6330_s0 + $0x375] sm:$0x1]  ;;  %v4363_v54 = vld [vmem:[%s6330_s0 + $0x3a5] sm:$0x1] }
 0x11c   :  { %7541 = vst [vmem:[#allocation104_spill] sm:$0xff] %v4340_v60  ;;  %v4358_v20 = vld [vmem:[%s6330_s0 + $0x395] sm:$0x1]  ;;  %7542 = vst [vmem:[#allocation59_spill] sm:$0xff] %v4363_v54  ;;  %v4381_v22 = vld [vmem:[%s6330_s0 + $0x3c5] sm:$0x1] }
 0x11d   :  { %v4368_v28 = vld [vmem:[%s6330_s0 + $0x3b5] sm:$0x1]  ;;  %v4391_v18 = vld [vmem:[%s6330_s0 + $0x3e5] sm:$0x1]  ;;  %v803_v26 = vld [vmem:[%s6330_s0 + $0x36] sm:$0x1] }
 0x11e   :  { %7543 = vst [vmem:[#allocation107_spill] sm:$0xff] %v4368_v28  ;;  %7545 = vst [vmem:[#allocation105_spill] sm:$0xff] %v4391_v18  ;;  %v4396_v30 = vld [vmem:[%s6330_s0 + $0x3f5] sm:$0x1]  ;;  %v4409_v17 = vld [vmem:[%s6330_s0 + $0x405] sm:$0x1] }
 0x11f   :  { %7546 = vst [vmem:[#allocation66_spill] sm:$0xff] %v4396_v30  ;;  %7547 = vst [vmem:[#allocation108_spill] sm:$0xff] %v4409_v17  ;;  %v4419_v38 = vld [vmem:[%s6330_s0 + $0x425] sm:$0x1]  ;;  %v4424_v1 = vld [vmem:[%s6330_s0 + $0x435] sm:$0x1] }
 0x120   :  { %7549 = vst [vmem:[#allocation106_spill] sm:$0xff] %v4419_v38  ;;  %7550 = vst [vmem:[#allocation109_spill] sm:$0xff] %v4424_v1  ;;  %v4437_v48 = vld [vmem:[%s6330_s0 + $0x445] sm:$0x1]  ;;  %v4442_v8 = vld [vmem:[%s6330_s0 + $0x455] sm:$0x1]  ;;  %v7559_v1 = vmax.f32 %v7481_v36, %v3913_v51 }
 0x121   :  { %7551 = vst [vmem:[#allocation16_spill] sm:$0xff] %v4437_v48  ;;  %7552 = vst [vmem:[#allocation72_spill] sm:$0xff] %v4442_v8  ;;  %v4447_v61 = vld [vmem:[%s6330_s0 + $0x465] sm:$0x1]  ;;  %v4452_v27 = vld [vmem:[%s6330_s0 + $0x475] sm:$0x1] }
 0x122   :  { %7553 = vst [vmem:[#allocation114_spill] sm:$0xff] %v4447_v61  ;;  %7554 = vst [vmem:[#allocation115_spill] sm:$0xff] %v4452_v27  ;;  %v804_v42 = vld [vmem:[%s6330_s0 + $0x46] sm:$0x1]  ;;  %v805_v11 = vld [vmem:[%s6330_s0 + $0x56] sm:$0x1]  ;;  %v4557_v18 = vmax.f32 %v7559_v1, %v800_v19 }
 0x123   :  { %v806_v52 = vld [vmem:[%s6330_s0 + $0x66] sm:$0x1]  ;;  %v807_v59 = vld [vmem:[%s6330_s0 + $0x76] sm:$0x1]  ;;  %v7561_v27 = vld [vmem:[#allocation35_spill] sm:$0xff] }
 0x124   :  { %v808_v54 = vld [vmem:[%s6330_s0 + $0x86] sm:$0x1]  ;;  %v809_v60 = vld [vmem:[%s6330_s0 + $0x96] sm:$0x1]  ;;  %7560 = vst [vmem:[#allocation116_spill] sm:$0xff] %v4557_v18 }
 0x125   :  { %v810_v15 = vld [vmem:[%s6330_s0 + $0xa6] sm:$0x1]  ;;  %v811_v43 = vld [vmem:[%s6330_s0 + $0xb6] sm:$0x1] }
 0x126   :  { %v812_v41 = vld [vmem:[%s6330_s0 + $0xc6] sm:$0x1]  ;;  %v813_v33 = vld [vmem:[%s6330_s0 + $0xd6] sm:$0x1] }
 0x127   :  { %v814_v28 = vld [vmem:[%s6330_s0 + $0xe6] sm:$0x1]  ;;  %v815_v32 = vld [vmem:[%s6330_s0 + $0xf6] sm:$0x1] }
 0x128   :  { %v816_v38 = vld [vmem:[%s6330_s0 + $0x106] sm:$0x1]  ;;  %v817_v30 = vld [vmem:[%s6330_s0 + $0x116] sm:$0x1] }
 0x129   :  { %v818_v2 = vld [vmem:[%s6330_s0 + $0x126] sm:$0x1]  ;;  %v819_v35 = vld [vmem:[%s6330_s0 + $0x136] sm:$0x1] }
 0x12a   :  { %v7562_v5 = vld [vmem:[#allocation76_spill] sm:$0xff]  ;;  %v820_v51 = vld [vmem:[%s6330_s0 + $0x146] sm:$0x1] }
 0x12b   :  { %v7563_v61 = vmax.f32 %v7561_v27, %v7562_v5  ;;  %v7565_v8 = vld [vmem:[#allocation36_spill] sm:$0xff]  ;;  %v7582_v27 = vld [vmem:[#allocation22_spill] sm:$0xff] }
 0x12c   :  { %v7566_v23 = vld [vmem:[#allocation24_spill] sm:$0xff] }
 0x12d   :  { %v4562_v34 = vmax.f32 %v7563_v61, %v801_v49  ;;  %v7567_v48 = vmax.f32 %v7565_v8, %v7566_v23  ;;  %v7570_v45 = vld [vmem:[#allocation80_spill] sm:$0xff]  ;;  %v822_v61 = vld [vmem:[%s6330_s0 + $0x166] sm:$0x1] }
 0x12e   :  { %v7571_v17 = vmax.f32 %v7569_v31, %v7570_v45  ;;  %v821_v5 = vld [vmem:[%s6330_s0 + $0x156] sm:$0x1]  ;;  %v7574_v31 = vld [vmem:[#allocation25_spill] sm:$0xff] }
 0x12f   :  { %7564 = vst [vmem:[#allocation35_spill] sm:$0xff] %v4562_v34  ;;  %v4567_v16 = vmax.f32 %v7567_v48, %v802_v46  ;;  %v823_v8 = vld [vmem:[%s6330_s0 + $0x176] sm:$0x1]  ;;  %v7573_v46 = vld [vmem:[#allocation110_spill] sm:$0xff]  ;;  %v7577_v45 = vld [vmem:[#allocation49_spill] sm:$0xff] }
 0x130   :  { %v4572_v12 = vmax.f32 %v7571_v17, %v803_v26  ;;  %v7575_v26 = vmax.f32 %v7573_v46, %v7574_v31  ;;  %v7578_v17 = vld [vmem:[#allocation81_spill] sm:$0xff]  ;;  %v7581_v48 = vld [vmem:[#allocation111_spill] sm:$0xff]  ;;  %v825_v46 = vld [vmem:[%s6330_s0 + $0x196] sm:$0x1] }
 0x131   :  { %7568 = vst [vmem:[#allocation76_spill] sm:$0xff] %v4567_v16  ;;  %v7579_v1 = vmax.f32 %v7577_v45, %v7578_v17  ;;  %v7583_v36 = vmax.f32 %v7581_v48, %v7582_v27  ;;  %v7586_v16 = vld [vmem:[#allocation78_spill] sm:$0xff]  ;;  %v7589_v31 = vld [vmem:[#allocation112_spill] sm:$0xff]  ;;  %v7598_v48 = vld [vmem:[#allocation83_spill] sm:$0xff] }
 0x132   :  { %7572 = vst [vmem:[#allocation36_spill] sm:$0xff] %v4572_v12  ;;  %v4589_v49 = vmax.f32 %v7575_v26, %v804_v42  ;;  %v7585_v12 = vld [vmem:[#allocation46_spill] sm:$0xff]  ;;  %v7594_v26 = vld [vmem:[#allocation27_spill] sm:$0xff] }
 0x133   :  { %v4594_v23 = vmax.f32 %v7579_v1, %v805_v11  ;;  %v4599_v19 = vmax.f32 %v7583_v36, %v806_v52  ;;  %v7587_v34 = vmax.f32 %v7585_v12, %v7586_v16  ;;  %v824_v42 = vld [vmem:[%s6330_s0 + $0x186] sm:$0x1]  ;;  %v827_v52 = vld [vmem:[%s6330_s0 + $0x1b6] sm:$0x1]  ;;  %v7590_v12 = vld [vmem:[#allocation79_spill] sm:$0xff] }
 0x134   :  { %7576 = vst [vmem:[#allocation24_spill] sm:$0xff] %v4589_v49  ;;  %v826_v11 = vld [vmem:[%s6330_s0 + $0x1a6] sm:$0x1] }
 0x135   :  { %7580 = vst [vmem:[#allocation113_spill] sm:$0xff] %v4594_v23  ;;  %7584 = vst [vmem:[#allocation80_spill] sm:$0xff] %v4599_v19  ;;  %v4604_v18 = vmax.f32 %v7587_v34, %v807_v59  ;;  %v7591_v59 = vmax.f32 %v7589_v31, %v7590_v12  ;;  %v7593_v34 = vld [vmem:[#allocation50_spill] sm:$0xff]  ;;  %v7602_v19 = vld [vmem:[#allocation28_spill] sm:$0xff] }
 0x136   :  { %v7595_v45 = vmax.f32 %v7593_v34, %v7594_v26  ;;  %v7597_v1 = vld [vmem:[#allocation2_spill] sm:$0xff]  ;;  %v829_v31 = vld [vmem:[%s6330_s0 + $0x1d6] sm:$0x1]  ;;  %v7605_v12 = vld [vmem:[#allocation3_spill] sm:$0xff] }
 0x137   :  { %7588 = vst [vmem:[#allocation110_spill] sm:$0xff] %v4604_v18  ;;  %v4621_v16 = vmax.f32 %v7591_v59, %v808_v54  ;;  %v7599_v27 = vmax.f32 %v7597_v1, %v7598_v48  ;;  %v7601_v18 = vld [vmem:[#allocation47_spill] sm:$0xff]  ;;  %v828_v54 = vld [vmem:[%s6330_s0 + $0x1c6] sm:$0x1]  ;;  %v7610_v59 = vld [vmem:[#allocation33_spill] sm:$0xff] }
 0x138   :  { %v4626_v17 = vmax.f32 %v7595_v45, %v809_v60  ;;  %v7603_v23 = vmax.f32 %v7601_v18, %v7602_v19  ;;  %v830_v60 = vld [vmem:[%s6330_s0 + $0x1e6] sm:$0x1]  ;;  %v7606_v18 = vld [vmem:[#allocation85_spill] sm:$0xff]  ;;  %v7613_v45 = vld [vmem:[#allocation4_spill] sm:$0xff] }
 0x139   :  { %7592 = vst [vmem:[#allocation25_spill] sm:$0xff] %v4621_v16  ;;  %v4631_v36 = vmax.f32 %v7599_v27, %v810_v15  ;;  %v831_v15 = vld [vmem:[%s6330_s0 + $0x1f6] sm:$0x1]  ;;  %v7609_v19 = vld [vmem:[#allocation53_spill] sm:$0xff]  ;;  %v7614_v1 = vld [vmem:[#allocation87_spill] sm:$0xff] }
 0x13a   :  { %7596 = vst [vmem:[#allocation49_spill] sm:$0xff] %v4626_v17  ;;  %v4636_v49 = vmax.f32 %v7603_v23, %v811_v43  ;;  %v7607_v43 = vmax.f32 %v7605_v12, %v7606_v18  ;;  %v7611_v34 = vmax.f32 %v7609_v19, %v7610_v59  ;;  %v7615_v48 = vmax.f32 %v7613_v45, %v7614_v1  ;;  %v833_v12 = vld [vmem:[%s6330_s0 + $0x216] sm:$0x1]  ;;  %v7630_v45 = vld [vmem:[#allocation91_spill] sm:$0xff] }
 0x13b   :  { %7600 = vst [vmem:[#allocation81_spill] sm:$0xff] %v4631_v36  ;;  %v7618_v36 = vld [vmem:[#allocation30_spill] sm:$0xff]  ;;  %v7621_v18 = vld [vmem:[#allocation8_spill] sm:$0xff] }
 0x13c   :  { %7604 = vst [vmem:[#allocation111_spill] sm:$0xff] %v4636_v49  ;;  %v4653_v23 = vmax.f32 %v7607_v43, %v812_v41  ;;  %v4658_v26 = vmax.f32 %v7611_v34, %v813_v33  ;;  %v4663_v27 = vmax.f32 %v7615_v48, %v814_v28  ;;  %v7617_v49 = vld [vmem:[#allocation57_spill] sm:$0xff]  ;;  %v832_v41 = vld [vmem:[%s6330_s0 + $0x206] sm:$0x1]  ;;  %v835_v28 = vld [vmem:[%s6330_s0 + $0x236] sm:$0x1] }
 0x13d   :  { %v7619_v17 = vmax.f32 %v7617_v49, %v7618_v36  ;;  %v834_v33 = vld [vmem:[%s6330_s0 + $0x226] sm:$0x1]  ;;  %v7622_v49 = vld [vmem:[#allocation89_spill] sm:$0xff]  ;;  %v7626_v43 = vld [vmem:[#allocation40_spill] sm:$0xff] }
 0x13e   :  { %7608 = vst [vmem:[#allocation22_spill] sm:$0xff] %v4653_v23  ;;  %7612 = vst [vmem:[#allocation46_spill] sm:$0xff] %v4658_v26  ;;  %v7625_v36 = vld [vmem:[#allocation54_spill] sm:$0xff]  ;;  %v7629_v34 = vld [vmem:[#allocation5_spill] sm:$0xff] }
 0x13f   :  { %7616 = vst [vmem:[#allocation78_spill] sm:$0xff] %v4663_v27  ;;  %v4668_v16 = vmax.f32 %v7619_v17, %v815_v32  ;;  %v7623_v32 = vmax.f32 %v7621_v18, %v7622_v49  ;;  %v7627_v19 = vmax.f32 %v7625_v36, %v7626_v43  ;;  %v7631_v1 = vmax.f32 %v7629_v34, %v7630_v45  ;;  %v7634_v27 = vld [vmem:[#allocation37_spill] sm:$0xff]  ;;  %v837_v18 = vld [vmem:[%s6330_s0 + $0x256] sm:$0x1]  ;;  %v7646_v34 = vld [vmem:[#allocation94_spill] sm:$0xff] }
 0x140   :  { %v7637_v49 = vld [vmem:[#allocation9_spill] sm:$0xff] }
 0x141   :  { %7620 = vst [vmem:[#allocation112_spill] sm:$0xff] %v4668_v16  ;;  %v4685_v17 = vmax.f32 %v7623_v32, %v816_v38  ;;  %v4690_v59 = vmax.f32 %v7627_v19, %v817_v30  ;;  %v4695_v48 = vmax.f32 %v7631_v1, %v818_v2  ;;  %v7633_v16 = vld [vmem:[#allocation58_spill] sm:$0xff]  ;;  %v839_v2 = vld [vmem:[%s6330_s0 + $0x276] sm:$0x1]  ;;  %v7642_v32 = vld [vmem:[#allocation41_spill] sm:$0xff] }
 0x142   :  { %v7635_v26 = vmax.f32 %v7633_v16, %v7634_v27  ;;  %v836_v38 = vld [vmem:[%s6330_s0 + $0x246] sm:$0x1]  ;;  %v7638_v16 = vld [vmem:[#allocation92_spill] sm:$0xff] }
 0x143   :  { %7624 = vst [vmem:[#allocation79_spill] sm:$0xff] %v4685_v17  ;;  %7628 = vst [vmem:[#allocation50_spill] sm:$0xff] %v4690_v59  ;;  %v838_v30 = vld [vmem:[%s6330_s0 + $0x266] sm:$0x1]  ;;  %v7641_v27 = vld [vmem:[#allocation60_spill] sm:$0xff] }
 0x144   :  { %7632 = vst [vmem:[#allocation27_spill] sm:$0xff] %v4695_v48  ;;  %v4700_v23 = vmax.f32 %v7635_v26, %v819_v35  ;;  %v7639_v35 = vmax.f32 %v7637_v49, %v7638_v16  ;;  %v7643_v36 = vmax.f32 %v7641_v27, %v7642_v32  ;;  %v7645_v19 = vld [vmem:[#allocation6_spill] sm:$0xff]  ;;  %v841_v49 = vld [vmem:[%s6330_s0 + $0x296] sm:$0x1] }
 0x145   :  { %v7647_v45 = vmax.f32 %v7645_v19, %v7646_v34  ;;  %v7650_v48 = vld [vmem:[#allocation38_spill] sm:$0xff]  ;;  %v7662_v19 = vld [vmem:[#allocation95_spill] sm:$0xff] }
 0x146   :  { %7636 = vst [vmem:[#allocation2_spill] sm:$0xff] %v4700_v23  ;;  %v4717_v26 = vmax.f32 %v7639_v35, %v820_v51  ;;  %v4722_v43 = vmax.f32 %v7643_v36, %v821_v5  ;;  %v7649_v23 = vld [vmem:[#allocation64_spill] sm:$0xff]  ;;  %v840_v51 = vld [vmem:[%s6330_s0 + $0x286] sm:$0x1]  ;;  %v7661_v36 = vld [vmem:[#allocation7_spill] sm:$0xff] }
 0x147   :  { %v4727_v1 = vmax.f32 %v7647_v45, %v822_v61  ;;  %v7651_v59 = vmax.f32 %v7649_v23, %v7650_v48  ;;  %v842_v5 = vld [vmem:[%s6330_s0 + $0x2a6] sm:$0x1]  ;;  %v843_v61 = vld [vmem:[%s6330_s0 + $0x2b6] sm:$0x1]  ;;  %v7654_v23 = vld [vmem:[#allocation93_spill] sm:$0xff]  ;;  %v7663_v34 = vmax.f32 %v7661_v36, %v7662_v19 }
 0x148   :  { %7640 = vst [vmem:[#allocation83_spill] sm:$0xff] %v4717_v26  ;;  %7644 = vst [vmem:[#allocation47_spill] sm:$0xff] %v4722_v43  ;;  %v7653_v16 = vld [vmem:[#allocation10_spill] sm:$0xff]  ;;  %v7657_v48 = vld [vmem:[#allocation61_spill] sm:$0xff] }
 0x149   :  { %7648 = vst [vmem:[#allocation28_spill] sm:$0xff] %v4727_v1  ;;  %v4732_v17 = vmax.f32 %v7651_v59, %v823_v8  ;;  %v7655_v8 = vmax.f32 %v7653_v16, %v7654_v23  ;;  %v7658_v35 = vld [vmem:[#allocation42_spill] sm:$0xff]  ;;  %v4759_v45 = vmax.f32 %v7663_v34, %v826_v11  ;;  %v7666_v1 = vld [vmem:[#allocation39_spill] sm:$0xff]  ;;  %v845_v16 = vld [vmem:[%s6330_s0 + $0x2d6] sm:$0x1] }
 0x14a   :  { %v7659_v27 = vmax.f32 %v7657_v48, %v7658_v35  ;;  %v847_v11 = vld [vmem:[%s6330_s0 + $0x2f6] sm:$0x1]  ;;  %v7669_v23 = vld [vmem:[#allocation11_spill] sm:$0xff]  ;;  %v7676_v36 = vld [vmem:[#allocation98_spill] sm:$0xff] }
 0x14b   :  { %7652 = vst [vmem:[#allocation3_spill] sm:$0xff] %v4732_v17  ;;  %v4749_v59 = vmax.f32 %v7655_v8, %v824_v42  ;;  %7664 = vst [vmem:[#allocation33_spill] sm:$0xff] %v4759_v45  ;;  %v7665_v17 = vld [vmem:[#allocation65_spill] sm:$0xff]  ;;  %v844_v42 = vld [vmem:[%s6330_s0 + $0x2c6] sm:$0x1] }
 0x14c   :  { %v4754_v32 = vmax.f32 %v7659_v27, %v825_v46  ;;  %v7667_v43 = vmax.f32 %v7665_v17, %v7666_v1  ;;  %v846_v46 = vld [vmem:[%s6330_s0 + $0x2e6] sm:$0x1]  ;;  %v7670_v17 = vld [vmem:[#allocation96_spill] sm:$0xff]  ;;  %v7672_v1 = vld [vmem:[#allocation67_spill] sm:$0xff] }
 0x14d   :  { %7656 = vst [vmem:[#allocation85_spill] sm:$0xff] %v4749_v59  ;;  %v7673_v8 = vld [vmem:[#allocation43_spill] sm:$0xff]  ;;  %v7675_v27 = vld [vmem:[#allocation12_spill] sm:$0xff] }
 0x14e   :  { %7660 = vst [vmem:[#allocation53_spill] sm:$0xff] %v4754_v32  ;;  %v4764_v26 = vmax.f32 %v7667_v43, %v827_v52  ;;  %v7671_v52 = vmax.f32 %v7669_v23, %v7670_v17  ;;  %v7674_v48 = vmax.f32 %v7672_v1, %v7673_v8  ;;  %v7677_v19 = vmax.f32 %v7675_v27, %v7676_v36  ;;  %v7680_v45 = vld [vmem:[#allocation44_spill] sm:$0xff]  ;;  %v7685_v17 = vld [vmem:[#allocation13_spill] sm:$0xff] }
 0x14f   :  { %v849_v23 = vld [vmem:[%s6330_s0 + $0x316] sm:$0x1] }
 0x150   :  { %7668 = vst [vmem:[#allocation4_spill] sm:$0xff] %v4764_v26  ;;  %v4781_v43 = vmax.f32 %v7671_v52, %v828_v54  ;;  %v4786_v35 = vmax.f32 %v7674_v48, %v829_v31  ;;  %v4791_v34 = vmax.f32 %v7677_v19, %v830_v60  ;;  %v7679_v26 = vld [vmem:[#allocation68_spill] sm:$0xff]  ;;  %v848_v54 = vld [vmem:[%s6330_s0 + $0x306] sm:$0x1]  ;;  %v7686_v52 = vld [vmem:[#allocation97_spill] sm:$0xff] }
 0x151   :  { %v7681_v32 = vmax.f32 %v7679_v26, %v7680_v45  ;;  %v850_v31 = vld [vmem:[%s6330_s0 + $0x326] sm:$0x1]  ;;  %v851_v60 = vld [vmem:[%s6330_s0 + $0x336] sm:$0x1]  ;;  %v7687_v1 = vmax.f32 %v7685_v17, %v7686_v52  ;;  %v7689_v48 = vld [vmem:[#allocation69_spill] sm:$0xff] }
 0x152   :  { %7678 = vst [vmem:[#allocation87_spill] sm:$0xff] %v4791_v34  ;;  %v7690_v27 = vld [vmem:[#allocation48_spill] sm:$0xff] }
 0x153   :  { %v4796_v59 = vmax.f32 %v7681_v32, %v831_v15  ;;  %v7683_v15 = vmax.f32 %v7535_v55, %v4185_v3  ;;  %v7684_v32 = vmax.f32 %v7536_v50, %v4190_v47  ;;  %v4823_v8 = vmax.f32 %v7687_v1, %v834_v33  ;;  %v852_v3 = vld [vmem:[%s6330_s0 + $0x346] sm:$0x1]  ;;  %v853_v50 = vld [vmem:[%s6330_s0 + $0x356] sm:$0x1]  ;;  %v7699_v1 = vld [vmem:[#allocation73_spill] sm:$0xff] }
 0x154   :  { %v7691_v36 = vmax.f32 %v7689_v48, %v7690_v27  ;;  %v854_v47 = vld [vmem:[%s6330_s0 + $0x366] sm:$0x1]  ;;  %v855_v55 = vld [vmem:[%s6330_s0 + $0x376] sm:$0x1]  ;;  %v7694_v33 = vmax.f32 %v3770_v0, %v4218_v10  ;;  %v7700_v48 = vld [vmem:[#allocation45_spill] sm:$0xff] }
 0x155   :  { %7682 = vst [vmem:[#allocation57_spill] sm:$0xff] %v4796_v59  ;;  %v4813_v26 = vmax.f32 %v7683_v15, %v832_v41  ;;  %v4818_v45 = vmax.f32 %v7684_v32, %v833_v12  ;;  %7688 = vst [vmem:[#allocation30_spill] sm:$0xff] %v4823_v8  ;;  %v7693_v41 = vmax.f32 %v3765_v13, %v4213_v57  ;;  %v7695_v15 = vld [vmem:[#allocation17_spill] sm:$0xff]  ;;  %v7696_v32 = vld [vmem:[#allocation99_spill] sm:$0xff] }
 0x156   :  { %v4828_v19 = vmax.f32 %v7691_v36, %v835_v28  ;;  %v4850_v28 = vmax.f32 %v7694_v33, %v837_v18  ;;  %v7697_v17 = vmax.f32 %v7695_v15, %v7696_v32  ;;  %v7701_v27 = vmax.f32 %v7699_v1, %v7700_v48  ;;  %v856_v13 = vld [vmem:[%s6330_s0 + $0x386] sm:$0x1]  ;;  %v857_v0 = vld [vmem:[%s6330_s0 + $0x396] sm:$0x1]  ;;  %v7710_v1 = vld [vmem:[#allocation51_spill] sm:$0xff] }
 0x157   :  { %v4845_v12 = vmax.f32 %v7693_v41, %v836_v38  ;;  %v858_v57 = vld [vmem:[%s6330_s0 + $0x3a6] sm:$0x1]  ;;  %v859_v10 = vld [vmem:[%s6330_s0 + $0x3b6] sm:$0x1]  ;;  %v7703_v38 = vmax.f32 %v3797_v6, %v4241_v56  ;;  %v5410_v34 = vld [vmem:[%s6330_s0 + $0x357] sm:$0x1] }
 0x158   :  { %7692 = vst [vmem:[#allocation8_spill] sm:$0xff] %v4828_v19  ;;  %v4855_v52 = vmax.f32 %v7697_v17, %v838_v30  ;;  %v4860_v36 = vmax.f32 %v7701_v27, %v839_v2  ;;  %v7704_v30 = vmax.f32 %v3802_v9, %v4246_v39  ;;  %v7705_v41 = vld [vmem:[#allocation14_spill] sm:$0xff]  ;;  %v7706_v33 = vld [vmem:[#allocation100_spill] sm:$0xff] }
 0x159   :  { %v4877_v18 = vmax.f32 %v7703_v38, %v840_v51  ;;  %v7707_v15 = vmax.f32 %v7705_v41, %v7706_v33  ;;  %v7709_v17 = vld [vmem:[#allocation70_spill] sm:$0xff]  ;;  %v861_v9 = vld [vmem:[%s6330_s0 + $0x3d6] sm:$0x1]  ;;  %v7713_v51 = vmax.f32 %v3829_v40, %v4269_v44  ;;  %v5438_v8 = vld [vmem:[%s6330_s0 + $0x397] sm:$0x1] }
 0x15a   :  { %7698 = vst [vmem:[#allocation89_spill] sm:$0xff] %v4855_v52  ;;  %7702 = vst [vmem:[#allocation54_spill] sm:$0xff] %v4860_v36  ;;  %v4882_v2 = vmax.f32 %v7704_v30, %v841_v49  ;;  %v7711_v48 = vmax.f32 %v7709_v17, %v7710_v1  ;;  %v860_v6 = vld [vmem:[%s6330_s0 + $0x3c6] sm:$0x1]  ;;  %v863_v56 = vld [vmem:[%s6330_s0 + $0x3f6] sm:$0x1] }
 0x15b   :  { %v4887_v32 = vmax.f32 %v7707_v15, %v842_v5  ;;  %v862_v39 = vld [vmem:[%s6330_s0 + $0x3e6] sm:$0x1]  ;;  %v4909_v49 = vmax.f32 %v7713_v51, %v844_v42  ;;  %v7714_v5 = vmax.f32 %v3834_v24, %v4274_v58  ;;  %v7721_v17 = vld [vmem:[#allocation52_spill] sm:$0xff]  ;;  %v7724_v42 = vmax.f32 %v3861_v14, %v4297_v21  ;;  %v7726_v51 = vld [vmem:[#allocation15_spill] sm:$0xff] }
 0x15c   :  { %v4892_v27 = vmax.f32 %v7711_v48, %v843_v61  ;;  %v7716_v38 = vld [vmem:[#allocation18_spill] sm:$0xff]  ;;  %v865_v24 = vld [vmem:[%s6330_s0 + $0x416] sm:$0x1]  ;;  %v5466_v52 = vld [vmem:[%s6330_s0 + $0x3d7] sm:$0x1] }
 0x15d   :  { %7708 = vst [vmem:[#allocation40_spill] sm:$0xff] %v4887_v32  ;;  %v4914_v61 = vmax.f32 %v7714_v5, %v845_v16  ;;  %v7717_v30 = vld [vmem:[#allocation102_spill] sm:$0xff]  ;;  %v867_v44 = vld [vmem:[%s6330_s0 + $0x436] sm:$0x1]  ;;  %v4941_v16 = vmax.f32 %v7724_v42, %v848_v54  ;;  %v7727_v5 = vld [vmem:[#allocation101_spill] sm:$0xff]  ;;  %v7734_v54 = vmax.f32 %v3893_v62, %v4325_v63 }
 0x15e   :  { %7712 = vst [vmem:[#allocation5_spill] sm:$0xff] %v4892_v27  ;;  %v7718_v41 = vmax.f32 %v7716_v38, %v7717_v30  ;;  %v7720_v15 = vld [vmem:[#allocation74_spill] sm:$0xff]  ;;  %v7728_v38 = vmax.f32 %v7726_v51, %v7727_v5  ;;  %v7739_v51 = vld [vmem:[#allocation75_spill] sm:$0xff]  ;;  %v4998_v63 = vld [vmem:[%s6330_s0 + $0x17] sm:$0x1] }
 0x15f   :  { %7715 = vst [vmem:[#allocation91_spill] sm:$0xff] %v4914_v61  ;;  %v7722_v1 = vmax.f32 %v7720_v15, %v7721_v17  ;;  %v864_v40 = vld [vmem:[%s6330_s0 + $0x406] sm:$0x1]  ;;  %v7731_v15 = vld [vmem:[#allocation56_spill] sm:$0xff]  ;;  %v7740_v5 = vld [vmem:[#allocation55_spill] sm:$0xff] }
 0x160   :  { %v4919_v33 = vmax.f32 %v7718_v41, %v846_v46  ;;  %v866_v58 = vld [vmem:[%s6330_s0 + $0x426] sm:$0x1]  ;;  %v7725_v46 = vmax.f32 %v3866_v4, %v4302_v25  ;;  %v4951_v30 = vmax.f32 %v7728_v38, %v850_v31  ;;  %v7730_v41 = vld [vmem:[#allocation71_spill] sm:$0xff]  ;;  %v869_v4 = vld [vmem:[%s6330_s0 + $0x456] sm:$0x1]  ;;  %v7741_v38 = vmax.f32 %v7739_v51, %v7740_v5  ;;  %7747 = vst [vmem:[#allocation94_spill] sm:$0xff] %v4998_v63 }
 0x161   :  { %v4924_v48 = vmax.f32 %v7722_v1, %v847_v11  ;;  %v7732_v17 = vmax.f32 %v7730_v41, %v7731_v15  ;;  %v868_v14 = vld [vmem:[%s6330_s0 + $0x446] sm:$0x1]  ;;  %v871_v25 = vld [vmem:[%s6330_s0 + $0x476] sm:$0x1]  ;;  %v7735_v31 = vld [vmem:[#allocation19_spill] sm:$0xff] }
 0x162   :  { %7719 = vst [vmem:[#allocation58_spill] sm:$0xff] %v4919_v33  ;;  %v4946_v11 = vmax.f32 %v7725_v46, %v849_v23  ;;  %7729 = vst [vmem:[#allocation9_spill] sm:$0xff] %v4951_v30  ;;  %v870_v21 = vld [vmem:[%s6330_s0 + $0x466] sm:$0x1]  ;;  %v4973_v23 = vmax.f32 %v7734_v54, %v852_v3  ;;  %v4983_v41 = vmax.f32 %v7741_v38, %v854_v47  ;;  %v7743_v15 = vld [vmem:[#allocation20_spill] sm:$0xff] }
 0x163   :  { %7723 = vst [vmem:[#allocation37_spill] sm:$0xff] %v4924_v48  ;;  %v4956_v1 = vmax.f32 %v7732_v17, %v851_v60  ;;  %v7736_v60 = vld [vmem:[#allocation103_spill] sm:$0xff]  ;;  %v7744_v17 = vld [vmem:[#allocation104_spill] sm:$0xff]  ;;  %v4993_v62 = vld [vmem:[%s6330_s0 + $0x7] sm:$0x1]  ;;  %v7750_v47 = vmax.f32 %v3933_v53, %v4353_v29 }
 0x164   :  { %v7737_v42 = vmax.f32 %v7735_v31, %v7736_v60  ;;  %7742 = vst [vmem:[#allocation41_spill] sm:$0xff] %v4983_v41  ;;  %v5003_v3 = vld [vmem:[%s6330_s0 + $0x27] sm:$0x1]  ;;  %v7754_v31 = vld [vmem:[#allocation21_spill] sm:$0xff]  ;;  %v7755_v60 = vld [vmem:[#allocation59_spill] sm:$0xff] }
 0x165   :  { %7733 = vst [vmem:[#allocation92_spill] sm:$0xff] %v4956_v1  ;;  %v7745_v1 = vmax.f32 %v7743_v15, %v7744_v17  ;;  %7748 = vst [vmem:[#allocation64_spill] sm:$0xff] %v5003_v3  ;;  %v7758_v5 = vld [vmem:[#allocation77_spill] sm:$0xff]  ;;  %v7759_v38 = vld [vmem:[#allocation107_spill] sm:$0xff] }
 0x166   :  { %v4978_v46 = vmax.f32 %v7737_v42, %v853_v50  ;;  %v5008_v50 = vld [vmem:[%s6330_s0 + $0x37] sm:$0x1]  ;;  %v7756_v42 = vmax.f32 %v7754_v31, %v7755_v60  ;;  %v7760_v15 = vmax.f32 %v7758_v5, %v7759_v38  ;;  %v5033_v53 = vld [vmem:[%s6330_s0 + $0x47] sm:$0x1]  ;;  %v7773_v60 = vld [vmem:[#allocation105_spill] sm:$0xff] }
 0x167   :  { %v4988_v30 = vmax.f32 %v7745_v1, %v855_v55  ;;  %7749 = vst [vmem:[#allocation38_spill] sm:$0xff] %v5008_v50  ;;  %v5013_v55 = vmax.f32 %v7750_v47, %v856_v13  ;;  %v7752_v1 = vmax.f32 %v3938_v37, %v4358_v20  ;;  %7762 = vst [vmem:[#allocation7_spill] sm:$0xff] %v5033_v53  ;;  %v5038_v20 = vld [vmem:[%s6330_s0 + $0x57] sm:$0x1]  ;;  %v5043_v37 = vld [vmem:[%s6330_s0 + $0x67] sm:$0x1] }
 0x168   :  { %7738 = vst [vmem:[#allocation60_spill] sm:$0xff] %v4978_v46  ;;  %v5023_v51 = vmax.f32 %v7756_v42, %v858_v57  ;;  %v5028_v17 = vmax.f32 %v7760_v15, %v859_v10  ;;  %7763 = vst [vmem:[#allocation95_spill] sm:$0xff] %v5038_v20  ;;  %v5048_v29 = vld [vmem:[%s6330_s0 + $0x77] sm:$0x1]  ;;  %v7766_v13 = vmax.f32 %v3973_v7, %v4381_v22  ;;  %v7768_v57 = vld [vmem:[#allocation26_spill] sm:$0xff] }
 0x169   :  { %7746 = vst [vmem:[#allocation6_spill] sm:$0xff] %v4988_v30  ;;  %7751 = vst [vmem:[#allocation10_spill] sm:$0xff] %v5013_v55  ;;  %v5018_v54 = vmax.f32 %v7752_v1, %v857_v0  ;;  %v7769_v10 = vld [vmem:[#allocation62_spill] sm:$0xff]  ;;  %v7776_v38 = vld [vmem:[#allocation23_spill] sm:$0xff] }
 0x16a   :  { %7757 = vst [vmem:[#allocation61_spill] sm:$0xff] %v5023_v51  ;;  %7761 = vst [vmem:[#allocation42_spill] sm:$0xff] %v5028_v17  ;;  %v5053_v0 = vmax.f32 %v7766_v13, %v860_v6  ;;  %v7770_v47 = vmax.f32 %v7768_v57, %v7769_v10  ;;  %v7772_v31 = vld [vmem:[#allocation82_spill] sm:$0xff]  ;;  %v5078_v22 = vld [vmem:[%s6330_s0 + $0x97] sm:$0x1] }
 0x16b   :  { %7753 = vst [vmem:[#allocation93_spill] sm:$0xff] %v5018_v54  ;;  %7764 = vst [vmem:[#allocation65_spill] sm:$0xff] %v5043_v37  ;;  %v7774_v42 = vmax.f32 %v7772_v31, %v7773_v60  ;;  %v7777_v15 = vld [vmem:[#allocation66_spill] sm:$0xff]  ;;  %v7788_v57 = vld [vmem:[#allocation32_spill] sm:$0xff] }
 0x16c   :  { %7765 = vst [vmem:[#allocation39_spill] sm:$0xff] %v5048_v29  ;;  %7767 = vst [vmem:[#allocation11_spill] sm:$0xff] %v5053_v0  ;;  %v5058_v1 = vmax.f32 %v7770_v47, %v861_v9  ;;  %v7778_v17 = vmax.f32 %v7776_v38, %v7777_v15  ;;  %v5073_v7 = vld [vmem:[%s6330_s0 + $0x87] sm:$0x1]  ;;  %v5088_v9 = vld [vmem:[%s6330_s0 + $0xb7] sm:$0x1] }
 0x16d   :  { %v5063_v5 = vmax.f32 %v7774_v42, %v862_v39  ;;  %7780 = vst [vmem:[#allocation12_spill] sm:$0xff] %v5073_v7  ;;  %7781 = vst [vmem:[#allocation98_spill] sm:$0xff] %v5078_v22  ;;  %v5083_v6 = vld [vmem:[%s6330_s0 + $0xa7] sm:$0x1]  ;;  %v7784_v39 = vld [vmem:[#allocation84_spill] sm:$0xff] }
 0x16e   :  { %7771 = vst [vmem:[#allocation96_spill] sm:$0xff] %v5058_v1  ;;  %v5068_v51 = vmax.f32 %v7778_v17, %v863_v56  ;;  %7782 = vst [vmem:[#allocation68_spill] sm:$0xff] %v5083_v6  ;;  %v7785_v56 = vld [vmem:[#allocation108_spill] sm:$0xff]  ;;  %v7789_v10 = vld [vmem:[#allocation63_spill] sm:$0xff] }
 0x16f   :  { %7775 = vst [vmem:[#allocation67_spill] sm:$0xff] %v5063_v5  ;;  %7783 = vst [vmem:[#allocation44_spill] sm:$0xff] %v5088_v9  ;;  %v7786_v17 = vmax.f32 %v7784_v39, %v7785_v56  ;;  %v7790_v47 = vmax.f32 %v7788_v57, %v7789_v10  ;;  %v7792_v60 = vld [vmem:[#allocation86_spill] sm:$0xff]  ;;  %v7797_v5 = vld [vmem:[#allocation109_spill] sm:$0xff] }
 0x170   :  { %7779 = vst [vmem:[#allocation43_spill] sm:$0xff] %v5068_v51  ;;  %v7793_v42 = vld [vmem:[#allocation106_spill] sm:$0xff]  ;;  %v7796_v51 = vld [vmem:[#allocation29_spill] sm:$0xff]  ;;  %v5252_v50 = vld [vmem:[%s6330_s0 + $0x1f7] sm:$0x1] }
 0x171   :  { %v5093_v13 = vmax.f32 %v7786_v17, %v864_v40  ;;  %v5098_v31 = vmax.f32 %v7790_v47, %v865_v24  ;;  %v7794_v38 = vmax.f32 %v7792_v60, %v7793_v42  ;;  %v7798_v1 = vmax.f32 %v7796_v51, %v7797_v5  ;;  %v5113_v40 = vld [vmem:[%s6330_s0 + $0xc7] sm:$0x1]  ;;  %v5118_v24 = vld [vmem:[%s6330_s0 + $0xd7] sm:$0x1]  ;;  %7843 = vst [vmem:[#allocation55_spill] sm:$0xff] %v5252_v50 }
 0x172   :  { %7800 = vst [vmem:[#allocation17_spill] sm:$0xff] %v5113_v40  ;;  %7801 = vst [vmem:[#allocation99_spill] sm:$0xff] %v5118_v24  ;;  %v7804_v51 = vld [vmem:[#allocation88_spill] sm:$0xff]  ;;  %v7808_v56 = vld [vmem:[#allocation34_spill] sm:$0xff] }
 0x173   :  { %7787 = vst [vmem:[#allocation13_spill] sm:$0xff] %v5093_v13  ;;  %7791 = vst [vmem:[#allocation97_spill] sm:$0xff] %v5098_v31  ;;  %v5103_v15 = vmax.f32 %v7794_v38, %v866_v58  ;;  %v5108_v0 = vmax.f32 %v7798_v1, %v867_v44  ;;  %v5123_v58 = vld [vmem:[%s6330_s0 + $0xe7] sm:$0x1]  ;;  %v5128_v44 = vld [vmem:[%s6330_s0 + $0xf7] sm:$0x1] }
 0x174   :  { %7802 = vst [vmem:[#allocation73_spill] sm:$0xff] %v5123_v58  ;;  %7803 = vst [vmem:[#allocation45_spill] sm:$0xff] %v5128_v44  ;;  %v7805_v1 = vld [vmem:[#allocation16_spill] sm:$0xff]  ;;  %v7812_v47 = vld [vmem:[#allocation90_spill] sm:$0xff] }
 0x175   :  { %7795 = vst [vmem:[#allocation69_spill] sm:$0xff] %v5103_v15  ;;  %7799 = vst [vmem:[#allocation48_spill] sm:$0xff] %v5108_v0  ;;  %v7806_v5 = vmax.f32 %v7804_v51, %v7805_v1  ;;  %v7809_v17 = vld [vmem:[#allocation72_spill] sm:$0xff]  ;;  %v7813_v60 = vld [vmem:[#allocation114_spill] sm:$0xff] }
 0x176   :  { %v7810_v57 = vmax.f32 %v7808_v56, %v7809_v17  ;;  %v7814_v42 = vmax.f32 %v7812_v47, %v7813_v60  ;;  %v7816_v0 = vld [vmem:[#allocation31_spill] sm:$0xff]  ;;  %v5186_v47 = vld [vmem:[%s6330_s0 + $0x157] sm:$0x1]  ;;  %v5191_v60 = vld [vmem:[%s6330_s0 + $0x167] sm:$0x1]  ;;  %7871 = vst [vmem:[#allocation66_spill] sm:$0xff] %v5410_v34 }
 0x177   :  { %v5133_v39 = vmax.f32 %v7806_v5, %v868_v14  ;;  %v7817_v15 = vld [vmem:[#allocation115_spill] sm:$0xff]  ;;  %v5153_v14 = vld [vmem:[%s6330_s0 + $0x107] sm:$0x1]  ;;  %7829 = vst [vmem:[#allocation101_spill] sm:$0xff] %v5186_v47  ;;  %7830 = vst [vmem:[#allocation71_spill] sm:$0xff] %v5191_v60 }
 0x178   :  { %v5138_v10 = vmax.f32 %v7810_v57, %v869_v4  ;;  %v5143_v38 = vmax.f32 %v7814_v42, %v870_v21  ;;  %v7818_v31 = vmax.f32 %v7816_v0, %v7817_v15  ;;  %7820 = vst [vmem:[#allocation18_spill] sm:$0xff] %v5153_v14  ;;  %v5158_v4 = vld [vmem:[%s6330_s0 + $0x117] sm:$0x1]  ;;  %v5163_v21 = vld [vmem:[%s6330_s0 + $0x127] sm:$0x1]  ;;  %v7862_v44 = vld [vmem:[#allocation85_spill] sm:$0xff] }
 0x179   :  { %7807 = vst [vmem:[#allocation14_spill] sm:$0xff] %v5133_v39  ;;  %7821 = vst [vmem:[#allocation102_spill] sm:$0xff] %v5158_v4  ;;  %v7824_v0 = vld [vmem:[#allocation116_spill] sm:$0xff]  ;;  %v5181_v57 = vld [vmem:[%s6330_s0 + $0x147] sm:$0x1] }
 0x17a   :  { %7811 = vst [vmem:[#allocation100_spill] sm:$0xff] %v5138_v10  ;;  %7815 = vst [vmem:[#allocation70_spill] sm:$0xff] %v5143_v38  ;;  %v5148_v13 = vmax.f32 %v7818_v31, %v871_v25  ;;  %v5168_v25 = vld [vmem:[%s6330_s0 + $0x137] sm:$0x1]  ;;  %v5209_v63 = vld [vmem:[%s6330_s0 + $0x187] sm:$0x1] }
 0x17b   :  { %7822 = vst [vmem:[#allocation74_spill] sm:$0xff] %v5163_v21  ;;  %7823 = vst [vmem:[#allocation52_spill] sm:$0xff] %v5168_v25  ;;  %v5196_v42 = vld [vmem:[%s6330_s0 + $0x177] sm:$0x1]  ;;  %v5219_v31 = vld [vmem:[%s6330_s0 + $0x1a7] sm:$0x1] }
 0x17c   :  { %7819 = vst [vmem:[#allocation51_spill] sm:$0xff] %v5148_v13  ;;  %7828 = vst [vmem:[#allocation15_spill] sm:$0xff] %v5181_v57  ;;  %v5214_v15 = vld [vmem:[%s6330_s0 + $0x197] sm:$0x1]  ;;  %v5237_v53 = vld [vmem:[%s6330_s0 + $0x1c7] sm:$0x1] }
 0x17d   :  { %7831 = vst [vmem:[#allocation56_spill] sm:$0xff] %v5196_v42  ;;  %7836 = vst [vmem:[#allocation19_spill] sm:$0xff] %v5219_v31  ;;  %v5224_v56 = vld [vmem:[%s6330_s0 + $0x1b7] sm:$0x1]  ;;  %v5247_v3 = vld [vmem:[%s6330_s0 + $0x1e7] sm:$0x1] }
 0x17e   :  { %7837 = vst [vmem:[#allocation103_spill] sm:$0xff] %v5224_v56  ;;  %v5242_v17 = vld [vmem:[%s6330_s0 + $0x1d7] sm:$0x1]  ;;  %7842 = vst [vmem:[#allocation75_spill] sm:$0xff] %v5247_v3  ;;  %v5265_v7 = vld [vmem:[%s6330_s0 + $0x207] sm:$0x1] }
 0x17f   :  { %v5270_v1 = vld [vmem:[%s6330_s0 + $0x217] sm:$0x1]  ;;  %v5275_v20 = vld [vmem:[%s6330_s0 + $0x227] sm:$0x1]  ;;  %v7863_v42 = vld [vmem:[#allocation53_spill] sm:$0xff]  ;;  %7875 = vst [vmem:[#allocation63_spill] sm:$0xff] %v5438_v8 }
 0x180   :  { %7848 = vst [vmem:[#allocation20_spill] sm:$0xff] %v5275_v20  ;;  %v5280_v37 = vld [vmem:[%s6330_s0 + $0x237] sm:$0x1]  ;;  %v5293_v40 = vld [vmem:[%s6330_s0 + $0x247] sm:$0x1]  ;;  %7879 = vst [vmem:[#allocation109_spill] sm:$0xff] %v5466_v52 }
 0x181   :  { %7849 = vst [vmem:[#allocation104_spill] sm:$0xff] %v5280_v37  ;;  %v5298_v51 = vld [vmem:[%s6330_s0 + $0x257] sm:$0x1]  ;;  %v5303_v22 = vld [vmem:[%s6330_s0 + $0x267] sm:$0x1] }
 0x182   :  { %7854 = vst [vmem:[#allocation21_spill] sm:$0xff] %v5303_v22  ;;  %v5308_v6 = vld [vmem:[%s6330_s0 + $0x277] sm:$0x1]  ;;  %v5321_v14 = vld [vmem:[%s6330_s0 + $0x287] sm:$0x1] }
 0x183   :  { %7855 = vst [vmem:[#allocation59_spill] sm:$0xff] %v5308_v6  ;;  %v5326_v29 = vld [vmem:[%s6330_s0 + $0x297] sm:$0x1]  ;;  %v5331_v24 = vld [vmem:[%s6330_s0 + $0x2a7] sm:$0x1] }
 0x184   :  { %7860 = vst [vmem:[#allocation77_spill] sm:$0xff] %v5331_v24  ;;  %v5336_v58 = vld [vmem:[%s6330_s0 + $0x2b7] sm:$0x1]  ;;  %v5349_v57 = vld [vmem:[%s6330_s0 + $0x2c7] sm:$0x1] }
 0x185   :  { %7861 = vst [vmem:[#allocation107_spill] sm:$0xff] %v5336_v58  ;;  %v5354_v9 = vld [vmem:[%s6330_s0 + $0x2d7] sm:$0x1]  ;;  %v5359_v4 = vld [vmem:[%s6330_s0 + $0x2e7] sm:$0x1] }
 0x186   :  { %7866 = vst [vmem:[#allocation26_spill] sm:$0xff] %v5354_v9  ;;  %7867 = vst [vmem:[#allocation62_spill] sm:$0xff] %v5359_v4  ;;  %v5364_v21 = vld [vmem:[%s6330_s0 + $0x2f7] sm:$0x1]  ;;  %v5377_v31 = vld [vmem:[%s6330_s0 + $0x307] sm:$0x1] }
 0x187   :  { %7868 = vst [vmem:[#allocation82_spill] sm:$0xff] %v5364_v21  ;;  %v5382_v60 = vld [vmem:[%s6330_s0 + $0x317] sm:$0x1]  ;;  %v5387_v5 = vld [vmem:[%s6330_s0 + $0x327] sm:$0x1] }
 0x188   :  { %7869 = vst [vmem:[#allocation105_spill] sm:$0xff] %v5387_v5  ;;  %v5392_v56 = vld [vmem:[%s6330_s0 + $0x337] sm:$0x1]  ;;  %v5405_v3 = vld [vmem:[%s6330_s0 + $0x347] sm:$0x1] }
 0x189   :  { %7870 = vst [vmem:[#allocation23_spill] sm:$0xff] %v5392_v56  ;;  %v5415_v25 = vld [vmem:[%s6330_s0 + $0x367] sm:$0x1]  ;;  %v5420_v50 = vld [vmem:[%s6330_s0 + $0x377] sm:$0x1] }
 0x18a   :  { %7872 = vst [vmem:[#allocation84_spill] sm:$0xff] %v5415_v25  ;;  %7873 = vst [vmem:[#allocation108_spill] sm:$0xff] %v5420_v50  ;;  %v5433_v20 = vld [vmem:[%s6330_s0 + $0x387] sm:$0x1]  ;;  %v5448_v37 = vld [vmem:[%s6330_s0 + $0x3b7] sm:$0x1] }
 0x18b   :  { %7874 = vst [vmem:[#allocation32_spill] sm:$0xff] %v5433_v20  ;;  %v5443_v47 = vld [vmem:[%s6330_s0 + $0x3a7] sm:$0x1]  ;;  %7877 = vst [vmem:[#allocation106_spill] sm:$0xff] %v5448_v37  ;;  %v5476_v6 = vld [vmem:[%s6330_s0 + $0x3f7] sm:$0x1] }
 0x18c   :  { %7876 = vst [vmem:[#allocation86_spill] sm:$0xff] %v5443_v47  ;;  %v5461_v22 = vld [vmem:[%s6330_s0 + $0x3c7] sm:$0x1]  ;;  %7881 = vst [vmem:[#allocation16_spill] sm:$0xff] %v5476_v6  ;;  %v5494_v32 = vld [vmem:[%s6330_s0 + $0x417] sm:$0x1] }
 0x18d   :  { %7878 = vst [vmem:[#allocation29_spill] sm:$0xff] %v5461_v22  ;;  %v5471_v59 = vld [vmem:[%s6330_s0 + $0x3e7] sm:$0x1]  ;;  %7883 = vst [vmem:[#allocation72_spill] sm:$0xff] %v5494_v32  ;;  %v5504_v58 = vld [vmem:[%s6330_s0 + $0x437] sm:$0x1] }
 0x18e   :  { %7880 = vst [vmem:[#allocation88_spill] sm:$0xff] %v5471_v59  ;;  %v5489_v24 = vld [vmem:[%s6330_s0 + $0x407] sm:$0x1]  ;;  %7885 = vst [vmem:[#allocation114_spill] sm:$0xff] %v5504_v58  ;;  %v5522_v61 = vld [vmem:[%s6330_s0 + $0x457] sm:$0x1]  ;;  %v7902_v58 = vmax.f32 %v7824_v0, %v4993_v62 }
 0x18f   :  { %7882 = vst [vmem:[#allocation34_spill] sm:$0xff] %v5489_v24  ;;  %v5499_v19 = vld [vmem:[%s6330_s0 + $0x427] sm:$0x1]  ;;  %7889 = vst [vmem:[#allocation115_spill] sm:$0xff] %v5522_v61  ;;  %v5532_v48 = vld [vmem:[%s6330_s0 + $0x477] sm:$0x1] }
 0x190   :  { %7884 = vst [vmem:[#allocation90_spill] sm:$0xff] %v5499_v19  ;;  %v5517_v9 = vld [vmem:[%s6330_s0 + $0x447] sm:$0x1]  ;;  %7891 = vst [vmem:[#allocation85_spill] sm:$0xff] %v5532_v48  ;;  %v1088_v5 = vld [vmem:[%s6330_s0 + $0x8] sm:$0x1] }
 0x191   :  { %7888 = vst [vmem:[#allocation31_spill] sm:$0xff] %v5517_v9  ;;  %v5527_v36 = vld [vmem:[%s6330_s0 + $0x467] sm:$0x1]  ;;  %v1089_v21 = vld [vmem:[%s6330_s0 + $0x18] sm:$0x1]  ;;  %v5637_v52 = vmax.f32 %v7902_v58, %v1088_v5  ;;  %v7904_v48 = vld [vmem:[#allocation35_spill] sm:$0xff] }
 0x192   :  { %7890 = vst [vmem:[#allocation116_spill] sm:$0xff] %v5527_v36  ;;  %v1090_v33 = vld [vmem:[%s6330_s0 + $0x28] sm:$0x1]  ;;  %v1091_v27 = vld [vmem:[%s6330_s0 + $0x38] sm:$0x1]  ;;  %v7905_v13 = vld [vmem:[#allocation94_spill] sm:$0xff] }
 0x193   :  { %v1092_v34 = vld [vmem:[%s6330_s0 + $0x48] sm:$0x1]  ;;  %v1093_v46 = vld [vmem:[%s6330_s0 + $0x58] sm:$0x1]  ;;  %7903 = vst [vmem:[#allocation53_spill] sm:$0xff] %v5637_v52  ;;  %v7906_v36 = vmax.f32 %v7904_v48, %v7905_v13  ;;  %v7908_v61 = vld [vmem:[#allocation76_spill] sm:$0xff] }
 0x194   :  { %v1094_v56 = vld [vmem:[%s6330_s0 + $0x68] sm:$0x1]  ;;  %v1095_v4 = vld [vmem:[%s6330_s0 + $0x78] sm:$0x1]  ;;  %v7909_v10 = vld [vmem:[#allocation64_spill] sm:$0xff] }
 0x195   :  { %v1096_v20 = vld [vmem:[%s6330_s0 + $0x88] sm:$0x1]  ;;  %v1097_v55 = vld [vmem:[%s6330_s0 + $0x98] sm:$0x1]  ;;  %v5642_v38 = vmax.f32 %v7906_v36, %v1089_v21  ;;  %v7910_v9 = vmax.f32 %v7908_v61, %v7909_v10  ;;  %v7912_v32 = vld [vmem:[#allocation36_spill] sm:$0xff] }
 0x196   :  { %v1098_v47 = vld [vmem:[%s6330_s0 + $0xa8] sm:$0x1]  ;;  %v1099_v37 = vld [vmem:[%s6330_s0 + $0xb8] sm:$0x1]  ;;  %v7913_v54 = vld [vmem:[#allocation38_spill] sm:$0xff] }
 0x197   :  { %v1100_v22 = vld [vmem:[%s6330_s0 + $0xc8] sm:$0x1]  ;;  %v1101_v30 = vld [vmem:[%s6330_s0 + $0xd8] sm:$0x1]  ;;  %7907 = vst [vmem:[#allocation35_spill] sm:$0xff] %v5642_v38  ;;  %v5647_v39 = vmax.f32 %v7910_v9, %v1090_v33  ;;  %v7914_v24 = vmax.f32 %v7912_v32, %v7913_v54  ;;  %v7916_v33 = vld [vmem:[#allocation24_spill] sm:$0xff] }
 0x198   :  { %v1102_v59 = vld [vmem:[%s6330_s0 + $0xe8] sm:$0x1]  ;;  %v1103_v6 = vld [vmem:[%s6330_s0 + $0xf8] sm:$0x1]  ;;  %v7923_v10 = vld [vmem:[#allocation80_spill] sm:$0xff] }
 0x199   :  { %v1104_v19 = vld [vmem:[%s6330_s0 + $0x108] sm:$0x1]  ;;  %v1105_v8 = vld [vmem:[%s6330_s0 + $0x118] sm:$0x1]  ;;  %7911 = vst [vmem:[#allocation94_spill] sm:$0xff] %v5647_v39  ;;  %v5652_v50 = vmax.f32 %v7914_v24, %v1091_v27  ;;  %v7927_v52 = vld [vmem:[#allocation110_spill] sm:$0xff] }
 0x19a   :  { %v1106_v25 = vld [vmem:[%s6330_s0 + $0x128] sm:$0x1]  ;;  %v1107_v41 = vld [vmem:[%s6330_s0 + $0x138] sm:$0x1] }
 0x19b   :  { %7915 = vst [vmem:[#allocation76_spill] sm:$0xff] %v5652_v50  ;;  %v1108_v62 = vld [vmem:[%s6330_s0 + $0x148] sm:$0x1]  ;;  %v1109_v48 = vld [vmem:[%s6330_s0 + $0x158] sm:$0x1] }
 0x19c   :  { %v1110_v36 = vld [vmem:[%s6330_s0 + $0x168] sm:$0x1]  ;;  %v1111_v61 = vld [vmem:[%s6330_s0 + $0x178] sm:$0x1] }
 0x19d   :  { %v7917_v32 = vld [vmem:[#allocation7_spill] sm:$0xff]  ;;  %v7919_v9 = vld [vmem:[#allocation113_spill] sm:$0xff] }
 0x19e   :  { %v7918_v27 = vmax.f32 %v7916_v33, %v7917_v32  ;;  %v7920_v13 = vld [vmem:[#allocation95_spill] sm:$0xff]  ;;  %v7924_v21 = vld [vmem:[#allocation65_spill] sm:$0xff] }
 0x19f   :  { %v7921_v24 = vmax.f32 %v7919_v9, %v7920_v13  ;;  %v7925_v0 = vmax.f32 %v7923_v10, %v7924_v21  ;;  %v7928_v50 = vld [vmem:[#allocation39_spill] sm:$0xff]  ;;  %v1113_v33 = vld [vmem:[%s6330_s0 + $0x198] sm:$0x1] }
 0x1a0   :  { %v5669_v54 = vmax.f32 %v7918_v27, %v1092_v34  ;;  %v7929_v39 = vmax.f32 %v7927_v52, %v7928_v50  ;;  %v1112_v34 = vld [vmem:[%s6330_s0 + $0x188] sm:$0x1]  ;;  %v7931_v32 = vld [vmem:[#allocation25_spill] sm:$0xff]  ;;  %v7936_v50 = vld [vmem:[#allocation98_spill] sm:$0xff] }
 0x1a1   :  { %v5674_v58 = vmax.f32 %v7921_v24, %v1093_v46  ;;  %v5679_v5 = vmax.f32 %v7925_v0, %v1094_v56  ;;  %v1114_v46 = vld [vmem:[%s6330_s0 + $0x1a8] sm:$0x1]  ;;  %v7932_v56 = vld [vmem:[#allocation12_spill] sm:$0xff]  ;;  %v7935_v52 = vld [vmem:[#allocation49_spill] sm:$0xff] }
 0x1a2   :  { %v5684_v38 = vmax.f32 %v7929_v39, %v1095_v4  ;;  %v7933_v27 = vmax.f32 %v7931_v32, %v7932_v56  ;;  %v7937_v39 = vmax.f32 %v7935_v52, %v7936_v50  ;;  %v7938_v13 = vld [vmem:[#allocation81_spill] sm:$0xff]  ;;  %v7939_v24 = vld [vmem:[#allocation68_spill] sm:$0xff]  ;;  %v7942_v0 = vld [vmem:[#allocation111_spill] sm:$0xff] }
 0x1a3   :  { %7922 = vst [vmem:[#allocation64_spill] sm:$0xff] %v5674_v58  ;;  %7926 = vst [vmem:[#allocation36_spill] sm:$0xff] %v5679_v5  ;;  %v7940_v10 = vmax.f32 %v7938_v13, %v7939_v24  ;;  %v1116_v32 = vld [vmem:[%s6330_s0 + $0x1c8] sm:$0x1]  ;;  %v7946_v56 = vld [vmem:[#allocation22_spill] sm:$0xff] }
 0x1a4   :  { %7930 = vst [vmem:[#allocation38_spill] sm:$0xff] %v5684_v38  ;;  %v5698_v9 = vmax.f32 %v7933_v27, %v1096_v20  ;;  %v5703_v4 = vmax.f32 %v7937_v39, %v1097_v55  ;;  %v7943_v38 = vld [vmem:[#allocation44_spill] sm:$0xff]  ;;  %v1115_v20 = vld [vmem:[%s6330_s0 + $0x1b8] sm:$0x1]  ;;  %v7953_v39 = vld [vmem:[#allocation78_spill] sm:$0xff] }
 0x1a5   :  { %v5708_v21 = vmax.f32 %v7940_v10, %v1098_v47  ;;  %v7944_v5 = vmax.f32 %v7942_v0, %v7943_v38  ;;  %v1117_v55 = vld [vmem:[%s6330_s0 + $0x1d8] sm:$0x1]  ;;  %v7949_v38 = vld [vmem:[#allocation46_spill] sm:$0xff]  ;;  %v7957_v0 = vld [vmem:[#allocation112_spill] sm:$0xff] }
 0x1a6   :  { %7934 = vst [vmem:[#allocation24_spill] sm:$0xff] %v5698_v9  ;;  %v7947_v47 = vld [vmem:[#allocation17_spill] sm:$0xff] }
 0x1a7   :  { %7941 = vst [vmem:[#allocation7_spill] sm:$0xff] %v5708_v21  ;;  %v5713_v58 = vmax.f32 %v7944_v5, %v1099_v37  ;;  %v7948_v27 = vmax.f32 %v7946_v56, %v7947_v47  ;;  %v7950_v37 = vld [vmem:[#allocation99_spill] sm:$0xff]  ;;  %v7954_v13 = vld [vmem:[#allocation73_spill] sm:$0xff] }
 0x1a8   :  { %v7951_v5 = vmax.f32 %v7949_v38, %v7950_v37  ;;  %v7955_v24 = vmax.f32 %v7953_v39, %v7954_v13  ;;  %v7958_v9 = vld [vmem:[#allocation45_spill] sm:$0xff]  ;;  %v7961_v47 = vld [vmem:[#allocation79_spill] sm:$0xff]  ;;  %v7969_v39 = vld [vmem:[#allocation74_spill] sm:$0xff] }
 0x1a9   :  { %7945 = vst [vmem:[#allocation113_spill] sm:$0xff] %v5713_v58  ;;  %v5727_v52 = vmax.f32 %v7948_v27, %v1100_v22  ;;  %v7959_v58 = vmax.f32 %v7957_v0, %v7958_v9  ;;  %v1118_v22 = vld [vmem:[%s6330_s0 + $0x1e8] sm:$0x1]  ;;  %v1119_v56 = vld [vmem:[%s6330_s0 + $0x1f8] sm:$0x1]  ;;  %v7965_v9 = vld [vmem:[#allocation50_spill] sm:$0xff] }
 0x1aa   :  { %v5732_v50 = vmax.f32 %v7951_v5, %v1101_v30  ;;  %v5737_v10 = vmax.f32 %v7955_v24, %v1102_v59  ;;  %v1120_v30 = vld [vmem:[%s6330_s0 + $0x208] sm:$0x1]  ;;  %v7962_v59 = vld [vmem:[#allocation18_spill] sm:$0xff] }
 0x1ab   :  { %v5742_v21 = vmax.f32 %v7959_v58, %v1103_v6  ;;  %v7963_v27 = vmax.f32 %v7961_v47, %v7962_v59  ;;  %v7966_v6 = vld [vmem:[#allocation102_spill] sm:$0xff]  ;;  %v7968_v5 = vld [vmem:[#allocation27_spill] sm:$0xff] }
 0x1ac   :  { %7952 = vst [vmem:[#allocation95_spill] sm:$0xff] %v5732_v50  ;;  %7956 = vst [vmem:[#allocation80_spill] sm:$0xff] %v5737_v10  ;;  %v7967_v58 = vmax.f32 %v7965_v9, %v7966_v6  ;;  %v7970_v13 = vmax.f32 %v7968_v5, %v7969_v39  ;;  %v7972_v0 = vld [vmem:[#allocation2_spill] sm:$0xff]  ;;  %v1122_v47 = vld [vmem:[%s6330_s0 + $0x228] sm:$0x1] }
 0x1ad   :  { %7960 = vst [vmem:[#allocation65_spill] sm:$0xff] %v5742_v21  ;;  %v5756_v38 = vmax.f32 %v7963_v27, %v1104_v19  ;;  %v7973_v21 = vld [vmem:[#allocation52_spill] sm:$0xff]  ;;  %v1121_v19 = vld [vmem:[%s6330_s0 + $0x218] sm:$0x1]  ;;  %v7976_v59 = vld [vmem:[#allocation83_spill] sm:$0xff] }
 0x1ae   :  { %v5761_v37 = vmax.f32 %v7967_v58, %v1105_v8  ;;  %v5766_v24 = vmax.f32 %v7970_v13, %v1106_v25  ;;  %v7974_v10 = vmax.f32 %v7972_v0, %v7973_v21  ;;  %v1123_v8 = vld [vmem:[%s6330_s0 + $0x238] sm:$0x1]  ;;  %v7977_v25 = vld [vmem:[#allocation15_spill] sm:$0xff]  ;;  %v7982_v58 = vld [vmem:[#allocation28_spill] sm:$0xff] }
 0x1af   :  { %7964 = vst [vmem:[#allocation110_spill] sm:$0xff] %v5756_v38  ;;  %v7978_v27 = vmax.f32 %v7976_v59, %v7977_v25  ;;  %v7979_v21 = vld [vmem:[#allocation47_spill] sm:$0xff]  ;;  %v7986_v38 = vld [vmem:[#allocation56_spill] sm:$0xff]  ;;  %v1125_v59 = vld [vmem:[%s6330_s0 + $0x258] sm:$0x1] }
 0x1b0   :  { %7971 = vst [vmem:[#allocation39_spill] sm:$0xff] %v5766_v24  ;;  %v5771_v50 = vmax.f32 %v7974_v10, %v1107_v41  ;;  %v7980_v41 = vld [vmem:[#allocation101_spill] sm:$0xff]  ;;  %v7983_v5 = vld [vmem:[#allocation71_spill] sm:$0xff] }
 0x1b1   :  { %v5785_v9 = vmax.f32 %v7978_v27, %v1108_v62  ;;  %v7981_v10 = vmax.f32 %v7979_v21, %v7980_v41  ;;  %v7984_v39 = vmax.f32 %v7982_v58, %v7983_v5  ;;  %v7985_v0 = vld [vmem:[#allocation3_spill] sm:$0xff] }
 0x1b2   :  { %7975 = vst [vmem:[#allocation25_spill] sm:$0xff] %v5771_v50  ;;  %v7987_v50 = vmax.f32 %v7985_v0, %v7986_v38  ;;  %v1124_v62 = vld [vmem:[%s6330_s0 + $0x248] sm:$0x1]  ;;  %v7990_v38 = vld [vmem:[#allocation33_spill] sm:$0xff] }
 0x1b3   :  { %v5790_v6 = vmax.f32 %v7981_v10, %v1109_v48  ;;  %v5795_v13 = vmax.f32 %v7984_v39, %v1110_v36  ;;  %v1126_v48 = vld [vmem:[%s6330_s0 + $0x268] sm:$0x1]  ;;  %v7988_v36 = vmax.f32 %v7862_v44, %v5209_v63  ;;  %v7993_v10 = vld [vmem:[#allocation4_spill] sm:$0xff]  ;;  %v1127_v63 = vld [vmem:[%s6330_s0 + $0x278] sm:$0x1] }
 0x1b4   :  { %v5800_v24 = vmax.f32 %v7987_v50, %v1111_v61  ;;  %v7989_v61 = vmax.f32 %v7863_v42, %v5214_v15  ;;  %v7991_v27 = vld [vmem:[#allocation19_spill] sm:$0xff]  ;;  %v1129_v15 = vld [vmem:[%s6330_s0 + $0x298] sm:$0x1]  ;;  %v7996_v42 = vmax.f32 %v4781_v43, %v5237_v53 }
 0x1b5   :  { %v5814_v25 = vmax.f32 %v7988_v36, %v1112_v34  ;;  %v7992_v21 = vmax.f32 %v7990_v38, %v7991_v27  ;;  %v7994_v58 = vld [vmem:[#allocation103_spill] sm:$0xff]  ;;  %v8001_v38 = vld [vmem:[#allocation57_spill] sm:$0xff] }
 0x1b6   :  { %v5819_v50 = vmax.f32 %v7989_v61, %v1113_v33  ;;  %v7995_v5 = vmax.f32 %v7993_v10, %v7994_v58  ;;  %v1128_v44 = vld [vmem:[%s6330_s0 + $0x288] sm:$0x1]  ;;  %v5843_v34 = vmax.f32 %v7996_v42, %v1116_v32  ;;  %v7997_v33 = vmax.f32 %v4786_v35, %v5242_v17  ;;  %v1131_v35 = vld [vmem:[%s6330_s0 + $0x2b8] sm:$0x1]  ;;  %v8007_v58 = vld [vmem:[#allocation20_spill] sm:$0xff] }
 0x1b7   :  { %v5824_v41 = vmax.f32 %v7992_v21, %v1114_v46  ;;  %v7999_v0 = vld [vmem:[#allocation75_spill] sm:$0xff]  ;;  %v8004_v17 = vmax.f32 %v4813_v26, %v5265_v7  ;;  %v1133_v26 = vld [vmem:[%s6330_s0 + $0x2d8] sm:$0x1] }
 0x1b8   :  { %v5829_v39 = vmax.f32 %v7995_v5, %v1115_v20  ;;  %v5848_v46 = vmax.f32 %v7997_v33, %v1117_v55  ;;  %v7998_v20 = vld [vmem:[#allocation87_spill] sm:$0xff]  ;;  %v8005_v55 = vmax.f32 %v4818_v45, %v5270_v1  ;;  %v8009_v33 = vld [vmem:[#allocation8_spill] sm:$0xff]  ;;  %v1135_v7 = vld [vmem:[%s6330_s0 + $0x2f8] sm:$0x1]  ;;  %v8012_v1 = vmax.f32 %v4845_v12, %v5293_v40 }
 0x1b9   :  { %v8000_v36 = vmax.f32 %v7998_v20, %v7999_v0  ;;  %v8002_v27 = vld [vmem:[#allocation55_spill] sm:$0xff]  ;;  %v5872_v32 = vmax.f32 %v8004_v17, %v1120_v30  ;;  %v8010_v20 = vld [vmem:[#allocation104_spill] sm:$0xff]  ;;  %v8017_v17 = vld [vmem:[#allocation54_spill] sm:$0xff] }
 0x1ba   :  { %v8003_v21 = vmax.f32 %v8001_v38, %v8002_v27  ;;  %v1130_v43 = vld [vmem:[%s6330_s0 + $0x2a8] sm:$0x1]  ;;  %v8011_v0 = vmax.f32 %v8009_v33, %v8010_v20  ;;  %v5901_v30 = vmax.f32 %v8012_v1, %v1124_v62  ;;  %v8015_v38 = vld [vmem:[#allocation21_spill] sm:$0xff] }
 0x1bb   :  { %v5853_v61 = vmax.f32 %v8000_v36, %v1118_v22  ;;  %v1132_v53 = vld [vmem:[%s6330_s0 + $0x2c8] sm:$0x1]  ;;  %v5877_v22 = vmax.f32 %v8005_v55, %v1121_v19  ;;  %v8013_v19 = vmax.f32 %v4850_v28, %v5298_v51  ;;  %v1137_v28 = vld [vmem:[%s6330_s0 + $0x318] sm:$0x1]  ;;  %v8020_v51 = vmax.f32 %v4877_v18, %v5321_v14 }
 0x1bc   :  { %v5858_v10 = vmax.f32 %v8003_v21, %v1119_v56  ;;  %v8006_v56 = vld [vmem:[#allocation30_spill] sm:$0xff]  ;;  %v5887_v36 = vmax.f32 %v8011_v0, %v1123_v8  ;;  %v1134_v45 = vld [vmem:[%s6330_s0 + $0x2e8] sm:$0x1]  ;;  %v8014_v8 = vld [vmem:[#allocation89_spill] sm:$0xff]  ;;  %v8028_v14 = vmax.f32 %v4909_v49, %v5349_v57 }
 0x1bd   :  { %v8008_v5 = vmax.f32 %v8006_v56, %v8007_v58  ;;  %v8016_v27 = vmax.f32 %v8014_v8, %v8015_v38  ;;  %v8018_v55 = vld [vmem:[#allocation59_spill] sm:$0xff]  ;;  %v5930_v62 = vmax.f32 %v8020_v51, %v1128_v44  ;;  %v8025_v0 = vld [vmem:[#allocation5_spill] sm:$0xff] }
 0x1be   :  { %v8019_v56 = vmax.f32 %v8017_v17, %v8018_v55  ;;  %v1136_v12 = vld [vmem:[%s6330_s0 + $0x308] sm:$0x1]  ;;  %v1139_v18 = vld [vmem:[%s6330_s0 + $0x338] sm:$0x1]  ;;  %v5959_v44 = vmax.f32 %v8028_v14, %v1132_v53  ;;  %v8033_v17 = vld [vmem:[#allocation62_spill] sm:$0xff] }
 0x1bf   :  { %v5882_v42 = vmax.f32 %v8008_v5, %v1122_v47  ;;  %v5906_v47 = vmax.f32 %v8013_v19, %v1125_v59  ;;  %v5911_v21 = vmax.f32 %v8016_v27, %v1126_v48  ;;  %v1138_v40 = vld [vmem:[%s6330_s0 + $0x328] sm:$0x1]  ;;  %v8021_v59 = vmax.f32 %v4882_v2, %v5326_v29  ;;  %v8023_v5 = vld [vmem:[#allocation77_spill] sm:$0xff]  ;;  %v8032_v27 = vld [vmem:[#allocation58_spill] sm:$0xff] }
 0x1c0   :  { %v5916_v58 = vmax.f32 %v8019_v56, %v1127_v63  ;;  %v8022_v63 = vld [vmem:[#allocation40_spill] sm:$0xff]  ;;  %v8026_v1 = vld [vmem:[#allocation107_spill] sm:$0xff]  ;;  %v1141_v29 = vld [vmem:[%s6330_s0 + $0x358] sm:$0x1]  ;;  %v8034_v55 = vmax.f32 %v8032_v27, %v8033_v17 }
 0x1c1   :  { %v5935_v48 = vmax.f32 %v8021_v59, %v1129_v15  ;;  %v8024_v33 = vmax.f32 %v8022_v63, %v8023_v5  ;;  %v8027_v19 = vmax.f32 %v8025_v0, %v8026_v1  ;;  %v1140_v2 = vld [vmem:[%s6330_s0 + $0x348] sm:$0x1]  ;;  %v8035_v51 = vld [vmem:[#allocation37_spill] sm:$0xff]  ;;  %v8036_v59 = vld [vmem:[#allocation82_spill] sm:$0xff] }
 0x1c2   :  { %v8029_v15 = vld [vmem:[#allocation91_spill] sm:$0xff]  ;;  %v5969_v56 = vmax.f32 %v8034_v55, %v1134_v45  ;;  %v8037_v63 = vmax.f32 %v8035_v51, %v8036_v59  ;;  %v1143_v57 = vld [vmem:[%s6330_s0 + $0x378] sm:$0x1]  ;;  %v8051_v51 = vld [vmem:[#allocation84_spill] sm:$0xff] }
 0x1c3   :  { %v5940_v20 = vmax.f32 %v8024_v33, %v1130_v43  ;;  %v5945_v8 = vmax.f32 %v8027_v19, %v1131_v35  ;;  %v8030_v43 = vld [vmem:[#allocation26_spill] sm:$0xff]  ;;  %v1142_v49 = vld [vmem:[%s6330_s0 + $0x368] sm:$0x1]  ;;  %v8040_v0 = vld [vmem:[#allocation9_spill] sm:$0xff] }
 0x1c4   :  { %v8031_v35 = vmax.f32 %v8029_v15, %v8030_v43  ;;  %v5974_v5 = vmax.f32 %v8037_v63, %v1135_v7  ;;  %v1144_v53 = vld [vmem:[%s6330_s0 + $0x388] sm:$0x1]  ;;  %v8039_v7 = vmax.f32 %v4946_v11, %v5382_v60  ;;  %v8041_v1 = vld [vmem:[#allocation105_spill] sm:$0xff]  ;;  %v8043_v15 = vld [vmem:[#allocation92_spill] sm:$0xff]  ;;  %v8046_v60 = vmax.f32 %v4973_v23, %v5405_v3 }
 0x1c5   :  { %v8042_v19 = vmax.f32 %v8040_v0, %v8041_v1  ;;  %v8044_v43 = vld [vmem:[#allocation23_spill] sm:$0xff]  ;;  %v8050_v55 = vld [vmem:[#allocation41_spill] sm:$0xff] }
 0x1c6   :  { %v5964_v38 = vmax.f32 %v8031_v35, %v1133_v26  ;;  %v8038_v26 = vmax.f32 %v4941_v16, %v5377_v31  ;;  %v5993_v33 = vmax.f32 %v8039_v7, %v1137_v28  ;;  %v8045_v35 = vmax.f32 %v8043_v15, %v8044_v43  ;;  %v1145_v16 = vld [vmem:[%s6330_s0 + $0x398] sm:$0x1]  ;;  %v1146_v11 = vld [vmem:[%s6330_s0 + $0x3a8] sm:$0x1]  ;;  %v8047_v28 = vld [vmem:[#allocation60_spill] sm:$0xff] }
 0x1c7   :  { %v5998_v14 = vmax.f32 %v8042_v19, %v1138_v40  ;;  %v1147_v31 = vld [vmem:[%s6330_s0 + $0x3b8] sm:$0x1]  ;;  %v8048_v40 = vld [vmem:[#allocation66_spill] sm:$0xff]  ;;  %v8052_v59 = vmax.f32 %v8050_v55, %v8051_v51  ;;  %v8054_v7 = vld [vmem:[#allocation108_spill] sm:$0xff] }
 0x1c8   :  { %v5988_v45 = vmax.f32 %v8038_v26, %v1136_v12  ;;  %v6003_v27 = vmax.f32 %v8045_v35, %v1139_v18  ;;  %v6017_v12 = vmax.f32 %v8046_v60, %v1140_v2  ;;  %v8049_v18 = vmax.f32 %v8047_v28, %v8048_v40  ;;  %v8053_v26 = vld [vmem:[#allocation6_spill] sm:$0xff]  ;;  %v1148_v23 = vld [vmem:[%s6330_s0 + $0x3c8] sm:$0x1]  ;;  %v1149_v3 = vld [vmem:[%s6330_s0 + $0x3d8] sm:$0x1] }
 0x1c9   :  { %v6027_v63 = vmax.f32 %v8052_v59, %v1142_v49  ;;  %v8055_v0 = vmax.f32 %v8053_v26, %v8054_v7  ;;  %v1150_v2 = vld [vmem:[%s6330_s0 + $0x3e8] sm:$0x1]  ;;  %v8057_v49 = vld [vmem:[#allocation32_spill] sm:$0xff]  ;;  %v8060_v43 = vld [vmem:[#allocation93_spill] sm:$0xff] }
 0x1ca   :  { %v6022_v17 = vmax.f32 %v8049_v18, %v1141_v29  ;;  %v8056_v29 = vld [vmem:[#allocation10_spill] sm:$0xff]  ;;  %v8063_v28 = vld [vmem:[#allocation61_spill] sm:$0xff] }
 0x1cb   :  { %v6032_v1 = vmax.f32 %v8055_v0, %v1143_v57  ;;  %v8058_v19 = vmax.f32 %v8056_v29, %v8057_v49  ;;  %v8061_v57 = vld [vmem:[#allocation63_spill] sm:$0xff]  ;;  %v8064_v40 = vld [vmem:[#allocation86_spill] sm:$0xff] }
 0x1cc   :  { %v8062_v35 = vmax.f32 %v8060_v43, %v8061_v57  ;;  %v8065_v18 = vmax.f32 %v8063_v28, %v8064_v40  ;;  %v8066_v51 = vld [vmem:[#allocation42_spill] sm:$0xff]  ;;  %v1152_v0 = vld [vmem:[%s6330_s0 + $0x408] sm:$0x1]  ;;  %v8073_v43 = vld [vmem:[#allocation96_spill] sm:$0xff] }
 0x1cd   :  { %v6046_v15 = vmax.f32 %v8058_v19, %v1144_v53  ;;  %v8067_v59 = vld [vmem:[#allocation106_spill] sm:$0xff]  ;;  %v1151_v53 = vld [vmem:[%s6330_s0 + $0x3f8] sm:$0x1]  ;;  %v8070_v29 = vld [vmem:[#allocation11_spill] sm:$0xff] }
 0x1ce   :  { %v6051_v60 = vmax.f32 %v8062_v35, %v1145_v16  ;;  %v6056_v55 = vmax.f32 %v8065_v18, %v1146_v11  ;;  %v8068_v26 = vmax.f32 %v8066_v51, %v8067_v59  ;;  %v1153_v16 = vld [vmem:[%s6330_s0 + $0x418] sm:$0x1]  ;;  %v8077_v28 = vld [vmem:[#allocation67_spill] sm:$0xff]  ;;  %v8078_v40 = vld [vmem:[#allocation88_spill] sm:$0xff] }
 0x1cf   :  { %8059 = vst [vmem:[#allocation12_spill] sm:$0xff] %v6046_v15  ;;  %v8071_v11 = vld [vmem:[#allocation29_spill] sm:$0xff]  ;;  %v8079_v18 = vmax.f32 %v8077_v28, %v8078_v40  ;;  %v8081_v59 = vld [vmem:[#allocation43_spill] sm:$0xff]  ;;  %v8093_v40 = vld [vmem:[#allocation90_spill] sm:$0xff] }
 0x1d0   :  { %v6061_v7 = vmax.f32 %v8068_v26, %v1147_v31  ;;  %v8072_v49 = vmax.f32 %v8070_v29, %v8071_v11  ;;  %v8074_v31 = vld [vmem:[#allocation109_spill] sm:$0xff]  ;;  %v8082_v26 = vld [vmem:[#allocation16_spill] sm:$0xff] }
 0x1d1   :  { %v8075_v57 = vmax.f32 %v8073_v43, %v8074_v31  ;;  %v6085_v51 = vmax.f32 %v8079_v18, %v1150_v2  ;;  %v8083_v15 = vmax.f32 %v8081_v59, %v8082_v26  ;;  %v1155_v29 = vld [vmem:[%s6330_s0 + $0x438] sm:$0x1]  ;;  %v8086_v2 = vld [vmem:[#allocation34_spill] sm:$0xff]  ;;  %v8096_v26 = vld [vmem:[#allocation48_spill] sm:$0xff] }
 0x1d2   :  { %8069 = vst [vmem:[#allocation49_spill] sm:$0xff] %v6061_v7  ;;  %v6075_v19 = vmax.f32 %v8072_v49, %v1148_v23  ;;  %v1154_v23 = vld [vmem:[%s6330_s0 + $0x428] sm:$0x1]  ;;  %v8085_v11 = vld [vmem:[#allocation13_spill] sm:$0xff] }
 0x1d3   :  { %v6080_v35 = vmax.f32 %v8075_v57, %v1149_v3  ;;  %8080 = vst [vmem:[#allocation81_spill] sm:$0xff] %v6085_v51  ;;  %v6090_v7 = vmax.f32 %v8083_v15, %v1151_v53  ;;  %v1156_v3 = vld [vmem:[%s6330_s0 + $0x448] sm:$0x1]  ;;  %v8087_v49 = vmax.f32 %v8085_v11, %v8086_v2  ;;  %v8089_v31 = vld [vmem:[#allocation97_spill] sm:$0xff]  ;;  %v8090_v15 = vld [vmem:[#allocation72_spill] sm:$0xff] }
 0x1d4   :  { %v8091_v53 = vmax.f32 %v8089_v31, %v8090_v15  ;;  %v8092_v28 = vld [vmem:[#allocation69_spill] sm:$0xff]  ;;  %v1158_v11 = vld [vmem:[%s6330_s0 + $0x468] sm:$0x1] }
 0x1d5   :  { %8076 = vst [vmem:[#allocation98_spill] sm:$0xff] %v6080_v35  ;;  %8084 = vst [vmem:[#allocation68_spill] sm:$0xff] %v6090_v7  ;;  %v6104_v43 = vmax.f32 %v8087_v49, %v1152_v0  ;;  %v8094_v18 = vmax.f32 %v8092_v28, %v8093_v40  ;;  %v8097_v7 = vld [vmem:[#allocation114_spill] sm:$0xff]  ;;  %v1157_v0 = vld [vmem:[%s6330_s0 + $0x458] sm:$0x1] }
 0x1d6   :  { %v6109_v57 = vmax.f32 %v8091_v53, %v1153_v16  ;;  %v8098_v51 = vmax.f32 %v8096_v26, %v8097_v7  ;;  %v8100_v16 = vld [vmem:[#allocation14_spill] sm:$0xff]  ;;  %v8101_v2 = vld [vmem:[#allocation31_spill] sm:$0xff] }
 0x1d7   :  { %8088 = vst [vmem:[#allocation111_spill] sm:$0xff] %v6104_v43  ;;  %v6114_v59 = vmax.f32 %v8094_v18, %v1154_v23  ;;  %v8102_v49 = vmax.f32 %v8100_v16, %v8101_v2  ;;  %v8104_v23 = vld [vmem:[#allocation100_spill] sm:$0xff]  ;;  %v8105_v15 = vld [vmem:[#allocation115_spill] sm:$0xff]  ;;  %v8108_v7 = vld [vmem:[#allocation70_spill] sm:$0xff] }
 0x1d8   :  { %v6119_v35 = vmax.f32 %v8098_v51, %v1155_v29  ;;  %v8106_v53 = vmax.f32 %v8104_v23, %v8105_v15  ;;  %v8109_v51 = vld [vmem:[#allocation116_spill] sm:$0xff]  ;;  %v8112_v18 = vld [vmem:[#allocation35_spill] sm:$0xff]  ;;  %v1159_v43 = vld [vmem:[%s6330_s0 + $0x478] sm:$0x1]  ;;  %v1313_v15 = vrot.slane %v5669_v54, 4 }
 0x1d9   :  { %8095 = vst [vmem:[#allocation44_spill] sm:$0xff] %v6114_v59  ;;  %v6130_v31 = vmax.f32 %v8102_v49, %v1156_v3  ;;  %v8110_v29 = vmax.f32 %v8108_v7, %v8109_v51  ;;  %v1304_v26 = vrot.slane %v8112_v18, 7  ;;  %v8113_v16 = vld [vmem:[#allocation94_spill] sm:$0xff]  ;;  %v8114_v2 = vld [vmem:[#allocation76_spill] sm:$0xff]  ;;  %v8115_v23 = vld [vmem:[#allocation53_spill] sm:$0xff] }
 0x1da   :  { %8099 = vst [vmem:[#allocation22_spill] sm:$0xff] %v6119_v35  ;;  %v6135_v28 = vmax.f32 %v8106_v53, %v1157_v0  ;;  %v1307_v3 = vrot.slane %v8113_v16, 6  ;;  %v1310_v49 = vrot.slane %v8114_v2, 5  ;;  %v8116_v53 = vld [vmem:[#allocation64_spill] sm:$0xff]  ;;  %v8118_v18 = vld [vmem:[#allocation51_spill] sm:$0xff] }
 0x1db   :  { %8103 = vst [vmem:[#allocation17_spill] sm:$0xff] %v6130_v31  ;;  %v6140_v40 = vmax.f32 %v8110_v29, %v1158_v11  ;;  %v1306_v0 = vsel %vm1305_vm0, %v1304_v26, %v8115_v23  ;;  %v1316_v7 = vrot.slane %v8116_v53, 3  ;;  %v8117_v51 = vld [vmem:[#allocation36_spill] sm:$0xff]  ;;  %v8122_v26 = vld [vmem:[#allocation38_spill] sm:$0xff]  ;;  %v1325_v31 = vrot.slane %v5703_v4, 7  ;;  %v8124_v53 = vld [vmem:[#allocation113_spill] sm:$0xff] }
 0x1dc   :  { %8107 = vst [vmem:[#allocation46_spill] sm:$0xff] %v6135_v28  ;;  %v1309_v11 = vsel %vm1308_vm1, %v1307_v3, %v1306_v0  ;;  %v1319_v29 = vrot.slane %v8117_v51, 2  ;;  %v1322_v23 = vrot.slane %v8122_v26, 1  ;;  %v8123_v3 = vld [vmem:[#allocation7_spill] sm:$0xff]  ;;  %v1329_v35 = vrot.slane %v8124_v53, 5  ;;  %v8127_v26 = vld [vmem:[#allocation80_spill] sm:$0xff] }
 0x1dd   :  { %8111 = vst [vmem:[#allocation99_spill] sm:$0xff] %v6140_v40  ;;  %v8119_v40 = vld [vmem:[#allocation85_spill] sm:$0xff]  ;;  %v1312_v2 = vsel %vm1311_vm2, %v1310_v49, %v1309_v11  ;;  %v1327_v0 = vrot.slane %v8123_v3, 6  ;;  %v8126_v11 = vld [vmem:[#allocation24_spill] sm:$0xff]  ;;  %v1339_v4 = vrot.slane %v5761_v37, 7 }
 0x1de   :  { %v8120_v16 = vmax.f32 %v8118_v18, %v8119_v40  ;;  %v1315_v54 = vsel %vm1314_vm3, %v1313_v15, %v1312_v2  ;;  %v1331_v40 = vrot.slane %v5727_v52, 4  ;;  %v1335_v15 = vrot.slane %v8127_v26, 2  ;;  %v8128_v3 = vld [vmem:[#allocation65_spill] sm:$0xff] }
 0x1df   :  { %v1318_v51 = vsel %vm1317_vm4, %v1316_v7, %v1315_v54  ;;  %v1337_v53 = vrot.slane %v8128_v3, 1  ;;  %v8130_v54 = vld [vmem:[#allocation25_spill] sm:$0xff]  ;;  %v1369_v3 = vrot.slane %v5882_v42, 6 }
 0x1e0   :  { %v6157_v28 = vmax.f32 %v8120_v16, %v1159_v43  ;;  %v8125_v43 = vld [vmem:[#allocation95_spill] sm:$0xff]  ;;  %v1321_v49 = vsel %vm1320_vm5, %v1319_v29, %v1318_v51  ;;  %v1326_v16 = vsel %vm1305_vm0, %v1325_v31, %v8126_v11  ;;  %v1343_v59 = vrot.slane %v8130_v54, 5 }
 0x1e1   :  { %v1333_v18 = vrot.slane %v8125_v43, 3  ;;  %v1328_v2 = vsel %vm1308_vm1, %v1327_v0, %v1326_v16  ;;  %v8131_v43 = vld [vmem:[#allocation110_spill] sm:$0xff]  ;;  %v1345_v51 = vrot.slane %v5785_v9, 4  ;;  %v1347_v31 = vrot.slane %v5790_v6, 3 }
 0x1e2   :  { %8121 = vst [vmem:[#allocation78_spill] sm:$0xff] %v6157_v28  ;;  %v8129_v28 = vld [vmem:[#allocation39_spill] sm:$0xff]  ;;  %v1330_v52 = vsel %vm1311_vm2, %v1329_v35, %v1328_v2  ;;  %v1340_v29 = vsel %vm1305_vm0, %v1339_v4, %v8131_v43  ;;  %v1349_v0 = vrot.slane %v5795_v13, 2  ;;  %v1351_v16 = vrot.slane %v5800_v24, 1 }
 0x1e3   :  { %v1341_v7 = vrot.slane %v8129_v28, 6  ;;  %v1332_v11 = vsel %vm1314_vm3, %v1331_v40, %v1330_v52  ;;  %v1353_v35 = vrot.slane %v5819_v50, 7  ;;  %v1355_v4 = vrot.slane %v5824_v41, 6 }
 0x1e4   :  { %v1334_v28 = vsel %vm1317_vm4, %v1333_v18, %v1332_v11  ;;  %v1357_v40 = vrot.slane %v5829_v39, 5  ;;  %v1359_v2 = vrot.slane %v5843_v34, 4  ;;  %v6195_v13 = vsel %vm1323_vm6, %v1322_v23, %v1321_v49 }
 0x1e5   :  { %v1342_v37 = vsel %vm1308_vm1, %v1341_v7, %v1340_v29  ;;  %v1336_v9 = vsel %vm1320_vm5, %v1335_v15, %v1334_v28  ;;  %v1361_v50 = vrot.slane %v5848_v46, 3  ;;  %v1363_v39 = vrot.slane %v5853_v61, 2  ;;  %1447 = vst.msk [vmem:[%s6331_s1] sm:$0xff] %vm1446_vm7, %v6195_v13 }
 0x1e6   :  { %v1344_v26 = vsel %vm1311_vm2, %v1343_v59, %v1342_v37  ;;  %v1354_v59 = vsel %vm1305_vm0, %v1353_v35, %v5814_v25  ;;  %v6202_v41 = vsel %vm1323_vm6, %v1337_v53, %v1336_v9  ;;  %v1365_v23 = vrot.slane %v5858_v10, 1 }
 0x1e7   :  { %v1346_v6 = vsel %vm1314_vm3, %v1345_v51, %v1344_v26  ;;  %v1356_v15 = vsel %vm1308_vm1, %v1355_v4, %v1354_v59  ;;  %v1367_v49 = vrot.slane %v5877_v22, 7  ;;  %v1371_v53 = vrot.slane %v5887_v36, 5  ;;  %1448 = vst.msk [vmem:[%s6331_s1 + $0x8] sm:$0xff] %vm1446_vm7, %v6202_v41 }
 0x1e8   :  { %v1348_v24 = vsel %vm1317_vm4, %v1347_v31, %v1346_v6  ;;  %v1358_v34 = vsel %vm1311_vm2, %v1357_v40, %v1356_v15  ;;  %v1373_v7 = vrot.slane %v5901_v30, 4  ;;  %v1375_v10 = vrot.slane %v5906_v47, 3  ;;  %v8132_v40 = vld [vmem:[#allocation49_spill] sm:$0xff] }
 0x1e9   :  { %v1350_v18 = vsel %vm1320_vm5, %v1349_v0, %v1348_v24  ;;  %v1360_v46 = vsel %vm1314_vm3, %v1359_v2, %v1358_v34  ;;  %v1368_v61 = vsel %vm1305_vm0, %v1367_v49, %v5872_v32  ;;  %v1377_v22 = vrot.slane %v5911_v21, 2  ;;  %v8133_v24 = vld [vmem:[#allocation12_spill] sm:$0xff] }
 0x1ea   :  { %v6212_v25 = vsel %vm1323_vm6, %v1351_v16, %v1350_v18  ;;  %v1362_v54 = vsel %vm1317_vm4, %v1361_v50, %v1360_v46  ;;  %v1370_v52 = vsel %vm1308_vm1, %v1369_v3, %v1368_v61  ;;  %v1381_v43 = vrot.slane %v5935_v48, 7  ;;  %v8134_v50 = vld [vmem:[#allocation98_spill] sm:$0xff]  ;;  %v8137_v46 = vld [vmem:[#allocation44_spill] sm:$0xff] }
 0x1eb   :  { %v1364_v42 = vsel %vm1320_vm5, %v1363_v39, %v1362_v54  ;;  %v1383_v29 = vrot.slane %v5940_v20, 6  ;;  %v1372_v36 = vsel %vm1311_vm2, %v1371_v53, %v1370_v52  ;;  %v1379_v30 = vrot.slane %v5916_v58, 1  ;;  %v8138_v54 = vld [vmem:[#allocation22_spill] sm:$0xff]  ;;  %v8140_v52 = vld [vmem:[#allocation111_spill] sm:$0xff]  ;;  %1449 = vst.msk [vmem:[%s6331_s1 + $0x10] sm:$0xff] %vm1446_vm7, %v6212_v25 }
 0x1ec   :  { %v1385_v51 = vrot.slane %v5945_v8, 5  ;;  %v1387_v32 = vrot.slane %v5959_v44, 4  ;;  %v1366_v47 = vsel %vm1323_vm6, %v1365_v23, %v1364_v42  ;;  %v1374_v21 = vsel %vm1314_vm3, %v1373_v7, %v1372_v36  ;;  %v8136_v23 = vld [vmem:[#allocation68_spill] sm:$0xff] }
 0x1ed   :  { %v1382_v31 = vsel %vm1305_vm0, %v1381_v43, %v5930_v62  ;;  %v1389_v11 = vrot.slane %v5964_v38, 3  ;;  %v1376_v48 = vsel %vm1317_vm4, %v1375_v10, %v1374_v21  ;;  %v1391_v37 = vrot.slane %v5969_v56, 2  ;;  %v8139_v10 = vld [vmem:[#allocation17_spill] sm:$0xff]  ;;  %1450 = vst.msk [vmem:[%s6331_s1 + $0x18] sm:$0xff] %vm1446_vm7, %v1366_v47 }
 0x1ee   :  { %v1384_v20 = vsel %vm1308_vm1, %v1383_v29, %v1382_v31  ;;  %v1395_v58 = vrot.slane %v5993_v33, 7  ;;  %v1378_v8 = vsel %vm1320_vm5, %v1377_v22, %v1376_v48  ;;  %v1397_v0 = vrot.slane %v5998_v14, 6  ;;  %v8141_v29 = vld [vmem:[#allocation46_spill] sm:$0xff] }
 0x1ef   :  { %v1386_v44 = vsel %vm1311_vm2, %v1385_v51, %v1384_v20  ;;  %v1399_v16 = vrot.slane %v6003_v27, 5  ;;  %v1393_v38 = vrot.slane %v5974_v5, 1  ;;  %v1401_v26 = vrot.slane %v6017_v12, 4  ;;  %v8142_v51 = vld [vmem:[#allocation99_spill] sm:$0xff] }
 0x1f0   :  { %v1388_v62 = vsel %vm1314_vm3, %v1387_v32, %v1386_v44  ;;  %v1396_v28 = vsel %vm1305_vm0, %v1395_v58, %v5988_v45  ;;  %v1403_v35 = vrot.slane %v6022_v17, 3  ;;  %v1405_v4 = vrot.slane %v6027_v63, 2 }
 0x1f1   :  { %v1390_v56 = vsel %vm1317_vm4, %v1389_v11, %v1388_v62  ;;  %v1398_v33 = vsel %vm1308_vm1, %v1397_v0, %v1396_v28  ;;  %v1380_v14 = vsel %vm1323_vm6, %v1379_v30, %v1378_v8  ;;  %v1409_v5 = vrot.slane %v6051_v60, 7  ;;  %v8143_v11 = vld [vmem:[#allocation78_spill] sm:$0xff] }
 0x1f2   :  { %v1392_v27 = vsel %vm1320_vm5, %v1391_v37, %v1390_v56  ;;  %v1400_v9 = vsel %vm1311_vm2, %v1399_v16, %v1398_v33  ;;  %v1407_v12 = vrot.slane %v6032_v1, 1  ;;  %v1411_v6 = vrot.slane %v6056_v55, 6  ;;  %v8135_v1 = vld [vmem:[#allocation81_spill] sm:$0xff]  ;;  %1451 = vst.msk [vmem:[%s6331_s1 + $0x20] sm:$0xff] %vm1446_vm7, %v1380_v14 }
 0x1f3   :  { %v1402_v45 = vsel %vm1314_vm3, %v1401_v26, %v1400_v9  ;;  %v1413_v2 = vrot.slane %v8132_v40, 5  ;;  %v1410_v63 = vsel %vm1305_vm0, %v1409_v5, %v8133_v24  ;;  %v1415_v59 = vrot.slane %v6075_v19, 4 }
 0x1f4   :  { %v1404_v17 = vsel %vm1317_vm4, %v1403_v35, %v1402_v45  ;;  %v1417_v18 = vrot.slane %v8134_v50, 3  ;;  %v1394_v15 = vsel %vm1323_vm6, %v1393_v38, %v1392_v27  ;;  %v1412_v39 = vsel %vm1308_vm1, %v1411_v6, %v1410_v63 }
 0x1f5   :  { %v1406_v60 = vsel %vm1320_vm5, %v1405_v4, %v1404_v17  ;;  %v1419_v34 = vrot.slane %v8135_v1, 2  ;;  %v1414_v55 = vsel %vm1311_vm2, %v1413_v2, %v1412_v39  ;;  %v1421_v49 = vrot.slane %v8136_v23, 1  ;;  %1452 = vst.msk [vmem:[%s6331_s1 + $0x28] sm:$0xff] %vm1446_vm7, %v1394_v15 }
 0x1f6   :  { %v1423_v3 = vrot.slane %v6109_v57, 7  ;;  %v1425_v53 = vrot.slane %v8137_v46, 6  ;;  %v1408_v19 = vsel %vm1323_vm6, %v1407_v12, %v1406_v60  ;;  %v1416_v7 = vsel %vm1314_vm3, %v1415_v59, %v1414_v55 }
 0x1f7   :  { %v1427_v61 = vrot.slane %v8138_v54, 5  ;;  %v1429_v22 = vrot.slane %v8139_v10, 4  ;;  %v1418_v42 = vsel %vm1317_vm4, %v1417_v18, %v1416_v7  ;;  %v1431_v36 = vrot.slane %v8141_v29, 3  ;;  %1453 = vst.msk [vmem:[%s6331_s1 + $0x30] sm:$0xff] %vm1446_vm7, %v1408_v19 }
 0x1f8   :  { %v1424_v43 = vsel %vm1305_vm0, %v1423_v3, %v8140_v52  ;;  %v1420_v30 = vsel %vm1320_vm5, %v1419_v34, %v1418_v42  ;;  %v1433_v32 = vrot.slane %v8142_v51, 2  ;;  %v1435_v48 = vrot.slane %v8143_v11, 1 }
 0x1f9   :  { %v1426_v57 = vsel %vm1308_vm1, %v1425_v53, %v1424_v43  ;;  %v1422_v21 = vsel %vm1323_vm6, %v1421_v49, %v1420_v30 }
 0x1fa   :  { %v1428_v31 = vsel %vm1311_vm2, %v1427_v61, %v1426_v57  ;;  %1454 = vst.msk [vmem:[%s6331_s1 + $0x38] sm:$0xff] %vm1446_vm7, %v1422_v21 }
 0x1fb   :  { %v1430_v13 = vsel %vm1314_vm3, %v1429_v22, %v1428_v31 }
 0x1fc   :  { %v1432_v41 = vsel %vm1317_vm4, %v1431_v36, %v1430_v13 }
 0x1fd   :  { %v1434_v25 = vsel %vm1320_vm5, %v1433_v32, %v1432_v41 }
 0x1fe   :  { %v1436_v47 = vsel %vm1323_vm6, %v1435_v48, %v1434_v25 }
 0x1ff   :  { %1455 = vst.msk [vmem:[%s6331_s1 + $0x40] sm:$0xff] %vm1446_vm7, %v1436_v47 }

// kernel: forward.13
= control target key start
LH: loop header
LB: loop body
LE: loop exit
PB: predicated region body
PF: predicated region fallthrough
CT: control target
= control target key end

     0   :  { %s544_s1 = inlined_call_operand.vmem [shape: bf16[256,128], index: 1, kind: input, shape index: {}]   ;;  %s545_s0 = inlined_call_operand.vmem [shape: bf16[72,256], index: 0, kind: input, shape index: {}]   ;;  %s546_s2 = inlined_call_operand.vmem [shape: f32[1,128], index: 2, kind: input, shape index: {}]   ;;  %s547_s3 = inlined_call_operand.vmem [shape: f32[72,128], index: 3, kind: output, shape index: {}]  }
   0x1   :  { %v389_v0 = vld [vmem:[%s544_s1 + $0x40] sm:$0xff]   ;;  %v391_v2 = vld [vmem:[%s544_s1 + $0x48] sm:$0xff]   ;;  %v393_v4 = vld [vmem:[%s544_s1 + $0x50] sm:$0xff]  }
   0x2   :  { %v390_v1 = vld [vmem:[%s544_s1] sm:$0xff]   ;;  %327 = vmatprep.subr.bf16.mxu0 %v389_v0  ;;  %373 = vmatprep.subr.bf16.mxu1 %v389_v0  ;;  %v392_v3 = vld [vmem:[%s544_s1 + $0x8] sm:$0xff]   ;;  %v394_v5 = vld [vmem:[%s544_s1 + $0x10] sm:$0xff]  }
   0x3   :  { %328 = vmatpush3.bf16.msra.mxu0 %v390_v1  ;;  %381 = vmatpush3.bf16.msra.mxu1 %v390_v1  ;;  %v395_v6 = vld [vmem:[%s544_s1 + $0x58] sm:$0xff]   ;;  %v397_v8 = vld [vmem:[%s544_s1 + $0x60] sm:$0xff]   ;;  %v399_v10 = vld [vmem:[%s544_s1 + $0x68] sm:$0xff]  }
   0x4   :  { %329 = vmatprep.subr.bf16.mxu0 %v391_v2  ;;  %374 = vmatprep.subr.bf16.mxu1 %v391_v2  ;;  %v396_v7 = vld [vmem:[%s544_s1 + $0x18] sm:$0xff]   ;;  %v398_v9 = vld [vmem:[%s544_s1 + $0x20] sm:$0xff]   ;;  %v400_v13 = vld [vmem:[%s544_s1 + $0x28] sm:$0xff]  }
   0x5   :  { %v407_v11 = vld [vmem:[%s545_s0 + $0x4] ss:$8 sps:$4 sm:$0xff]   ;;  %v410_v12 = vld [vmem:[%s545_s0 + $0x34] ss:$8 sps:$4 sm:$0xff]   ;;  %v405_v19 = vld [vmem:[%s545_s0] ss:$8 sps:$4 sm:$0xff]  }
   0x6   :  { %v401_v14 = vld [vmem:[%s544_s1 + $0x70] sm:$0xff]   ;;  %238 = vmatprep.mubr.bf16.mxu0 %v407_v11  ;;  %262 = vmatprep.mubr.bf16.mxu1 %v410_v12  ;;  %v403_v16 = vld [vmem:[%s544_s1 + $0x78] sm:$0xff]   ;;  %v23_v18 = vld [vmem:[%s545_s0 + $0x40] sm:$0xff] }
   0x7   :  { %330 = vmatpush3.bf16.msra.mxu0 %v392_v3  ;;  %382 = vmatpush3.bf16.msra.mxu1 %v392_v3  ;;  %v402_v15 = vld [vmem:[%s544_s1 + $0x30] sm:$0xff]   ;;  %v404_v17 = vld [vmem:[%s544_s1 + $0x38] sm:$0xff]   ;;  %v310_v22 = vcombine.high %v23_v18, %v23_v18  ;;  %v309_v24 = vcombine.low %v23_v18, %v23_v18  ;;  %v415_v25 = vld [vmem:[%s545_s0 + $0x24] ss:$8 sps:$4 sm:$0xff]  }
   0x8   :  { %331 = vmatprep.subr.bf16.mxu0 %v393_v4  ;;  %375 = vmatprep.subr.bf16.mxu1 %v393_v4  ;;  %v408_v20 = vld [vmem:[%s545_s0 + $0x30] ss:$8 sps:$4 sm:$0xff]   ;;  %v411_v21 = vld [vmem:[%s545_s0 + $0x14] ss:$8 sps:$4 sm:$0xff]   ;;  %v418_v26 = vld [vmem:[%s545_s0 + $0x20] ss:$8 sps:$4 sm:$0xff]  }
   0x9   :  { %v413_v23 = vld [vmem:[%s545_s0 + $0x10] ss:$8 sps:$4 sm:$0xff]   ;;  %v300_v29 = vld [vmem:[%s546_s2] ss:$0 sm:$0xff] }
   0xb   :  { %332 = vmatpush3.bf16.msra.mxu0 %v394_v5  ;;  %383 = vmatpush3.bf16.msra.mxu1 %v394_v5 }
   0xc   :  { %333 = vmatprep.subr.bf16.mxu0 %v395_v6  ;;  %376 = vmatprep.subr.bf16.mxu1 %v395_v6 }
   0xf   :  { %334 = vmatpush3.bf16.msra.mxu0 %v396_v7  ;;  %384 = vmatpush3.bf16.msra.mxu1 %v396_v7 }
  0x10   :  { %335 = vmatprep.subr.bf16.mxu0 %v397_v8  ;;  %377 = vmatprep.subr.bf16.mxu1 %v397_v8 }
  0x13   :  { %336 = vmatpush3.bf16.msra.mxu0 %v398_v9  ;;  %385 = vmatpush3.bf16.msra.mxu1 %v398_v9 }
  0x14   :  { %337 = vmatprep.subr.bf16.mxu0 %v399_v10  ;;  %378 = vmatprep.subr.bf16.mxu1 %v399_v10 }
  0x17   :  { %338 = vmatpush3.bf16.msra.mxu0 %v400_v13  ;;  %386 = vmatpush3.bf16.msra.mxu1 %v400_v13 }
  0x18   :  { %339 = vmatprep.subr.bf16.mxu0 %v401_v14  ;;  %379 = vmatprep.subr.bf16.mxu1 %v401_v14 }
  0x1b   :  { %340 = vmatpush3.bf16.msra.mxu0 %v402_v15  ;;  %387 = vmatpush3.bf16.msra.mxu1 %v402_v15 }
  0x1c   :  { %341 = vmatprep.subr.bf16.mxu0 %v403_v16  ;;  %380 = vmatprep.subr.bf16.mxu1 %v403_v16 }
  0x1f   :  { %342 = vmatpush3.bf16.msra.mxu0 %v404_v17  ;;  %388 = vmatpush3.bf16.msra.mxu1 %v404_v17 }
  0x22   :  { %239 = vmatmul.mubr.bf16.vlgmr.msra.gmra.mrb[0].mxu0 %v405_v19  ;;  %263 = vmatmul.mubr.bf16.vlgmr.msra.gmra.mrb[0].mxu1 %v408_v20 }
  0x23   :  { %246 = vmatprep.mubr.bf16.mxu0 %v411_v21  ;;  %270 = vmatprep.mubr.bf16.mxu1 %v310_v22 }
  0x2a   :  { %247 = vmatmul.mubr.bf16.gmra.mrb[4].mxu0 %v413_v23  ;;  %271 = vmatmul.mubr.bf16.gmra.mrb[4].mxu1 %v309_v24 }
  0x2b   :  { %254 = vmatprep.mubr.bf16.mxu0 %v415_v25 }
  0x32   :  { %255 = vmatmul.mubr.bf16.gmra.mrb[8].mxu0 %v418_v26 }
  0xf5   :  { %v343_v27 = vpop.f32.mrb[0].mxu0  ;;  %v361_v28 = vpop.f32.mrb[0].mxu1 }
  0xf6   :  { %v344_v30 = vpop.f32.mrb[1].mxu0  ;;  %v362_v31 = vpop.f32.mrb[1].mxu1 }
  0xf7   :  { %v345_v32 = vadd.f32 %v344_v30, %v343_v27  ;;  %v346_v33 = vpop.f32.mrb[2].mxu0  ;;  %v363_v34 = vadd.f32 %v362_v31, %v361_v28  ;;  %v364_v35 = vpop.f32.mrb[2].mxu1 }
  0xf8   :  { %v347_v36 = vpop.f32.mrb[3].mxu0  ;;  %v365_v37 = vpop.f32.mrb[3].mxu1 }
  0xf9   :  { %v241_v38 = vadd.f32 %v345_v32, %v300_v29  ;;  %v348_v39 = vadd.f32 %v347_v36, %v346_v33  ;;  %v265_v40 = vadd.f32 %v363_v34, %v300_v29  ;;  %v366_v41 = vadd.f32 %v365_v37, %v364_v35 }
  0xfb   :  { %v278_v42 = vmax.f32 %v241_v38, 0.0  ;;  %v244_v43 = vadd.f32 %v348_v39, %v300_v29  ;;  %v284_v44 = vmax.f32 %v265_v40, 0.0  ;;  %v268_v45 = vadd.f32 %v366_v41, %v300_v29 }
  0xfd   :  { %287 = vst [vmem:[%s547_s3] sm:$0xff] %v278_v42  ;;  %v279_v46 = vmax.f32 %v244_v43, 0.0  ;;  %v349_v47 = vpop.f32.mrb[4].mxu0  ;;  %293 = vst [vmem:[%s547_s3 + $0x30] sm:$0xff] %v284_v44  ;;  %v285_v48 = vmax.f32 %v268_v45, 0.0  ;;  %v367_v49 = vpop.f32.mrb[4].mxu1 }
  0xfe   :  { %v350_v50 = vpop.f32.mrb[5].mxu0  ;;  %v368_v51 = vpop.f32.mrb[5].mxu1 }
  0xff   :  { %288 = vst [vmem:[%s547_s3 + $0x8] sm:$0xff] %v279_v46  ;;  %v351_v52 = vadd.f32 %v350_v50, %v349_v47  ;;  %v352_v53 = vpop.f32.mrb[6].mxu0  ;;  %294 = vst [vmem:[%s547_s3 + $0x38] sm:$0xff] %v285_v48  ;;  %v369_v54 = vadd.f32 %v368_v51, %v367_v49  ;;  %v370_v55 = vpop.f32.mrb[6].mxu1 }
 0x100   :  { %v353_v56 = vpop.f32.mrb[7].mxu0  ;;  %v371_v57 = vpop.f32.mrb[7].mxu1 }
 0x101   :  { %v249_v58 = vadd.f32 %v351_v52, %v300_v29  ;;  %v354_v59 = vadd.f32 %v353_v56, %v352_v53  ;;  %v273_v60 = vadd.f32 %v369_v54, %v300_v29 }
 0x103   :  { %v280_v61 = vmax.f32 %v249_v58, 0.0  ;;  %v252_v62 = vadd.f32 %v354_v59, %v300_v29  ;;  %v286_v63 = vmax.f32 %v273_v60, 0.0 }
 0x105   :  { %289 = vst [vmem:[%s547_s3 + $0x10] sm:$0xff] %v280_v61  ;;  %v281_v0 = vmax.f32 %v252_v62, 0.0  ;;  %v355_v1 = vpop.f32.mrb[8].mxu0  ;;  %295 = vst [vmem:[%s547_s3 + $0x40] sm:$0xff] %v286_v63 }
 0x106   :  { %v356_v2 = vpop.f32.mrb[9].mxu0 }
 0x107   :  { %290 = vst [vmem:[%s547_s3 + $0x18] sm:$0xff] %v281_v0  ;;  %v357_v3 = vadd.f32 %v356_v2, %v355_v1  ;;  %v358_v4 = vpop.f32.mrb[10].mxu0 }
 0x108   :  { %v359_v5 = vpop.f32.mrb[11].mxu0 }
 0x109   :  { %v257_v6 = vadd.f32 %v357_v3, %v300_v29  ;;  %v360_v7 = vadd.f32 %v359_v5, %v358_v4 }
 0x10b   :  { %v282_v8 = vmax.f32 %v257_v6, 0.0  ;;  %v260_v9 = vadd.f32 %v360_v7, %v300_v29 }
 0x10d   :  { %291 = vst [vmem:[%s547_s3 + $0x20] sm:$0xff] %v282_v8  ;;  %v283_v10 = vmax.f32 %v260_v9, 0.0 }
 0x10f   :  { %292 = vst [vmem:[%s547_s3 + $0x28] sm:$0xff] %v283_v10 }

// kernel: forward.17
= control target key start
LH: loop header
LB: loop body
LE: loop exit
PB: predicated region body
PF: predicated region fallthrough
CT: control target
= control target key end

     0   :  { %s2334_s1 = inlined_call_operand.vmem [shape: bf16[2048,128], index: 1, kind: input, shape index: {}]   ;;  %s2335_s0 = inlined_call_operand.vmem [shape: bf16[8,2048], index: 0, kind: input, shape index: {}]   ;;  %s2336_s2 = inlined_call_operand.vmem [shape: f32[1,128], index: 2, kind: input, shape index: {}]   ;;  %s2337_s3 = inlined_call_operand.vmem [shape: f32[8,128], index: 3, kind: output, shape index: {}]  }
   0x1   :  { %v1756_v0 = vld [vmem:[%s2334_s1 + $0x40] sm:$0xff]   ;;  %v1760_v4 = vld [vmem:[%s2334_s1 + $0x48] sm:$0xff]   ;;  %v1764_v8 = vld [vmem:[%s2334_s1 + $0x50] sm:$0xff]  }
   0x2   :  { %v1757_v1 = vld [vmem:[%s2334_s1 + $0xc0] sm:$0xff]   ;;  %1580 = vmatprep.subr.bf16.mxu0 %v1756_v0  ;;  %v1761_v5 = vld [vmem:[%s2334_s1 + $0xc8] sm:$0xff]   ;;  %v1765_v9 = vld [vmem:[%s2334_s1 + $0xd0] sm:$0xff]  }
   0x3   :  { %v1758_v2 = vld [vmem:[%s2334_s1] sm:$0xff]   ;;  %1602 = vmatprep.subr.bf16.mxu1 %v1757_v1  ;;  %v1762_v6 = vld [vmem:[%s2334_s1 + $0x8] sm:$0xff]   ;;  %v1766_v10 = vld [vmem:[%s2334_s1 + $0x10] sm:$0xff]  }
   0x4   :  { %v1759_v3 = vld [vmem:[%s2334_s1 + $0x80] sm:$0xff]   ;;  %1581 = vmatpush3.bf16.msra.mxu0 %v1758_v2  ;;  %v1763_v7 = vld [vmem:[%s2334_s1 + $0x88] sm:$0xff]   ;;  %v1767_v11 = vld [vmem:[%s2334_s1 + $0x90] sm:$0xff]  }
   0x5   :  { %1603 = vmatpush3.bf16.msra.mxu1 %v1759_v3  ;;  %1582 = vmatprep.subr.bf16.mxu0 %v1760_v4  ;;  %v1768_v12 = vld [vmem:[%s2334_s1 + $0x58] sm:$0xff]   ;;  %v1772_v16 = vld [vmem:[%s2334_s1 + $0x60] sm:$0xff]   ;;  %v1776_v20 = vld [vmem:[%s2334_s1 + $0x68] sm:$0xff]  }
   0x6   :  { %1604 = vmatprep.subr.bf16.mxu1 %v1761_v5  ;;  %v1769_v13 = vld [vmem:[%s2334_s1 + $0xd8] sm:$0xff]   ;;  %v1773_v17 = vld [vmem:[%s2334_s1 + $0xe0] sm:$0xff]   ;;  %v1777_v21 = vld [vmem:[%s2334_s1 + $0xe8] sm:$0xff]  }
   0x7   :  { %v1770_v14 = vld [vmem:[%s2334_s1 + $0x18] sm:$0xff]   ;;  %v1774_v18 = vld [vmem:[%s2334_s1 + $0x20] sm:$0xff]   ;;  %v1778_v22 = vld [vmem:[%s2334_s1 + $0x28] sm:$0xff]  }
   0x8   :  { %1583 = vmatpush3.bf16.msra.mxu0 %v1762_v6  ;;  %v1771_v15 = vld [vmem:[%s2334_s1 + $0x98] sm:$0xff]   ;;  %v1775_v19 = vld [vmem:[%s2334_s1 + $0xa0] sm:$0xff]   ;;  %v1779_v23 = vld [vmem:[%s2334_s1 + $0xa8] sm:$0xff]  }
   0x9   :  { %1605 = vmatpush3.bf16.msra.mxu1 %v1763_v7  ;;  %1584 = vmatprep.subr.bf16.mxu0 %v1764_v8  ;;  %v1780_v24 = vld [vmem:[%s2334_s1 + $0x70] sm:$0xff]   ;;  %v1784_v28 = vld [vmem:[%s2334_s1 + $0x78] sm:$0xff]   ;;  %v15_v32 = vld [vmem:[%s2335_s0] sm:$0xff] }
   0xa   :  { %1606 = vmatprep.subr.bf16.mxu1 %v1765_v9  ;;  %v1781_v25 = vld [vmem:[%s2334_s1 + $0xf0] sm:$0xff]   ;;  %v1785_v29 = vld [vmem:[%s2334_s1 + $0xf8] sm:$0xff]   ;;  %v16_v33 = vld [vmem:[%s2335_s0 + $0x8] sm:$0xff]  ;;  %v1436_v34 = vcombine.low %v15_v32, %v15_v32  ;;  %v1437_v35 = vcombine.high %v15_v32, %v15_v32 }
   0xb   :  { %v1782_v26 = vld [vmem:[%s2334_s1 + $0x30] sm:$0xff]   ;;  %v1786_v30 = vld [vmem:[%s2334_s1 + $0x38] sm:$0xff]   ;;  %v1438_v36 = vcombine.low %v16_v33, %v16_v33  ;;  %v1439_v37 = vcombine.high %v16_v33, %v16_v33  ;;  %v1792_v38 = vld [vmem:[%s2334_s1 + $0x140] sm:$0xff]  }
   0xc   :  { %1585 = vmatpush3.bf16.msra.mxu0 %v1766_v10  ;;  %v1783_v27 = vld [vmem:[%s2334_s1 + $0xb0] sm:$0xff]   ;;  %v1787_v31 = vld [vmem:[%s2334_s1 + $0xb8] sm:$0xff]   ;;  %v1793_v39 = vld [vmem:[%s2334_s1 + $0x1c0] sm:$0xff]   ;;  %1142 = vmatprep.mubr.bf16.mxu0 %v1437_v35 }
   0xd   :  { %1607 = vmatpush3.bf16.msra.mxu1 %v1767_v11  ;;  %1586 = vmatprep.subr.bf16.mxu0 %v1768_v12  ;;  %v1794_v40 = vld [vmem:[%s2334_s1 + $0x100] sm:$0xff]   ;;  %v1796_v42 = vld [vmem:[%s2334_s1 + $0x148] sm:$0xff]   ;;  %v1800_v46 = vld [vmem:[%s2334_s1 + $0x150] sm:$0xff]  }
   0xe   :  { %1608 = vmatprep.subr.bf16.mxu1 %v1769_v13  ;;  %1182 = vmatprep.mubr.bf16.mxu1 %v1439_v37  ;;  %v1795_v41 = vld [vmem:[%s2334_s1 + $0x180] sm:$0xff]   ;;  %v1797_v43 = vld [vmem:[%s2334_s1 + $0x1c8] sm:$0xff]   ;;  %v1801_v47 = vld [vmem:[%s2334_s1 + $0x1d0] sm:$0xff]  }
   0xf   :  { %v1798_v44 = vld [vmem:[%s2334_s1 + $0x108] sm:$0xff]   ;;  %v1802_v48 = vld [vmem:[%s2334_s1 + $0x110] sm:$0xff]   ;;  %v1804_v50 = vld [vmem:[%s2334_s1 + $0x158] sm:$0xff]  }
  0x10   :  { %1587 = vmatpush3.bf16.msra.mxu0 %v1770_v14  ;;  %v1799_v45 = vld [vmem:[%s2334_s1 + $0x188] sm:$0xff]   ;;  %v1803_v49 = vld [vmem:[%s2334_s1 + $0x190] sm:$0xff]   ;;  %v1805_v51 = vld [vmem:[%s2334_s1 + $0x1d8] sm:$0xff]  }
  0x11   :  { %1609 = vmatpush3.bf16.msra.mxu1 %v1771_v15  ;;  %1588 = vmatprep.subr.bf16.mxu0 %v1772_v16  ;;  %v1806_v52 = vld [vmem:[%s2334_s1 + $0x118] sm:$0xff]   ;;  %v1808_v54 = vld [vmem:[%s2334_s1 + $0x160] sm:$0xff]   ;;  %v1812_v58 = vld [vmem:[%s2334_s1 + $0x168] sm:$0xff]  }
  0x12   :  { %1610 = vmatprep.subr.bf16.mxu1 %v1773_v17  ;;  %v1807_v53 = vld [vmem:[%s2334_s1 + $0x198] sm:$0xff]   ;;  %v1809_v55 = vld [vmem:[%s2334_s1 + $0x1e0] sm:$0xff]   ;;  %v1813_v59 = vld [vmem:[%s2334_s1 + $0x1e8] sm:$0xff]  }
  0x13   :  { %v1810_v56 = vld [vmem:[%s2334_s1 + $0x120] sm:$0xff]   ;;  %v1814_v60 = vld [vmem:[%s2334_s1 + $0x128] sm:$0xff]   ;;  %v1816_v62 = vld [vmem:[%s2334_s1 + $0x170] sm:$0xff]  }
  0x14   :  { %1589 = vmatpush3.bf16.msra.mxu0 %v1774_v18  ;;  %v1811_v57 = vld [vmem:[%s2334_s1 + $0x1a0] sm:$0xff]   ;;  %v1815_v61 = vld [vmem:[%s2334_s1 + $0x1a8] sm:$0xff]   ;;  %v1817_v63 = vld [vmem:[%s2334_s1 + $0x1f0] sm:$0xff]  }
  0x15   :  { %1611 = vmatpush3.bf16.msra.mxu1 %v1775_v19  ;;  %1590 = vmatprep.subr.bf16.mxu0 %v1776_v20  ;;  %v1818_v0 = vld [vmem:[%s2334_s1 + $0x130] sm:$0xff]   ;;  %v1820_v2 = vld [vmem:[%s2334_s1 + $0x178] sm:$0xff]   ;;  %v1828_v12 = vld [vmem:[%s2334_s1 + $0x240] sm:$0xff]  }
  0x16   :  { %1612 = vmatprep.subr.bf16.mxu1 %v1777_v21  ;;  %v1819_v1 = vld [vmem:[%s2334_s1 + $0x1b0] sm:$0xff]   ;;  %v1821_v3 = vld [vmem:[%s2334_s1 + $0x1f8] sm:$0xff]   ;;  %v1829_v13 = vld [vmem:[%s2334_s1 + $0x2c0] sm:$0xff]  }
  0x17   :  { %v1822_v4 = vld [vmem:[%s2334_s1 + $0x138] sm:$0xff]   ;;  %v17_v6 = vld [vmem:[%s2335_s0 + $0x10] sm:$0xff]  ;;  %v1830_v14 = vld [vmem:[%s2334_s1 + $0x200] sm:$0xff]  }
  0x18   :  { %1591 = vmatpush3.bf16.msra.mxu0 %v1778_v22  ;;  %v1823_v5 = vld [vmem:[%s2334_s1 + $0x1b8] sm:$0xff]   ;;  %v1440_v7 = vcombine.low %v17_v6, %v17_v6  ;;  %v1441_v8 = vcombine.high %v17_v6, %v17_v6  ;;  %v1831_v15 = vld [vmem:[%s2334_s1 + $0x280] sm:$0xff]   ;;  %v1832_v16 = vld [vmem:[%s2334_s1 + $0x248] sm:$0xff]  }
  0x19   :  { %1613 = vmatpush3.bf16.msra.mxu1 %v1779_v23  ;;  %1592 = vmatprep.subr.bf16.mxu0 %v1780_v24  ;;  %v18_v9 = vld [vmem:[%s2335_s0 + $0x18] sm:$0xff]  ;;  %v1833_v17 = vld [vmem:[%s2334_s1 + $0x2c8] sm:$0xff]   ;;  %v1836_v20 = vld [vmem:[%s2334_s1 + $0x250] sm:$0xff]  }
  0x1a   :  { %1614 = vmatprep.subr.bf16.mxu1 %v1781_v25  ;;  %v1442_v10 = vcombine.low %v18_v9, %v18_v9  ;;  %v1443_v11 = vcombine.high %v18_v9, %v18_v9  ;;  %v1834_v18 = vld [vmem:[%s2334_s1 + $0x208] sm:$0xff]   ;;  %v1837_v21 = vld [vmem:[%s2334_s1 + $0x2d0] sm:$0xff]   ;;  %v1840_v24 = vld [vmem:[%s2334_s1 + $0x258] sm:$0xff]  }
  0x1b   :  { %v1835_v19 = vld [vmem:[%s2334_s1 + $0x288] sm:$0xff]   ;;  %v1838_v22 = vld [vmem:[%s2334_s1 + $0x210] sm:$0xff]   ;;  %v1841_v25 = vld [vmem:[%s2334_s1 + $0x2d8] sm:$0xff]  }
  0x1c   :  { %1593 = vmatpush3.bf16.msra.mxu0 %v1782_v26  ;;  %v1839_v23 = vld [vmem:[%s2334_s1 + $0x290] sm:$0xff]   ;;  %v1842_v26 = vld [vmem:[%s2334_s1 + $0x218] sm:$0xff]   ;;  %v1848_v32 = vld [vmem:[%s2334_s1 + $0x268] sm:$0xff]  }
  0x1d   :  { %1615 = vmatpush3.bf16.msra.mxu1 %v1783_v27  ;;  %1594 = vmatprep.subr.bf16.mxu0 %v1784_v28  ;;  %v1843_v27 = vld [vmem:[%s2334_s1 + $0x298] sm:$0xff]   ;;  %v1844_v28 = vld [vmem:[%s2334_s1 + $0x260] sm:$0xff]   ;;  %v1849_v33 = vld [vmem:[%s2334_s1 + $0x2e8] sm:$0xff]  }
  0x1e   :  { %1616 = vmatprep.subr.bf16.mxu1 %v1785_v29  ;;  %v1845_v29 = vld [vmem:[%s2334_s1 + $0x2e0] sm:$0xff]   ;;  %v1851_v35 = vld [vmem:[%s2334_s1 + $0x2a8] sm:$0xff]   ;;  %v1853_v37 = vld [vmem:[%s2334_s1 + $0x2f0] sm:$0xff]  }
  0x1f   :  { %v1884_v6 = vld [vmem:[%s2334_s1 + $0x368] sm:$0xff]  }
  0x20   :  { %1595 = vmatpush3.bf16.msra.mxu0 %v1786_v30  ;;  %v1846_v30 = vld [vmem:[%s2334_s1 + $0x220] sm:$0xff]   ;;  %v1887_v9 = vld [vmem:[%s2334_s1 + $0x3a8] sm:$0xff]  }
  0x21   :  { %1617 = vmatpush3.bf16.msra.mxu1 %v1787_v31  ;;  %1624 = vmatprep.subr.bf16.mxu0 %v1792_v38  ;;  %v1847_v31 = vld [vmem:[%s2334_s1 + $0x2a0] sm:$0xff]   ;;  %v1854_v38 = vld [vmem:[%s2334_s1 + $0x230] sm:$0xff]  }
  0x22   :  { %1646 = vmatprep.subr.bf16.mxu1 %v1793_v39  ;;  %v1855_v39 = vld [vmem:[%s2334_s1 + $0x2b0] sm:$0xff]  }
  0x23   :  { %1143 = vmatmul.mubr.bf16.vlgmr.msra.gmra.mrb[0].mxu0 %v1436_v34  ;;  %v1850_v34 = vld [vmem:[%s2334_s1 + $0x228] sm:$0xff]  }
  0x24   :  { %1183 = vmatmul.mubr.bf16.vlgmr.msra.gmra.mrb[0].mxu1 %v1438_v36  ;;  %1625 = vmatpush3.bf16.msra.mxu0 %v1794_v40  ;;  %v1852_v36 = vld [vmem:[%s2334_s1 + $0x270] sm:$0xff]   ;;  %v1856_v40 = vld [vmem:[%s2334_s1 + $0x278] sm:$0xff]  }
  0x25   :  { %1647 = vmatpush3.bf16.msra.mxu1 %v1795_v41  ;;  %1626 = vmatprep.subr.bf16.mxu0 %v1796_v42  ;;  %v1857_v41 = vld [vmem:[%s2334_s1 + $0x2f8] sm:$0xff]  }
  0x26   :  { %1648 = vmatprep.subr.bf16.mxu1 %v1797_v43  ;;  %1222 = vmatprep.mubr.bf16.mxu0 %v1441_v8  ;;  %v1858_v42 = vld [vmem:[%s2334_s1 + $0x238] sm:$0xff]   ;;  %v1886_v8 = vld [vmem:[%s2334_s1 + $0x328] sm:$0xff]  }
  0x27   :  { %1262 = vmatprep.mubr.bf16.mxu1 %v1443_v11  ;;  %v1859_v43 = vld [vmem:[%s2334_s1 + $0x2b8] sm:$0xff]   ;;  %v1889_v11 = vld [vmem:[%s2334_s1 + $0x3f0] sm:$0xff]  }
  0x28   :  { %1627 = vmatpush3.bf16.msra.mxu0 %v1798_v44  ;;  %v19_v44 = vld [vmem:[%s2335_s0 + $0x20] sm:$0xff] }
  0x29   :  { %1649 = vmatpush3.bf16.msra.mxu1 %v1799_v45  ;;  %1628 = vmatprep.subr.bf16.mxu0 %v1800_v46  ;;  %v20_v45 = vld [vmem:[%s2335_s0 + $0x28] sm:$0xff]  ;;  %v1444_v46 = vcombine.low %v19_v44, %v19_v44 }
  0x2a   :  { %1650 = vmatprep.subr.bf16.mxu1 %v1801_v47  ;;  %v1445_v47 = vcombine.high %v19_v44, %v19_v44 }
  0x2c   :  { %1629 = vmatpush3.bf16.msra.mxu0 %v1802_v48  ;;  %v1446_v48 = vcombine.low %v20_v45, %v20_v45 }
  0x2d   :  { %1651 = vmatpush3.bf16.msra.mxu1 %v1803_v49  ;;  %1630 = vmatprep.subr.bf16.mxu0 %v1804_v50  ;;  %v1447_v49 = vcombine.high %v20_v45, %v20_v45  ;;  %v1864_v50 = vld [vmem:[%s2334_s1 + $0x340] sm:$0xff]  }
  0x2e   :  { %1652 = vmatprep.subr.bf16.mxu1 %v1805_v51  ;;  %v1865_v51 = vld [vmem:[%s2334_s1 + $0x3c0] sm:$0xff]  }
  0x30   :  { %1631 = vmatpush3.bf16.msra.mxu0 %v1806_v52  ;;  %v1866_v52 = vld [vmem:[%s2334_s1 + $0x300] sm:$0xff]  }
  0x31   :  { %1653 = vmatpush3.bf16.msra.mxu1 %v1807_v53  ;;  %1632 = vmatprep.subr.bf16.mxu0 %v1808_v54  ;;  %v1867_v53 = vld [vmem:[%s2334_s1 + $0x380] sm:$0xff]   ;;  %v1868_v54 = vld [vmem:[%s2334_s1 + $0x348] sm:$0xff]  }
  0x32   :  { %1654 = vmatprep.subr.bf16.mxu1 %v1809_v55  ;;  %v1869_v55 = vld [vmem:[%s2334_s1 + $0x3c8] sm:$0xff]  }
  0x34   :  { %1633 = vmatpush3.bf16.msra.mxu0 %v1810_v56  ;;  %v1870_v56 = vld [vmem:[%s2334_s1 + $0x308] sm:$0xff]  }
  0x35   :  { %1655 = vmatpush3.bf16.msra.mxu1 %v1811_v57  ;;  %1634 = vmatprep.subr.bf16.mxu0 %v1812_v58  ;;  %v1871_v57 = vld [vmem:[%s2334_s1 + $0x388] sm:$0xff]   ;;  %v1872_v58 = vld [vmem:[%s2334_s1 + $0x350] sm:$0xff]  }
  0x36   :  { %1656 = vmatprep.subr.bf16.mxu1 %v1813_v59  ;;  %v1873_v59 = vld [vmem:[%s2334_s1 + $0x3d0] sm:$0xff]  }
  0x38   :  { %1635 = vmatpush3.bf16.msra.mxu0 %v1814_v60  ;;  %v1874_v60 = vld [vmem:[%s2334_s1 + $0x310] sm:$0xff]  }
  0x39   :  { %1657 = vmatpush3.bf16.msra.mxu1 %v1815_v61  ;;  %1636 = vmatprep.subr.bf16.mxu0 %v1816_v62  ;;  %v1875_v61 = vld [vmem:[%s2334_s1 + $0x390] sm:$0xff]   ;;  %v1876_v62 = vld [vmem:[%s2334_s1 + $0x358] sm:$0xff]  }
  0x3a   :  { %1658 = vmatprep.subr.bf16.mxu1 %v1817_v63  ;;  %v1877_v63 = vld [vmem:[%s2334_s1 + $0x3d8] sm:$0xff]  }
  0x3c   :  { %1637 = vmatpush3.bf16.msra.mxu0 %v1818_v0  ;;  %v1878_v0 = vld [vmem:[%s2334_s1 + $0x318] sm:$0xff]  }
  0x3d   :  { %1659 = vmatpush3.bf16.msra.mxu1 %v1819_v1  ;;  %1638 = vmatprep.subr.bf16.mxu0 %v1820_v2  ;;  %v1879_v1 = vld [vmem:[%s2334_s1 + $0x398] sm:$0xff]   ;;  %v1880_v2 = vld [vmem:[%s2334_s1 + $0x360] sm:$0xff]  }
  0x3e   :  { %1660 = vmatprep.subr.bf16.mxu1 %v1821_v3  ;;  %v1881_v3 = vld [vmem:[%s2334_s1 + $0x3e0] sm:$0xff]  }
  0x40   :  { %1639 = vmatpush3.bf16.msra.mxu0 %v1822_v4  ;;  %v1882_v4 = vld [vmem:[%s2334_s1 + $0x320] sm:$0xff]  }
  0x41   :  { %1661 = vmatpush3.bf16.msra.mxu1 %v1823_v5  ;;  %1668 = vmatprep.subr.bf16.mxu0 %v1828_v12  ;;  %v1883_v5 = vld [vmem:[%s2334_s1 + $0x3a0] sm:$0xff]   ;;  %v1890_v12 = vld [vmem:[%s2334_s1 + $0x330] sm:$0xff]  }
  0x42   :  { %1690 = vmatprep.subr.bf16.mxu1 %v1829_v13  ;;  %v1891_v13 = vld [vmem:[%s2334_s1 + $0x3b0] sm:$0xff]  }
  0x43   :  { %1223 = vmatmul.mubr.bf16.vlgmr.msra.gmra.mrb[4].mxu0 %v1440_v7  ;;  %v1885_v7 = vld [vmem:[%s2334_s1 + $0x3e8] sm:$0xff]  }
  0x44   :  { %1263 = vmatmul.mubr.bf16.vlgmr.msra.gmra.mrb[4].mxu1 %v1442_v10  ;;  %1669 = vmatpush3.bf16.msra.mxu0 %v1830_v14  ;;  %v1888_v10 = vld [vmem:[%s2334_s1 + $0x370] sm:$0xff]   ;;  %v1892_v14 = vld [vmem:[%s2334_s1 + $0x378] sm:$0xff]  }
  0x45   :  { %1691 = vmatpush3.bf16.msra.mxu1 %v1831_v15  ;;  %1670 = vmatprep.subr.bf16.mxu0 %v1832_v16  ;;  %v1893_v15 = vld [vmem:[%s2334_s1 + $0x3f8] sm:$0xff]  }
  0x46   :  { %1692 = vmatprep.subr.bf16.mxu1 %v1833_v17  ;;  %1302 = vmatprep.mubr.bf16.mxu0 %v1445_v47  ;;  %v1894_v16 = vld [vmem:[%s2334_s1 + $0x338] sm:$0xff]  }
  0x47   :  { %1342 = vmatprep.mubr.bf16.mxu1 %v1447_v49  ;;  %v1895_v17 = vld [vmem:[%s2334_s1 + $0x3b8] sm:$0xff]  }
  0x48   :  { %1671 = vmatpush3.bf16.msra.mxu0 %v1834_v18  ;;  %v21_v18 = vld [vmem:[%s2335_s0 + $0x30] sm:$0xff] }
  0x49   :  { %1693 = vmatpush3.bf16.msra.mxu1 %v1835_v19  ;;  %1672 = vmatprep.subr.bf16.mxu0 %v1836_v20  ;;  %v22_v19 = vld [vmem:[%s2335_s0 + $0x38] sm:$0xff]  ;;  %v1448_v20 = vcombine.low %v21_v18, %v21_v18 }
  0x4a   :  { %1694 = vmatprep.subr.bf16.mxu1 %v1837_v21  ;;  %v1449_v21 = vcombine.high %v21_v18, %v21_v18 }
  0x4c   :  { %1673 = vmatpush3.bf16.msra.mxu0 %v1838_v22  ;;  %v1450_v22 = vcombine.low %v22_v19, %v22_v19 }
  0x4d   :  { %1695 = vmatpush3.bf16.msra.mxu1 %v1839_v23  ;;  %1674 = vmatprep.subr.bf16.mxu0 %v1840_v24  ;;  %v1451_v23 = vcombine.high %v22_v19, %v22_v19 }
  0x4e   :  { %1696 = vmatprep.subr.bf16.mxu1 %v1841_v25 }
  0x50   :  { %1675 = vmatpush3.bf16.msra.mxu0 %v1842_v26  ;;  %v1435_v26 = vld [vmem:[%s2336_s2] ss:$0 sm:$0xff] }
  0x51   :  { %1697 = vmatpush3.bf16.msra.mxu1 %v1843_v27  ;;  %1676 = vmatprep.subr.bf16.mxu0 %v1844_v28 }
  0x52   :  { %1698 = vmatprep.subr.bf16.mxu1 %v1845_v29 }
  0x54   :  { %1677 = vmatpush3.bf16.msra.mxu0 %v1846_v30 }
  0x55   :  { %1699 = vmatpush3.bf16.msra.mxu1 %v1847_v31  ;;  %1678 = vmatprep.subr.bf16.mxu0 %v1848_v32 }
  0x56   :  { %1700 = vmatprep.subr.bf16.mxu1 %v1849_v33 }
  0x58   :  { %1679 = vmatpush3.bf16.msra.mxu0 %v1850_v34 }
  0x59   :  { %1701 = vmatpush3.bf16.msra.mxu1 %v1851_v35  ;;  %1680 = vmatprep.subr.bf16.mxu0 %v1852_v36 }
  0x5a   :  { %1702 = vmatprep.subr.bf16.mxu1 %v1853_v37 }
  0x5c   :  { %1681 = vmatpush3.bf16.msra.mxu0 %v1854_v38 }
  0x5d   :  { %1703 = vmatpush3.bf16.msra.mxu1 %v1855_v39  ;;  %1682 = vmatprep.subr.bf16.mxu0 %v1856_v40 }
  0x5e   :  { %1704 = vmatprep.subr.bf16.mxu1 %v1857_v41 }
  0x60   :  { %1683 = vmatpush3.bf16.msra.mxu0 %v1858_v42 }
  0x61   :  { %1705 = vmatpush3.bf16.msra.mxu1 %v1859_v43  ;;  %1712 = vmatprep.subr.bf16.mxu0 %v1864_v50 }
  0x62   :  { %1734 = vmatprep.subr.bf16.mxu1 %v1865_v51 }
  0x63   :  { %1303 = vmatmul.mubr.bf16.vlgmr.msra.gmra.mrb[8].mxu0 %v1444_v46 }
  0x64   :  { %1343 = vmatmul.mubr.bf16.vlgmr.msra.gmra.mrb[8].mxu1 %v1446_v48  ;;  %1713 = vmatpush3.bf16.msra.mxu0 %v1866_v52 }
  0x65   :  { %1735 = vmatpush3.bf16.msra.mxu1 %v1867_v53  ;;  %1714 = vmatprep.subr.bf16.mxu0 %v1868_v54 }
  0x66   :  { %1736 = vmatprep.subr.bf16.mxu1 %v1869_v55  ;;  %1382 = vmatprep.mubr.bf16.mxu0 %v1449_v21 }
  0x67   :  { %1422 = vmatprep.mubr.bf16.mxu1 %v1451_v23 }
  0x68   :  { %1715 = vmatpush3.bf16.msra.mxu0 %v1870_v56 }
  0x69   :  { %1737 = vmatpush3.bf16.msra.mxu1 %v1871_v57  ;;  %1716 = vmatprep.subr.bf16.mxu0 %v1872_v58 }
  0x6a   :  { %1738 = vmatprep.subr.bf16.mxu1 %v1873_v59 }
  0x6c   :  { %1717 = vmatpush3.bf16.msra.mxu0 %v1874_v60 }
  0x6d   :  { %1739 = vmatpush3.bf16.msra.mxu1 %v1875_v61  ;;  %1718 = vmatprep.subr.bf16.mxu0 %v1876_v62 }
  0x6e   :  { %1740 = vmatprep.subr.bf16.mxu1 %v1877_v63 }
  0x70   :  { %1719 = vmatpush3.bf16.msra.mxu0 %v1878_v0 }
  0x71   :  { %1741 = vmatpush3.bf16.msra.mxu1 %v1879_v1  ;;  %1720 = vmatprep.subr.bf16.mxu0 %v1880_v2 }
  0x72   :  { %1742 = vmatprep.subr.bf16.mxu1 %v1881_v3 }
  0x74   :  { %1721 = vmatpush3.bf16.msra.mxu0 %v1882_v4 }
  0x75   :  { %1743 = vmatpush3.bf16.msra.mxu1 %v1883_v5  ;;  %1722 = vmatprep.subr.bf16.mxu0 %v1884_v6 }
  0x76   :  { %1744 = vmatprep.subr.bf16.mxu1 %v1885_v7 }
  0x78   :  { %1723 = vmatpush3.bf16.msra.mxu0 %v1886_v8 }
  0x79   :  { %1745 = vmatpush3.bf16.msra.mxu1 %v1887_v9  ;;  %1724 = vmatprep.subr.bf16.mxu0 %v1888_v10 }
  0x7a   :  { %1746 = vmatprep.subr.bf16.mxu1 %v1889_v11 }
  0x7c   :  { %1725 = vmatpush3.bf16.msra.mxu0 %v1890_v12 }
  0x7d   :  { %1747 = vmatpush3.bf16.msra.mxu1 %v1891_v13  ;;  %1726 = vmatprep.subr.bf16.mxu0 %v1892_v14 }
  0x7e   :  { %1748 = vmatprep.subr.bf16.mxu1 %v1893_v15 }
  0x80   :  { %1727 = vmatpush3.bf16.msra.mxu0 %v1894_v16 }
  0x81   :  { %1749 = vmatpush3.bf16.msra.mxu1 %v1895_v17 }
  0x83   :  { %1383 = vmatmul.mubr.bf16.vlgmr.msra.gmra.mrb[12].mxu0 %v1448_v20 }
  0x84   :  { %1423 = vmatmul.mubr.bf16.vlgmr.msra.gmra.mrb[12].mxu1 %v1450_v22 }
  0xf6   :  { %v1596_v24 = vpop.f32.mrb[0].mxu0 }
  0xf7   :  { %v1618_v25 = vpop.f32.mrb[0].mxu1  ;;  %v1597_v27 = vpop.f32.mrb[1].mxu0 }
  0xf8   :  { %v1619_v28 = vpop.f32.mrb[1].mxu1  ;;  %v1598_v29 = vadd.f32 %v1597_v27, %v1596_v24  ;;  %v1599_v31 = vpop.f32.mrb[2].mxu0 }
  0xf9   :  { %v1620_v30 = vadd.f32 %v1619_v28, %v1618_v25  ;;  %v1621_v32 = vpop.f32.mrb[2].mxu1  ;;  %v1600_v33 = vpop.f32.mrb[3].mxu0 }
  0xfa   :  { %v1622_v34 = vpop.f32.mrb[3].mxu1  ;;  %v1145_v35 = vadd.f32 %v1598_v29, %v1435_v26 }
  0xfc   :  { %v1185_v36 = vadd.f32 %v1620_v30, %v1145_v35 }
 0x116   :  { %v1640_v37 = vpop.f32.mrb[4].mxu0 }
 0x117   :  { %v1662_v38 = vpop.f32.mrb[4].mxu1  ;;  %v1641_v39 = vpop.f32.mrb[5].mxu0 }
 0x118   :  { %v1663_v40 = vpop.f32.mrb[5].mxu1  ;;  %v1642_v41 = vadd.f32 %v1641_v39, %v1640_v37  ;;  %v1643_v43 = vpop.f32.mrb[6].mxu0 }
 0x119   :  { %v1664_v42 = vadd.f32 %v1663_v40, %v1662_v38  ;;  %v1665_v44 = vpop.f32.mrb[6].mxu1  ;;  %v1644_v45 = vpop.f32.mrb[7].mxu0 }
 0x11a   :  { %v1666_v46 = vpop.f32.mrb[7].mxu1  ;;  %v1225_v47 = vadd.f32 %v1642_v41, %v1185_v36 }
 0x11c   :  { %v1265_v48 = vadd.f32 %v1664_v42, %v1225_v47 }
 0x136   :  { %v1684_v49 = vpop.f32.mrb[8].mxu0 }
 0x137   :  { %v1706_v50 = vpop.f32.mrb[8].mxu1  ;;  %v1685_v51 = vpop.f32.mrb[9].mxu0 }
 0x138   :  { %v1686_v52 = vadd.f32 %v1685_v51, %v1684_v49  ;;  %v1707_v53 = vpop.f32.mrb[9].mxu1  ;;  %v1687_v54 = vpop.f32.mrb[10].mxu0 }
 0x139   :  { %v1708_v55 = vadd.f32 %v1707_v53, %v1706_v50  ;;  %v1709_v56 = vpop.f32.mrb[10].mxu1  ;;  %v1688_v57 = vpop.f32.mrb[11].mxu0 }
 0x13a   :  { %v1305_v58 = vadd.f32 %v1686_v52, %v1265_v48  ;;  %v1710_v59 = vpop.f32.mrb[11].mxu1 }
 0x13c   :  { %v1345_v60 = vadd.f32 %v1708_v55, %v1305_v58 }
 0x156   :  { %v1728_v61 = vpop.f32.mrb[12].mxu0 }
 0x157   :  { %v1750_v62 = vpop.f32.mrb[12].mxu1  ;;  %v1729_v63 = vpop.f32.mrb[13].mxu0 }
 0x158   :  { %v1730_v0 = vadd.f32 %v1729_v63, %v1728_v61  ;;  %v1751_v1 = vpop.f32.mrb[13].mxu1  ;;  %v1731_v2 = vpop.f32.mrb[14].mxu0 }
 0x159   :  { %v1752_v3 = vadd.f32 %v1751_v1, %v1750_v62  ;;  %v1753_v4 = vpop.f32.mrb[14].mxu1  ;;  %v1732_v5 = vpop.f32.mrb[15].mxu0 }
 0x15a   :  { %v1385_v6 = vadd.f32 %v1730_v0, %v1345_v60  ;;  %v1754_v7 = vpop.f32.mrb[15].mxu1 }
 0x15c   :  { %v1425_v8 = vadd.f32 %v1752_v3, %v1385_v6 }
 0x15e   :  { %1430 = vst [vmem:[%s2337_s3] sm:$0xff] %v1425_v8 }

</bundles_post_ra>
